<compile_context>
chip_gen: v7x
topology: tpu7x:2x2x1
jax: 0.10.0
libtpu: 0.0.40
codegen_flags: <defaults>
</compile_context>

<pallas_src>
import functools

import jax
import jax.numpy as jnp
from jax import lax
from jax.experimental import pallas as pl
from jax.experimental.pallas import tpu as pltpu

LANE = 128          # output-channel padding granularity (lane width)
TILE_M_DEFAULT = 512
TILE_K_DEFAULT = 2048


def _round_up(x, m):
    return ((x + m - 1) // m) * m


# ----------------------------------------------------------------------------
# Pallas kernel: tiled matmul + per-channel affine (folded BN) + LeakyReLU(0.2)
#   grid = (M_tiles, K_tiles); K axis last, "arbitrary"; f32 accumulator scratch.
# ----------------------------------------------------------------------------
def _conv_bn_lrelu_kernel(p_ref, w_ref, s_ref, b_ref, o_ref, acc_ref):
    k = pl.program_id(1)

    @pl.when(k == 0)
    def _init():
        acc_ref[...] = jnp.zeros_like(acc_ref)

    acc_ref[...] += jnp.dot(p_ref[...], w_ref[...],
                            preferred_element_type=jnp.float32)

    @pl.when(k == pl.num_programs(1) - 1)
    def _finalize():
        y = acc_ref[...] * s_ref[...] + b_ref[...]
        o_ref[...] = jnp.where(y > 0, y, 0.2 * y).astype(o_ref.dtype)


def _fused_conv_layer(x_nhwc, wmat, scale2d, bias2d, *, out_dtype,
                      tile_m=TILE_M_DEFAULT, tile_k=TILE_K_DEFAULT):
    """One Conv2d(k=4, s=2, p=1, bias=False) + folded-BN + LeakyReLU(0.2) layer.

    x_nhwc : (N, H, W, Cin_pad) activations (channel-padded)
    wmat   : (K=16*Cin_pad, Cout_pad) bf16 reshaped conv weight
    scale2d/bias2d : (1, Cout_pad) f32 folded BatchNorm affine
    """
    N, H, W, C = x_nhwc.shape
    K, Cout = wmat.shape
    assert K == 16 * C, (K, C)
    assert H % 2 == 0 and W % 2 == 0, "even spatial dims required (stride 2, pad 1, k 4)"
    Ho, Wo = H // 2, W // 2
    M = N * Ho * Wo

    # ---- glue: im2col (pad=1, stride=2), patch order (kh, kw, cin), in bf16 ----
    xb = x_nhwc.astype(jnp.bfloat16)
    xp = jnp.pad(xb, ((0, 0), (1, 1), (1, 1), (0, 0)))
    slices = [xp[:, kh:kh + 2 * Ho:2, kw:kw + 2 * Wo:2, :]
              for kh in range(4) for kw in range(4)]
    patches = jnp.stack(slices, axis=3).reshape(M, K)        # (M, K) bf16

    # ---- tiling ----
    tm = min(tile_m, _round_up(M, 8))
    Mp = _round_up(M, tm)
    if Mp != M:
        patches = jnp.pad(patches, ((0, Mp - M), (0, 0)))
    tk = tile_k if (K > tile_k and K % tile_k == 0) else K
    grid = (Mp // tm, K // tk)

    # explicit VMEM budget (double-buffered bf16 inputs + out + accumulator)
    out_bytes = jnp.dtype(out_dtype).itemsize
    est_vmem = (2 * (tm * tk + tk * Cout) * 2          # bf16 inputs, 2 buffers each
                + 2 * (tm * Cout) * out_bytes          # out, 2 buffers
                + (tm * Cout) * 4                      # f32 accumulator scratch
                + 2 * Cout * 4 * 2)                    # scale/bias
    vmem_limit = int(min(max(2 * est_vmem, 32 * 1024 * 1024), 96 * 1024 * 1024))

    cost = pl.CostEstimate(
        flops=2 * Mp * K * Cout,
        transcendentals=0,
        bytes_accessed=Mp * K * 2 + K * Cout * 2 + Mp * Cout * out_bytes + 2 * Cout * 4,
    )

    out = pl.pallas_call(
        _conv_bn_lrelu_kernel,
        out_shape=jax.ShapeDtypeStruct((Mp, Cout), out_dtype),
        grid_spec=pltpu.PrefetchScalarGridSpec(
            num_scalar_prefetch=0,
            grid=grid,
            in_specs=[
                pl.BlockSpec((tm, tk), lambda i, k: (i, k)),
                pl.BlockSpec((tk, Cout), lambda i, k: (k, 0)),
                pl.BlockSpec((1, Cout), lambda i, k: (0, 0)),
                pl.BlockSpec((1, Cout), lambda i, k: (0, 0)),
            ],
            out_specs=pl.BlockSpec((tm, Cout), lambda i, k: (i, 0)),
            scratch_shapes=[pltpu.VMEM((tm, Cout), jnp.float32)],
        ),
        compiler_params=pltpu.CompilerParams(
            dimension_semantics=("parallel", "arbitrary"),
            vmem_limit_bytes=vmem_limit),
        cost_estimate=cost,
    )(patches, wmat, scale2d, bias2d)

    return out[:M].reshape(N, Ho, Wo, Cout)


# ----------------------------------------------------------------------------
# Parameter construction (deterministic, in-script)
# ----------------------------------------------------------------------------
def init_params(key, df_dim):
    ndf = df_dim
    chans = [(3, ndf), (ndf, ndf * 2), (ndf * 2, ndf * 4), (ndf * 4, ndf * 8)]
    params = []
    eps = 1e-5
    for li, (cin, cout) in enumerate(chans):
        key, kw, kg, kb, km, kv = jax.random.split(key, 6)
        w = 0.02 * jax.random.normal(kw, (cout, cin, 4, 4), dtype=jnp.float32)
        if li == 0:
            # no BatchNorm after the first conv -> identity affine
            scale = jnp.ones((cout,), jnp.float32)
            bias = jnp.zeros((cout,), jnp.float32)
        else:
            gamma = 1.0 + 0.1 * jax.random.normal(kg, (cout,), dtype=jnp.float32)
            beta = 0.1 * jax.random.normal(kb, (cout,), dtype=jnp.float32)
            rmean = 0.1 * jax.random.normal(km, (cout,), dtype=jnp.float32)
            rvar = jnp.abs(1.0 + 0.1 * jax.random.normal(kv, (cout,), dtype=jnp.float32))
            # eval-mode BatchNorm folded into scale/bias
            # TODO(synk): training-mode BN (batch statistics) not implemented; eval-mode stats used.
            scale = gamma / jnp.sqrt(rvar + eps)
            bias = beta - rmean * scale
        params.append((w, scale, bias))
    return params


def prepare_params(params, in_channels=3):
    """One-time prep: pad channels, reshape weight to (K, Cout_pad), cast to bf16.

    Returns a pytree of ARRAYS ONLY (no Python ints) so it can be passed through jit.
    """
    prepared = []
    cin_p = _round_up(in_channels, 8)        # layer-1 K = 16*8 = 128 (lane aligned)
    for (w, scale, bias) in params:
        cout, cin, kh, kw = w.shape
        assert kh == 4 and kw == 4
        cout_p = _round_up(cout, LANE)       # lane-dense output channels
        w_p = jnp.zeros((cout_p, cin_p, 4, 4), jnp.float32).at[:cout, :cin].set(w)
        wmat = jnp.transpose(w_p, (2, 3, 1, 0)).reshape(16 * cin_p, cout_p)
        wmat = wmat.astype(jnp.bfloat16)
        s2d = jnp.ones((cout_p,), jnp.float32).at[:cout].set(scale).reshape(1, cout_p)
        b2d = jnp.zeros((cout_p,), jnp.float32).at[:cout].set(bias).reshape(1, cout_p)
        prepared.append((wmat, s2d, b2d))
        cin_p = cout_p                       # next layer consumes the padded activation
    return prepared


# ----------------------------------------------------------------------------
# STAGE1_D forward (encode_img)
# ----------------------------------------------------------------------------
def stage1_d_forward(image_nchw, prepared, out_channels):
    x = jnp.transpose(image_nchw, (0, 2, 3, 1))          # NCHW -> NHWC
    n_layers = len(prepared)
    for li, (wmat, s2d, b2d) in enumerate(prepared):
        cin_p = wmat.shape[0] // 16                       # static (from array shape)
        if x.shape[-1] < cin_p:                           # zero-pad input channels
            x = jnp.pad(x, ((0, 0), (0, 0), (0, 0), (0, cin_p - x.shape[-1])))
        out_dtype = jnp.float32 if li == n_layers - 1 else jnp.bfloat16
        x = _fused_conv_layer(x, wmat, s2d, b2d, out_dtype=out_dtype)
    x = x[..., :out_channels]                             # drop channel padding
    return jnp.transpose(x, (0, 3, 1, 2))                 # NHWC -> NCHW (matches PyTorch)


# ----------------------------------------------------------------------------
# Pure-JAX reference (same bf16 input rounding as the kernel path)
# ----------------------------------------------------------------------------
def stage1_d_reference(image_nchw, params):
    x = jnp.transpose(image_nchw, (0, 2, 3, 1))
    for (w, scale, bias) in params:
        y = lax.conv_general_dilated(
            x.astype(jnp.bfloat16), w.astype(jnp.bfloat16),
            window_strides=(2, 2), padding=((1, 1), (1, 1)),
            dimension_numbers=("NHWC", "OIHW", "NHWC"),
            preferred_element_type=jnp.float32)
        y = y * scale[None, None, None, :] + bias[None, None, None, :]
        x = jnp.where(y > 0, y, 0.2 * y)
    return jnp.transpose(x, (0, 3, 1, 2))


if __name__ == "__main__":
    key = jax.random.PRNGKey(0)
    k_img, k_par = jax.random.split(key)

    df_dim = 8          # ndf
    condition_dim = 16  # ef_dim (unused in STAGE1_D.forward)
    N, H, W = 2, 32, 32

    image = jax.random.normal(k_img, (N, 3, H, W), dtype=jnp.float32)
    params = init_params(k_par, df_dim)
    prepared = prepare_params(params, in_channels=3)

    fwd = jax.jit(functools.partial(stage1_d_forward, out_channels=df_dim * 8))
    out = jax.block_until_ready(fwd(image, prepared))

    ref = jax.block_until_ready(stage1_d_reference(image, params))
    assert out.shape == (N, df_dim * 8, H // 16, W // 16), out.shape
    max_err = float(jnp.max(jnp.abs(out - ref)))
    assert jnp.allclose(out, ref, atol=5e-3, rtol=5e-3), max_err

    print("KERNEL_OK")
</pallas_src>

<mosaic_0001>
module attributes {stable_mosaic.version = 11 : i64} {
  func.func @_conv_bn_lrelu_kernel(%arg0: i32, %arg1: i32, %arg2: memref<512x128xbf16, #tpu.memory_space<vmem>>, %arg3: memref<128x128xbf16, #tpu.memory_space<vmem>>, %arg4: memref<1x128xf32, #tpu.memory_space<vmem>>, %arg5: memref<1x128xf32, #tpu.memory_space<vmem>>, %arg6: memref<512x128xbf16, #tpu.memory_space<vmem>>, %arg7: memref<512x128xf32, #tpu.memory_space<vmem>>) attributes {dimension_semantics = [#tpu.dimension_semantics<parallel>, #tpu.dimension_semantics<arbitrary>], iteration_bounds = array<i64: 1, 1>, scalar_prefetch = 0 : i64, scratch_operands = 1 : i64, tpu.core_type = #tpu.core_type<tc>, window_params = [{transform_indices = @transform_0, window_bounds = array<i64: 512, 128>}, {transform_indices = @transform_1, window_bounds = array<i64: 128, 128>}, {pipeline_mode = #tpu.pipeline_mode<synchronous>, transform_indices = @transform_2, window_bounds = array<i64: 1, 128>}, {pipeline_mode = #tpu.pipeline_mode<synchronous>, transform_indices = @transform_3, window_bounds = array<i64: 1, 128>}, {transform_indices = @transform_4, window_bounds = array<i64: 512, 128>}]} {
    %c0_i32 = arith.constant 0 : i32
    %0 = arith.cmpi eq, %arg1, %c0_i32 : i32
    %1 = arith.extui %0 : i1 to i32
    %c0_i32_0 = arith.constant 0 : i32
    %2 = arith.cmpi ne, %1, %c0_i32_0 : i32
    scf.if %2 {
      %cst_10 = arith.constant 0.000000e+00 : f32
      %12 = vector.broadcast %cst_10 : f32 to vector<512x128xf32>
      %c0_11 = arith.constant 0 : index
      %c0_12 = arith.constant 0 : index
      %13 = vector.load %arg7[%c0_11, %c0_12] : memref<512x128xf32, #tpu.memory_space<vmem>>, vector<512x128xf32>
      tpu.vector_store %arg7[%c0_11, %c0_12], %12 {strides = array<i32>} : memref<512x128xf32, #tpu.memory_space<vmem>>, vector<512x128xf32>,
    } else {
    }
    %c0 = arith.constant 0 : index
    %c0_1 = arith.constant 0 : index
    %3 = vector.load %arg7[%c0, %c0_1] : memref<512x128xf32, #tpu.memory_space<vmem>>, vector<512x128xf32>
    %c0_2 = arith.constant 0 : index
    %c0_3 = arith.constant 0 : index
    %4 = vector.load %arg2[%c0_2, %c0_3] : memref<512x128xbf16, #tpu.memory_space<vmem>>, vector<512x128xbf16>
    %c0_4 = arith.constant 0 : index
    %c0_5 = arith.constant 0 : index
    %5 = vector.load %arg3[%c0_4, %c0_5] : memref<128x128xbf16, #tpu.memory_space<vmem>>, vector<128x128xbf16>
    %cst = arith.constant dense<0.000000e+00> : vector<512x128xf32>
    %6 = tpu.matmul %4, %5, %cst {dimension_numbers = #tpu.dot_dimension_numbers<[1], [0], [0], [1], [0, 0, 1, 1], [], []>} : vector<512x128xbf16>, vector<128x128xbf16>, vector<512x128xf32> -> vector<512x128xf32>
    %7 = arith.addf %3, %6 : vector<512x128xf32>
    %c0_6 = arith.constant 0 : index
    %c0_7 = arith.constant 0 : index
    %8 = vector.load %arg7[%c0_6, %c0_7] : memref<512x128xf32, #tpu.memory_space<vmem>>, vector<512x128xf32>
    tpu.vector_store %arg7[%c0_6, %c0_7], %7 {strides = array<i32>} : memref<512x128xf32, #tpu.memory_space<vmem>>, vector<512x128xf32>,
    %c0_i32_8 = arith.constant 0 : i32
    %9 = arith.cmpi eq, %arg1, %c0_i32_8 : i32
    %10 = arith.extui %9 : i1 to i32
    %c0_i32_9 = arith.constant 0 : i32
    %11 = arith.cmpi ne, %10, %c0_i32_9 : i32
    scf.if %11 {
      %c0_10 = arith.constant 0 : index
      %c0_11 = arith.constant 0 : index
      %12 = vector.load %arg7[%c0_10, %c0_11] : memref<512x128xf32, #tpu.memory_space<vmem>>, vector<512x128xf32>
      %c0_12 = arith.constant 0 : index
      %c0_13 = arith.constant 0 : index
      %13 = vector.load %arg4[%c0_12, %c0_13] : memref<1x128xf32, #tpu.memory_space<vmem>>, vector<1x128xf32>
      %14 = vector.broadcast %13 : vector<1x128xf32> to vector<512x128xf32>
      %15 = arith.mulf %12, %14 : vector<512x128xf32>
      %c0_14 = arith.constant 0 : index
      %c0_15 = arith.constant 0 : index
      %16 = vector.load %arg5[%c0_14, %c0_15] : memref<1x128xf32, #tpu.memory_space<vmem>>, vector<1x128xf32>
      %17 = vector.broadcast %16 : vector<1x128xf32> to vector<512x128xf32>
      %18 = arith.addf %15, %17 : vector<512x128xf32>
      %cst_16 = arith.constant 0.000000e+00 : f32
      %19 = vector.broadcast %cst_16 : f32 to vector<512x128xf32>
      %20 = arith.cmpf ogt, %18, %19 : vector<512x128xf32>
      %cst_17 = arith.constant 2.000000e-01 : f32
      %21 = vector.broadcast %cst_17 : f32 to vector<512x128xf32>
      %22 = arith.mulf %21, %18 : vector<512x128xf32>
      %23 = arith.select %20, %18, %22 : vector<512x128xi1>, vector<512x128xf32>
      %24 = arith.truncf %23 : vector<512x128xf32> to vector<512x128xbf16>
      %c0_18 = arith.constant 0 : index
      %c0_19 = arith.constant 0 : index
      %25 = vector.load %arg6[%c0_18, %c0_19] : memref<512x128xbf16, #tpu.memory_space<vmem>>, vector<512x128xbf16>
      tpu.vector_store %arg6[%c0_18, %c0_19], %24 {strides = array<i32>} : memref<512x128xbf16, #tpu.memory_space<vmem>>, vector<512x128xbf16>,
    } else {
    }
    return
  }
  func.func @transform_0(%arg0: i32, %arg1: i32) -> (i32, i32) {
    %c0_i32 = arith.constant 0 : i32
    return %arg0, %arg1 : i32, i32
  }
  func.func @transform_1(%arg0: i32, %arg1: i32) -> (i32, i32) {
    %c0_i32 = arith.constant 0 : i32
    %c0_i32_0 = arith.constant 0 : i32
    return %arg1, %c0_i32 : i32, i32
  }
  func.func @transform_2(%arg0: i32, %arg1: i32) -> (i32, i32) {
    %c0_i32 = arith.constant 0 : i32
    %c0_i32_0 = arith.constant 0 : i32
    %c0_i32_1 = arith.constant 0 : i32
    return %c0_i32, %c0_i32_0 : i32, i32
  }
  func.func @transform_3(%arg0: i32, %arg1: i32) -> (i32, i32) {
    %c0_i32 = arith.constant 0 : i32
    %c0_i32_0 = arith.constant 0 : i32
    %c0_i32_1 = arith.constant 0 : i32
    return %c0_i32, %c0_i32_0 : i32, i32
  }
  func.func @transform_4(%arg0: i32, %arg1: i32) -> (i32, i32) {
    %c0_i32 = arith.constant 0 : i32
    %c0_i32_0 = arith.constant 0 : i32
    return %arg0, %c0_i32 : i32, i32
  }
}

module attributes {stable_mosaic.version = 11 : i64} {
  func.func @_conv_bn_lrelu_kernel(%arg0: i32, %arg1: i32, %arg2: memref<128x2048xbf16, #tpu.memory_space<vmem>>, %arg3: memref<2048x128xbf16, #tpu.memory_space<vmem>>, %arg4: memref<1x128xf32, #tpu.memory_space<vmem>>, %arg5: memref<1x128xf32, #tpu.memory_space<vmem>>, %arg6: memref<128x128xbf16, #tpu.memory_space<vmem>>, %arg7: memref<128x128xf32, #tpu.memory_space<vmem>>) attributes {dimension_semantics = [#tpu.dimension_semantics<parallel>, #tpu.dimension_semantics<arbitrary>], iteration_bounds = array<i64: 1, 1>, scalar_prefetch = 0 : i64, scratch_operands = 1 : i64, tpu.core_type = #tpu.core_type<tc>, window_params = [{transform_indices = @transform_0, window_bounds = array<i64: 128, 2048>}, {transform_indices = @transform_1, window_bounds = array<i64: 2048, 128>}, {pipeline_mode = #tpu.pipeline_mode<synchronous>, transform_indices = @transform_2, window_bounds = array<i64: 1, 128>}, {pipeline_mode = #tpu.pipeline_mode<synchronous>, transform_indices = @transform_3, window_bounds = array<i64: 1, 128>}, {transform_indices = @transform_4, window_bounds = array<i64: 128, 128>}]} {
    %c0_i32 = arith.constant 0 : i32
    %0 = arith.cmpi eq, %arg1, %c0_i32 : i32
    %1 = arith.extui %0 : i1 to i32
    %c0_i32_0 = arith.constant 0 : i32
    %2 = arith.cmpi ne, %1, %c0_i32_0 : i32
    scf.if %2 {
      %cst_10 = arith.constant 0.000000e+00 : f32
      %12 = vector.broadcast %cst_10 : f32 to vector<128x128xf32>
      %c0_11 = arith.constant 0 : index
      %c0_12 = arith.constant 0 : index
      %13 = vector.load %arg7[%c0_11, %c0_12] : memref<128x128xf32, #tpu.memory_space<vmem>>, vector<128x128xf32>
      tpu.vector_store %arg7[%c0_11, %c0_12], %12 {strides = array<i32>} : memref<128x128xf32, #tpu.memory_space<vmem>>, vector<128x128xf32>,
    } else {
    }
    %c0 = arith.constant 0 : index
    %c0_1 = arith.constant 0 : index
    %3 = vector.load %arg7[%c0, %c0_1] : memref<128x128xf32, #tpu.memory_space<vmem>>, vector<128x128xf32>
    %c0_2 = arith.constant 0 : index
    %c0_3 = arith.constant 0 : index
    %4 = vector.load %arg2[%c0_2, %c0_3] : memref<128x2048xbf16, #tpu.memory_space<vmem>>, vector<128x2048xbf16>
    %c0_4 = arith.constant 0 : index
    %c0_5 = arith.constant 0 : index
    %5 = vector.load %arg3[%c0_4, %c0_5] : memref<2048x128xbf16, #tpu.memory_space<vmem>>, vector<2048x128xbf16>
    %cst = arith.constant dense<0.000000e+00> : vector<128x128xf32>
    %6 = tpu.matmul %4, %5, %cst {dimension_numbers = #tpu.dot_dimension_numbers<[1], [0], [0], [1], [0, 0, 1, 1], [], []>} : vector<128x2048xbf16>, vector<2048x128xbf16>, vector<128x128xf32> -> vector<128x128xf32>
    %7 = arith.addf %3, %6 : vector<128x128xf32>
    %c0_6 = arith.constant 0 : index
    %c0_7 = arith.constant 0 : index
    %8 = vector.load %arg7[%c0_6, %c0_7] : memref<128x128xf32, #tpu.memory_space<vmem>>, vector<128x128xf32>
    tpu.vector_store %arg7[%c0_6, %c0_7], %7 {strides = array<i32>} : memref<128x128xf32, #tpu.memory_space<vmem>>, vector<128x128xf32>,
    %c0_i32_8 = arith.constant 0 : i32
    %9 = arith.cmpi eq, %arg1, %c0_i32_8 : i32
    %10 = arith.extui %9 : i1 to i32
    %c0_i32_9 = arith.constant 0 : i32
    %11 = arith.cmpi ne, %10, %c0_i32_9 : i32
    scf.if %11 {
      %c0_10 = arith.constant 0 : index
      %c0_11 = arith.constant 0 : index
      %12 = vector.load %arg7[%c0_10, %c0_11] : memref<128x128xf32, #tpu.memory_space<vmem>>, vector<128x128xf32>
      %c0_12 = arith.constant 0 : index
      %c0_13 = arith.constant 0 : index
      %13 = vector.load %arg4[%c0_12, %c0_13] : memref<1x128xf32, #tpu.memory_space<vmem>>, vector<1x128xf32>
      %14 = vector.broadcast %13 : vector<1x128xf32> to vector<128x128xf32>
      %15 = arith.mulf %12, %14 : vector<128x128xf32>
      %c0_14 = arith.constant 0 : index
      %c0_15 = arith.constant 0 : index
      %16 = vector.load %arg5[%c0_14, %c0_15] : memref<1x128xf32, #tpu.memory_space<vmem>>, vector<1x128xf32>
      %17 = vector.broadcast %16 : vector<1x128xf32> to vector<128x128xf32>
      %18 = arith.addf %15, %17 : vector<128x128xf32>
      %cst_16 = arith.constant 0.000000e+00 : f32
      %19 = vector.broadcast %cst_16 : f32 to vector<128x128xf32>
      %20 = arith.cmpf ogt, %18, %19 : vector<128x128xf32>
      %cst_17 = arith.constant 2.000000e-01 : f32
      %21 = vector.broadcast %cst_17 : f32 to vector<128x128xf32>
      %22 = arith.mulf %21, %18 : vector<128x128xf32>
      %23 = arith.select %20, %18, %22 : vector<128x128xi1>, vector<128x128xf32>
      %24 = arith.truncf %23 : vector<128x128xf32> to vector<128x128xbf16>
      %c0_18 = arith.constant 0 : index
      %c0_19 = arith.constant 0 : index
      %25 = vector.load %arg6[%c0_18, %c0_19] : memref<128x128xbf16, #tpu.memory_space<vmem>>, vector<128x128xbf16>
      tpu.vector_store %arg6[%c0_18, %c0_19], %24 {strides = array<i32>} : memref<128x128xbf16, #tpu.memory_space<vmem>>, vector<128x128xbf16>,
    } else {
    }
    return
  }
  func.func @transform_0(%arg0: i32, %arg1: i32) -> (i32, i32) {
    %c0_i32 = arith.constant 0 : i32
    return %arg0, %arg1 : i32, i32
  }
  func.func @transform_1(%arg0: i32, %arg1: i32) -> (i32, i32) {
    %c0_i32 = arith.constant 0 : i32
    %c0_i32_0 = arith.constant 0 : i32
    return %arg1, %c0_i32 : i32, i32
  }
  func.func @transform_2(%arg0: i32, %arg1: i32) -> (i32, i32) {
    %c0_i32 = arith.constant 0 : i32
    %c0_i32_0 = arith.constant 0 : i32
    %c0_i32_1 = arith.constant 0 : i32
    return %c0_i32, %c0_i32_0 : i32, i32
  }
  func.func @transform_3(%arg0: i32, %arg1: i32) -> (i32, i32) {
    %c0_i32 = arith.constant 0 : i32
    %c0_i32_0 = arith.constant 0 : i32
    %c0_i32_1 = arith.constant 0 : i32
    return %c0_i32, %c0_i32_0 : i32, i32
  }
  func.func @transform_4(%arg0: i32, %arg1: i32) -> (i32, i32) {
    %c0_i32 = arith.constant 0 : i32
    %c0_i32_0 = arith.constant 0 : i32
    return %arg0, %c0_i32 : i32, i32
  }
}

module attributes {stable_mosaic.version = 11 : i64} {
  func.func @_conv_bn_lrelu_kernel(%arg0: i32, %arg1: i32, %arg2: memref<32x2048xbf16, #tpu.memory_space<vmem>>, %arg3: memref<2048x128xbf16, #tpu.memory_space<vmem>>, %arg4: memref<1x128xf32, #tpu.memory_space<vmem>>, %arg5: memref<1x128xf32, #tpu.memory_space<vmem>>, %arg6: memref<32x128xbf16, #tpu.memory_space<vmem>>, %arg7: memref<32x128xf32, #tpu.memory_space<vmem>>) attributes {dimension_semantics = [#tpu.dimension_semantics<parallel>, #tpu.dimension_semantics<arbitrary>], iteration_bounds = array<i64: 1, 1>, scalar_prefetch = 0 : i64, scratch_operands = 1 : i64, tpu.core_type = #tpu.core_type<tc>, window_params = [{transform_indices = @transform_0, window_bounds = array<i64: 32, 2048>}, {transform_indices = @transform_1, window_bounds = array<i64: 2048, 128>}, {pipeline_mode = #tpu.pipeline_mode<synchronous>, transform_indices = @transform_2, window_bounds = array<i64: 1, 128>}, {pipeline_mode = #tpu.pipeline_mode<synchronous>, transform_indices = @transform_3, window_bounds = array<i64: 1, 128>}, {transform_indices = @transform_4, window_bounds = array<i64: 32, 128>}]} {
    %c0_i32 = arith.constant 0 : i32
    %0 = arith.cmpi eq, %arg1, %c0_i32 : i32
    %1 = arith.extui %0 : i1 to i32
    %c0_i32_0 = arith.constant 0 : i32
    %2 = arith.cmpi ne, %1, %c0_i32_0 : i32
    scf.if %2 {
      %cst_10 = arith.constant 0.000000e+00 : f32
      %12 = vector.broadcast %cst_10 : f32 to vector<32x128xf32>
      %c0_11 = arith.constant 0 : index
      %c0_12 = arith.constant 0 : index
      %13 = vector.load %arg7[%c0_11, %c0_12] : memref<32x128xf32, #tpu.memory_space<vmem>>, vector<32x128xf32>
      tpu.vector_store %arg7[%c0_11, %c0_12], %12 {strides = array<i32>} : memref<32x128xf32, #tpu.memory_space<vmem>>, vector<32x128xf32>,
    } else {
    }
    %c0 = arith.constant 0 : index
    %c0_1 = arith.constant 0 : index
    %3 = vector.load %arg7[%c0, %c0_1] : memref<32x128xf32, #tpu.memory_space<vmem>>, vector<32x128xf32>
    %c0_2 = arith.constant 0 : index
    %c0_3 = arith.constant 0 : index
    %4 = vector.load %arg2[%c0_2, %c0_3] : memref<32x2048xbf16, #tpu.memory_space<vmem>>, vector<32x2048xbf16>
    %c0_4 = arith.constant 0 : index
    %c0_5 = arith.constant 0 : index
    %5 = vector.load %arg3[%c0_4, %c0_5] : memref<2048x128xbf16, #tpu.memory_space<vmem>>, vector<2048x128xbf16>
    %cst = arith.constant dense<0.000000e+00> : vector<32x128xf32>
    %6 = tpu.matmul %4, %5, %cst {dimension_numbers = #tpu.dot_dimension_numbers<[1], [0], [0], [1], [0, 0, 1, 1], [], []>} : vector<32x2048xbf16>, vector<2048x128xbf16>, vector<32x128xf32> -> vector<32x128xf32>
    %7 = arith.addf %3, %6 : vector<32x128xf32>
    %c0_6 = arith.constant 0 : index
    %c0_7 = arith.constant 0 : index
    %8 = vector.load %arg7[%c0_6, %c0_7] : memref<32x128xf32, #tpu.memory_space<vmem>>, vector<32x128xf32>
    tpu.vector_store %arg7[%c0_6, %c0_7], %7 {strides = array<i32>} : memref<32x128xf32, #tpu.memory_space<vmem>>, vector<32x128xf32>,
    %c0_i32_8 = arith.constant 0 : i32
    %9 = arith.cmpi eq, %arg1, %c0_i32_8 : i32
    %10 = arith.extui %9 : i1 to i32
    %c0_i32_9 = arith.constant 0 : i32
    %11 = arith.cmpi ne, %10, %c0_i32_9 : i32
    scf.if %11 {
      %c0_10 = arith.constant 0 : index
      %c0_11 = arith.constant 0 : index
      %12 = vector.load %arg7[%c0_10, %c0_11] : memref<32x128xf32, #tpu.memory_space<vmem>>, vector<32x128xf32>
      %c0_12 = arith.constant 0 : index
      %c0_13 = arith.constant 0 : index
      %13 = vector.load %arg4[%c0_12, %c0_13] : memref<1x128xf32, #tpu.memory_space<vmem>>, vector<1x128xf32>
      %14 = vector.broadcast %13 : vector<1x128xf32> to vector<32x128xf32>
      %15 = arith.mulf %12, %14 : vector<32x128xf32>
      %c0_14 = arith.constant 0 : index
      %c0_15 = arith.constant 0 : index
      %16 = vector.load %arg5[%c0_14, %c0_15] : memref<1x128xf32, #tpu.memory_space<vmem>>, vector<1x128xf32>
      %17 = vector.broadcast %16 : vector<1x128xf32> to vector<32x128xf32>
      %18 = arith.addf %15, %17 : vector<32x128xf32>
      %cst_16 = arith.constant 0.000000e+00 : f32
      %19 = vector.broadcast %cst_16 : f32 to vector<32x128xf32>
      %20 = arith.cmpf ogt, %18, %19 : vector<32x128xf32>
      %cst_17 = arith.constant 2.000000e-01 : f32
      %21 = vector.broadcast %cst_17 : f32 to vector<32x128xf32>
      %22 = arith.mulf %21, %18 : vector<32x128xf32>
      %23 = arith.select %20, %18, %22 : vector<32x128xi1>, vector<32x128xf32>
      %24 = arith.truncf %23 : vector<32x128xf32> to vector<32x128xbf16>
      %c0_18 = arith.constant 0 : index
      %c0_19 = arith.constant 0 : index
      %25 = vector.load %arg6[%c0_18, %c0_19] : memref<32x128xbf16, #tpu.memory_space<vmem>>, vector<32x128xbf16>
      tpu.vector_store %arg6[%c0_18, %c0_19], %24 {strides = array<i32>} : memref<32x128xbf16, #tpu.memory_space<vmem>>, vector<32x128xbf16>,
    } else {
    }
    return
  }
  func.func @transform_0(%arg0: i32, %arg1: i32) -> (i32, i32) {
    %c0_i32 = arith.constant 0 : i32
    return %arg0, %arg1 : i32, i32
  }
  func.func @transform_1(%arg0: i32, %arg1: i32) -> (i32, i32) {
    %c0_i32 = arith.constant 0 : i32
    %c0_i32_0 = arith.constant 0 : i32
    return %arg1, %c0_i32 : i32, i32
  }
  func.func @transform_2(%arg0: i32, %arg1: i32) -> (i32, i32) {
    %c0_i32 = arith.constant 0 : i32
    %c0_i32_0 = arith.constant 0 : i32
    %c0_i32_1 = arith.constant 0 : i32
    return %c0_i32, %c0_i32_0 : i32, i32
  }
  func.func @transform_3(%arg0: i32, %arg1: i32) -> (i32, i32) {
    %c0_i32 = arith.constant 0 : i32
    %c0_i32_0 = arith.constant 0 : i32
    %c0_i32_1 = arith.constant 0 : i32
    return %c0_i32, %c0_i32_0 : i32, i32
  }
  func.func @transform_4(%arg0: i32, %arg1: i32) -> (i32, i32) {
    %c0_i32 = arith.constant 0 : i32
    %c0_i32_0 = arith.constant 0 : i32
    return %arg0, %c0_i32 : i32, i32
  }
}

module attributes {stable_mosaic.version = 11 : i64} {
  func.func @_conv_bn_lrelu_kernel(%arg0: i32, %arg1: i32, %arg2: memref<8x2048xbf16, #tpu.memory_space<vmem>>, %arg3: memref<2048x128xbf16, #tpu.memory_space<vmem>>, %arg4: memref<1x128xf32, #tpu.memory_space<vmem>>, %arg5: memref<1x128xf32, #tpu.memory_space<vmem>>, %arg6: memref<8x128xf32, #tpu.memory_space<vmem>>, %arg7: memref<8x128xf32, #tpu.memory_space<vmem>>) attributes {dimension_semantics = [#tpu.dimension_semantics<parallel>, #tpu.dimension_semantics<arbitrary>], iteration_bounds = array<i64: 1, 1>, scalar_prefetch = 0 : i64, scratch_operands = 1 : i64, tpu.core_type = #tpu.core_type<tc>, window_params = [{transform_indices = @transform_0, window_bounds = array<i64: 8, 2048>}, {transform_indices = @transform_1, window_bounds = array<i64: 2048, 128>}, {pipeline_mode = #tpu.pipeline_mode<synchronous>, transform_indices = @transform_2, window_bounds = array<i64: 1, 128>}, {pipeline_mode = #tpu.pipeline_mode<synchronous>, transform_indices = @transform_3, window_bounds = array<i64: 1, 128>}, {transform_indices = @transform_4, window_bounds = array<i64: 8, 128>}]} {
    %c0_i32 = arith.constant 0 : i32
    %0 = arith.cmpi eq, %arg1, %c0_i32 : i32
    %1 = arith.extui %0 : i1 to i32
    %c0_i32_0 = arith.constant 0 : i32
    %2 = arith.cmpi ne, %1, %c0_i32_0 : i32
    scf.if %2 {
      %cst_10 = arith.constant 0.000000e+00 : f32
      %12 = vector.broadcast %cst_10 : f32 to vector<8x128xf32>
      %c0_11 = arith.constant 0 : index
      %c0_12 = arith.constant 0 : index
      %13 = vector.load %arg7[%c0_11, %c0_12] : memref<8x128xf32, #tpu.memory_space<vmem>>, vector<8x128xf32>
      tpu.vector_store %arg7[%c0_11, %c0_12], %12 {strides = array<i32>} : memref<8x128xf32, #tpu.memory_space<vmem>>, vector<8x128xf32>,
    } else {
    }
    %c0 = arith.constant 0 : index
    %c0_1 = arith.constant 0 : index
    %3 = vector.load %arg7[%c0, %c0_1] : memref<8x128xf32, #tpu.memory_space<vmem>>, vector<8x128xf32>
    %c0_2 = arith.constant 0 : index
    %c0_3 = arith.constant 0 : index
    %4 = vector.load %arg2[%c0_2, %c0_3] : memref<8x2048xbf16, #tpu.memory_space<vmem>>, vector<8x2048xbf16>
    %c0_4 = arith.constant 0 : index
    %c0_5 = arith.constant 0 : index
    %5 = vector.load %arg3[%c0_4, %c0_5] : memref<2048x128xbf16, #tpu.memory_space<vmem>>, vector<2048x128xbf16>
    %cst = arith.constant dense<0.000000e+00> : vector<8x128xf32>
    %6 = tpu.matmul %4, %5, %cst {dimension_numbers = #tpu.dot_dimension_numbers<[1], [0], [0], [1], [0, 0, 1, 1], [], []>} : vector<8x2048xbf16>, vector<2048x128xbf16>, vector<8x128xf32> -> vector<8x128xf32>
    %7 = arith.addf %3, %6 : vector<8x128xf32>
    %c0_6 = arith.constant 0 : index
    %c0_7 = arith.constant 0 : index
    %8 = vector.load %arg7[%c0_6, %c0_7] : memref<8x128xf32, #tpu.memory_space<vmem>>, vector<8x128xf32>
    tpu.vector_store %arg7[%c0_6, %c0_7], %7 {strides = array<i32>} : memref<8x128xf32, #tpu.memory_space<vmem>>, vector<8x128xf32>,
    %c0_i32_8 = arith.constant 0 : i32
    %9 = arith.cmpi eq, %arg1, %c0_i32_8 : i32
    %10 = arith.extui %9 : i1 to i32
    %c0_i32_9 = arith.constant 0 : i32
    %11 = arith.cmpi ne, %10, %c0_i32_9 : i32
    scf.if %11 {
      %c0_10 = arith.constant 0 : index
      %c0_11 = arith.constant 0 : index
      %12 = vector.load %arg7[%c0_10, %c0_11] : memref<8x128xf32, #tpu.memory_space<vmem>>, vector<8x128xf32>
      %c0_12 = arith.constant 0 : index
      %c0_13 = arith.constant 0 : index
      %13 = vector.load %arg4[%c0_12, %c0_13] : memref<1x128xf32, #tpu.memory_space<vmem>>, vector<1x128xf32>
      %14 = vector.broadcast %13 : vector<1x128xf32> to vector<8x128xf32>
      %15 = arith.mulf %12, %14 : vector<8x128xf32>
      %c0_14 = arith.constant 0 : index
      %c0_15 = arith.constant 0 : index
      %16 = vector.load %arg5[%c0_14, %c0_15] : memref<1x128xf32, #tpu.memory_space<vmem>>, vector<1x128xf32>
      %17 = vector.broadcast %16 : vector<1x128xf32> to vector<8x128xf32>
      %18 = arith.addf %15, %17 : vector<8x128xf32>
      %cst_16 = arith.constant 0.000000e+00 : f32
      %19 = vector.broadcast %cst_16 : f32 to vector<8x128xf32>
      %20 = arith.cmpf ogt, %18, %19 : vector<8x128xf32>
      %cst_17 = arith.constant 2.000000e-01 : f32
      %21 = vector.broadcast %cst_17 : f32 to vector<8x128xf32>
      %22 = arith.mulf %21, %18 : vector<8x128xf32>
      %23 = arith.select %20, %18, %22 : vector<8x128xi1>, vector<8x128xf32>
      %c0_18 = arith.constant 0 : index
      %c0_19 = arith.constant 0 : index
      %24 = vector.load %arg6[%c0_18, %c0_19] : memref<8x128xf32, #tpu.memory_space<vmem>>, vector<8x128xf32>
      tpu.vector_store %arg6[%c0_18, %c0_19], %23 {strides = array<i32>} : memref<8x128xf32, #tpu.memory_space<vmem>>, vector<8x128xf32>,
    } else {
    }
    return
  }
  func.func @transform_0(%arg0: i32, %arg1: i32) -> (i32, i32) {
    %c0_i32 = arith.constant 0 : i32
    return %arg0, %arg1 : i32, i32
  }
  func.func @transform_1(%arg0: i32, %arg1: i32) -> (i32, i32) {
    %c0_i32 = arith.constant 0 : i32
    %c0_i32_0 = arith.constant 0 : i32
    return %arg1, %c0_i32 : i32, i32
  }
  func.func @transform_2(%arg0: i32, %arg1: i32) -> (i32, i32) {
    %c0_i32 = arith.constant 0 : i32
    %c0_i32_0 = arith.constant 0 : i32
    %c0_i32_1 = arith.constant 0 : i32
    return %c0_i32, %c0_i32_0 : i32, i32
  }
  func.func @transform_3(%arg0: i32, %arg1: i32) -> (i32, i32) {
    %c0_i32 = arith.constant 0 : i32
    %c0_i32_0 = arith.constant 0 : i32
    %c0_i32_1 = arith.constant 0 : i32
    return %c0_i32, %c0_i32_0 : i32, i32
  }
  func.func @transform_4(%arg0: i32, %arg1: i32) -> (i32, i32) {
    %c0_i32 = arith.constant 0 : i32
    %c0_i32_0 = arith.constant 0 : i32
    return %arg0, %c0_i32 : i32, i32
  }
}

</mosaic_0001>

<bundles_post_ra>
// kernel: stage1_d_forward.4
= control target key start
LH: loop header
LB: loop body
LE: loop exit
PB: predicated region body
PF: predicated region fallthrough
CT: control target
= control target key end

     0   :  { %s2626_s1 = inlined_call_operand.vmem [shape: bf16[128,128], index: 1, kind: input, shape index: {}]   ;;  %s2627_s0 = inlined_call_operand.vmem [shape: bf16[512,128], index: 0, kind: input, shape index: {}]   ;;  %s2628_s2 = inlined_call_operand.vmem [shape: f32[1,128], index: 2, kind: input, shape index: {}]   ;;  %s2629_s3 = inlined_call_operand.vmem [shape: f32[1,128], index: 3, kind: input, shape index: {}]   ;;  %s2630_s4 = inlined_call_operand.vmem [shape: bf16[512,128], index: 4, kind: output, shape index: {}]  }
   0x1   :  { %v2109_v0 = vld [vmem:[%s2626_s1] sm:$0xff]   ;;  %v2110_v1 = vld [vmem:[%s2626_s1 + $0x8] sm:$0xff]   ;;  %v2111_v2 = vld [vmem:[%s2626_s1 + $0x10] sm:$0xff]  }
   0x2   :  { %2013 = vmatprep.subr.bf16.mxu0 %v2109_v0  ;;  %2093 = vmatprep.subr.bf16.mxu1 %v2109_v0  ;;  %v2112_v3 = vld [vmem:[%s2626_s1 + $0x18] sm:$0xff]   ;;  %v2117_v4 = vld [vmem:[%s2627_s0] sm:$0xff]   ;;  %v2114_v7 = vld [vmem:[%s2626_s1 + $0x28] sm:$0xff]  }
   0x3   :  { %2014 = vmatpush3.bf16.msra.mxu0 %v2109_v0  ;;  %2101 = vmatpush3.bf16.msra.mxu1 %v2109_v0  ;;  %v2118_v5 = vld [vmem:[%s2627_s0 + $0x80] sm:$0xff]   ;;  %v2115_v8 = vld [vmem:[%s2626_s1 + $0x30] sm:$0xff]   ;;  %v2116_v9 = vld [vmem:[%s2626_s1 + $0x38] sm:$0xff]  }
   0x4   :  { %2015 = vmatprep.subr.bf16.mxu0 %v2110_v1  ;;  %2094 = vmatprep.subr.bf16.mxu1 %v2110_v1  ;;  %v2113_v6 = vld [vmem:[%s2626_s1 + $0x20] sm:$0xff]   ;;  %v2119_v10 = vld [vmem:[%s2627_s0 + $0x8] sm:$0xff]   ;;  %v2121_v12 = vld [vmem:[%s2627_s0 + $0x10] sm:$0xff]  }
   0x5   :  { %2029 = vmatprep.mubr.bf16.mxu0 %v2117_v4  ;;  %2061 = vmatprep.mubr.bf16.mxu1 %v2118_v5  ;;  %v2120_v11 = vld [vmem:[%s2627_s0 + $0x88] sm:$0xff]   ;;  %v2122_v13 = vld [vmem:[%s2627_s0 + $0x90] sm:$0xff]   ;;  %v2123_v14 = vld [vmem:[%s2627_s0 + $0x18] sm:$0xff]  }
   0x6   :  { %v2124_v15 = vld [vmem:[%s2627_s0 + $0x98] sm:$0xff]   ;;  %v2125_v16 = vld [vmem:[%s2627_s0 + $0x20] sm:$0xff]   ;;  %v2127_v18 = vld [vmem:[%s2627_s0 + $0x28] sm:$0xff]  }
   0x7   :  { %2016 = vmatpush3.bf16.msra.mxu0 %v2110_v1  ;;  %2102 = vmatpush3.bf16.msra.mxu1 %v2110_v1  ;;  %v2126_v17 = vld [vmem:[%s2627_s0 + $0xa0] sm:$0xff]   ;;  %v2128_v19 = vld [vmem:[%s2627_s0 + $0xa8] sm:$0xff]   ;;  %v2129_v20 = vld [vmem:[%s2627_s0 + $0x30] sm:$0xff]  }
   0x8   :  { %2017 = vmatprep.subr.bf16.mxu0 %v2111_v2  ;;  %2095 = vmatprep.subr.bf16.mxu1 %v2111_v2  ;;  %v2130_v21 = vld [vmem:[%s2627_s0 + $0xb0] sm:$0xff]   ;;  %v2131_v22 = vld [vmem:[%s2627_s0 + $0x38] sm:$0xff]   ;;  %v2133_v24 = vld [vmem:[%s2627_s0 + $0x40] sm:$0xff]  }
   0x9   :  { %v2132_v23 = vld [vmem:[%s2627_s0 + $0xb8] sm:$0xff]   ;;  %v2134_v25 = vld [vmem:[%s2627_s0 + $0xc0] sm:$0xff]   ;;  %v2135_v26 = vld [vmem:[%s2627_s0 + $0x48] sm:$0xff]  }
   0xa   :  { %v2136_v27 = vld [vmem:[%s2627_s0 + $0xc8] sm:$0xff]   ;;  %v2137_v28 = vld [vmem:[%s2627_s0 + $0x50] sm:$0xff]   ;;  %v2139_v30 = vld [vmem:[%s2627_s0 + $0x58] sm:$0xff]  }
   0xb   :  { %2018 = vmatpush3.bf16.msra.mxu0 %v2111_v2  ;;  %2103 = vmatpush3.bf16.msra.mxu1 %v2111_v2  ;;  %v2138_v29 = vld [vmem:[%s2627_s0 + $0xd0] sm:$0xff]   ;;  %v2140_v31 = vld [vmem:[%s2627_s0 + $0xd8] sm:$0xff]   ;;  %v2141_v32 = vld [vmem:[%s2627_s0 + $0x60] sm:$0xff]  }
   0xc   :  { %2019 = vmatprep.subr.bf16.mxu0 %v2112_v3  ;;  %2096 = vmatprep.subr.bf16.mxu1 %v2112_v3  ;;  %v2142_v33 = vld [vmem:[%s2627_s0 + $0xe0] sm:$0xff]   ;;  %v2143_v34 = vld [vmem:[%s2627_s0 + $0x68] sm:$0xff]   ;;  %v2145_v36 = vld [vmem:[%s2627_s0 + $0x70] sm:$0xff]  }
   0xd   :  { %v2144_v35 = vld [vmem:[%s2627_s0 + $0xe8] sm:$0xff]   ;;  %v2146_v37 = vld [vmem:[%s2627_s0 + $0xf0] sm:$0xff]   ;;  %v2147_v38 = vld [vmem:[%s2627_s0 + $0x78] sm:$0xff]  }
   0xe   :  { %v2148_v39 = vld [vmem:[%s2627_s0 + $0xf8] sm:$0xff]   ;;  %v2297_v40 = vld [vmem:[%s2628_s2] ss:$0 sm:$0xff] }
   0xf   :  { %2020 = vmatpush3.bf16.msra.mxu0 %v2112_v3  ;;  %2104 = vmatpush3.bf16.msra.mxu1 %v2112_v3  ;;  %v2302_v42 = vld [vmem:[%s2629_s3] ss:$0 sm:$0xff] }
  0x10   :  { %2021 = vmatprep.subr.bf16.mxu0 %v2113_v6  ;;  %2097 = vmatprep.subr.bf16.mxu1 %v2113_v6 }
  0x13   :  { %2022 = vmatpush3.bf16.msra.mxu0 %v2113_v6  ;;  %2105 = vmatpush3.bf16.msra.mxu1 %v2113_v6 }
  0x14   :  { %2023 = vmatprep.subr.bf16.mxu0 %v2114_v7  ;;  %2098 = vmatprep.subr.bf16.mxu1 %v2114_v7 }
  0x17   :  { %2024 = vmatpush3.bf16.msra.mxu0 %v2114_v7  ;;  %2106 = vmatpush3.bf16.msra.mxu1 %v2114_v7 }
  0x18   :  { %2025 = vmatprep.subr.bf16.mxu0 %v2115_v8  ;;  %2099 = vmatprep.subr.bf16.mxu1 %v2115_v8 }
  0x1b   :  { %2026 = vmatpush3.bf16.msra.mxu0 %v2115_v8  ;;  %2107 = vmatpush3.bf16.msra.mxu1 %v2115_v8 }
  0x1c   :  { %2027 = vmatprep.subr.bf16.mxu0 %v2116_v9  ;;  %2100 = vmatprep.subr.bf16.mxu1 %v2116_v9 }
  0x1f   :  { %2028 = vmatpush3.bf16.msra.mxu0 %v2116_v9  ;;  %2108 = vmatpush3.bf16.msra.mxu1 %v2116_v9 }
  0x22   :  { %2030 = vmatmul.mubr.bf16.vlgmr.msra.gmra.mrb[0].mxu0 %v2119_v10  ;;  %2062 = vmatmul.mubr.bf16.vlgmr.msra.gmra.mrb[0].mxu1 %v2120_v11 }
  0x23   :  { %2033 = vmatprep.mubr.bf16.mxu0 %v2121_v12  ;;  %2065 = vmatprep.mubr.bf16.mxu1 %v2122_v13 }
  0x2a   :  { %2034 = vmatmul.mubr.bf16.gmra.mrb[4].mxu0 %v2123_v14  ;;  %2066 = vmatmul.mubr.bf16.gmra.mrb[4].mxu1 %v2124_v15 }
  0x2b   :  { %2037 = vmatprep.mubr.bf16.mxu0 %v2125_v16  ;;  %2069 = vmatprep.mubr.bf16.mxu1 %v2126_v17 }
  0x32   :  { %2038 = vmatmul.mubr.bf16.gmra.mrb[8].mxu0 %v2127_v18  ;;  %2070 = vmatmul.mubr.bf16.gmra.mrb[8].mxu1 %v2128_v19 }
  0x33   :  { %2041 = vmatprep.mubr.bf16.mxu0 %v2129_v20  ;;  %2073 = vmatprep.mubr.bf16.mxu1 %v2130_v21 }
  0x3a   :  { %2042 = vmatmul.mubr.bf16.gmra.mrb[12].mxu0 %v2131_v22  ;;  %2074 = vmatmul.mubr.bf16.gmra.mrb[12].mxu1 %v2132_v23 }
  0x3b   :  { %2045 = vmatprep.mubr.bf16.mxu0 %v2133_v24  ;;  %2077 = vmatprep.mubr.bf16.mxu1 %v2134_v25 }
  0x42   :  { %2046 = vmatmul.mubr.bf16.gmra.mrb[16].mxu0 %v2135_v26  ;;  %2078 = vmatmul.mubr.bf16.gmra.mrb[16].mxu1 %v2136_v27 }
  0x43   :  { %2049 = vmatprep.mubr.bf16.mxu0 %v2137_v28  ;;  %2081 = vmatprep.mubr.bf16.mxu1 %v2138_v29 }
  0x4a   :  { %2050 = vmatmul.mubr.bf16.gmra.mrb[20].mxu0 %v2139_v30  ;;  %2082 = vmatmul.mubr.bf16.gmra.mrb[20].mxu1 %v2140_v31 }
  0x4b   :  { %2053 = vmatprep.mubr.bf16.mxu0 %v2141_v32  ;;  %2085 = vmatprep.mubr.bf16.mxu1 %v2142_v33 }
  0x52   :  { %2054 = vmatmul.mubr.bf16.gmra.mrb[24].mxu0 %v2143_v34  ;;  %2086 = vmatmul.mubr.bf16.gmra.mrb[24].mxu1 %v2144_v35 }
  0x53   :  { %2057 = vmatprep.mubr.bf16.mxu0 %v2145_v36  ;;  %2089 = vmatprep.mubr.bf16.mxu1 %v2146_v37 }
  0x5a   :  { %2058 = vmatmul.mubr.bf16.gmra.mrb[28].mxu0 %v2147_v38  ;;  %2090 = vmatmul.mubr.bf16.gmra.mrb[28].mxu1 %v2148_v39 }
  0xf5   :  { %v2031_v41 = vpop.f32.mrb[0].mxu0  ;;  %v2063_v43 = vpop.f32.mrb[0].mxu1 }
  0xf6   :  { %v963_v44 = vmul.f32 %v2031_v41, %v2297_v40  ;;  %v995_v45 = vmul.f32 %v2063_v43, %v2297_v40  ;;  %v504_v46 = vpop.f32.mrb[1].mxu0  ;;  %v632_v47 = vpop.f32.mrb[1].mxu1 }
  0xf7   :  { %v961_v48 = vmul.f32 %v2297_v40, %v504_v46  ;;  %v993_v49 = vmul.f32 %v2297_v40, %v632_v47  ;;  %v2032_v50 = vpop.f32.mrb[2].mxu0  ;;  %v2064_v51 = vpop.f32.mrb[2].mxu1 }
  0xf8   :  { %v1034_v52 = vadd.f32 %v2302_v42, %v963_v44  ;;  %v1066_v53 = vadd.f32 %v2302_v42, %v995_v45  ;;  %v964_v54 = vmul.f32 %v2032_v50, %v2297_v40  ;;  %v996_v55 = vmul.f32 %v2064_v51, %v2297_v40  ;;  %v507_v56 = vpop.f32.mrb[3].mxu0  ;;  %v635_v57 = vpop.f32.mrb[3].mxu1 }
  0xf9   :  { %v1032_v58 = vadd.f32 %v2302_v42, %v961_v48  ;;  %v1064_v59 = vadd.f32 %v2302_v42, %v993_v49  ;;  %v962_v60 = vmul.f32 %v2297_v40, %v507_v56  ;;  %v994_v61 = vmul.f32 %v2297_v40, %v635_v57 }
  0xfa   :  { %vm1098_vm0 = vcmp.gt.f32.partialorder %v1034_v52, 0.0  ;;  %v1162_v62 = vmul.f32 0.2, %v1034_v52  ;;  %vm1130_vm1 = vcmp.gt.f32.partialorder %v1066_v53, 0.0  ;;  %v1194_v63 = vmul.f32 0.2, %v1066_v53 }
  0xfb   :  { %vm1096_vm2 = vcmp.gt.f32.partialorder %v1032_v58, 0.0  ;;  %v1160_v0 = vmul.f32 0.2, %v1032_v58  ;;  %vm1128_vm3 = vcmp.gt.f32.partialorder %v1064_v59, 0.0  ;;  %v1192_v1 = vmul.f32 0.2, %v1064_v59 }
  0xfc   :  { %v1226_v2 = vsel %vm1098_vm0, %v1034_v52, %v1162_v62  ;;  %v1258_v3 = vsel %vm1130_vm1, %v1066_v53, %v1194_v63  ;;  %v1035_v4 = vadd.f32 %v2302_v42, %v964_v54  ;;  %v1067_v5 = vadd.f32 %v2302_v42, %v996_v55 }
  0xfd   :  { %v1224_v6 = vsel %vm1096_vm2, %v1032_v58, %v1160_v0  ;;  %v1256_v7 = vsel %vm1128_vm3, %v1064_v59, %v1192_v1  ;;  %v1033_v8 = vadd.f32 %v2302_v42, %v962_v60  ;;  %v1065_v9 = vadd.f32 %v2302_v42, %v994_v61  ;;  %v2035_v10 = vpop.f32.mrb[4].mxu0  ;;  %v2067_v11 = vpop.f32.mrb[4].mxu1 }
  0xfe   :  { %vm1099_vm4 = vcmp.gt.f32.partialorder %v1035_v4, 0.0  ;;  %v1163_v12 = vmul.f32 0.2, %v1035_v4  ;;  %vm1131_vm5 = vcmp.gt.f32.partialorder %v1067_v5, 0.0  ;;  %v1195_v13 = vmul.f32 0.2, %v1067_v5 }
  0xff   :  { %vm1097_vm6 = vcmp.gt.f32.partialorder %v1033_v8, 0.0  ;;  %v1161_v14 = vmul.f32 0.2, %v1033_v8  ;;  %vm1129_vm7 = vcmp.gt.f32.partialorder %v1065_v9, 0.0  ;;  %v1193_v15 = vmul.f32 0.2, %v1065_v9 }
 0x100   :  { %v1227_v16 = vsel %vm1099_vm4, %v1035_v4, %v1163_v12  ;;  %v1259_v17 = vsel %vm1131_vm5, %v1067_v5, %v1195_v13  ;;  %v967_v18 = vmul.f32 %v2035_v10, %v2297_v40  ;;  %v999_v19 = vmul.f32 %v2067_v11, %v2297_v40  ;;  %v520_v20 = vpop.f32.mrb[5].mxu0  ;;  %v648_v21 = vpop.f32.mrb[5].mxu1 }
 0x101   :  { %v1790_v22 = vpack.c.bf16 %v1227_v16, %v1226_v2  ;;  %v1870_v23 = vpack.c.bf16 %v1259_v17, %v1258_v3  ;;  %v1225_v24 = vsel %vm1097_vm6, %v1033_v8, %v1161_v14  ;;  %v1257_v25 = vsel %vm1129_vm7, %v1065_v9, %v1193_v15  ;;  %v2036_v26 = vpop.f32.mrb[6].mxu0  ;;  %v2068_v27 = vpop.f32.mrb[6].mxu1 }
 0x102   :  { %v1785_v28 = vpack.c.bf16 %v1225_v24, %v1224_v6  ;;  %v1865_v29 = vpack.c.bf16 %v1257_v25, %v1256_v7  ;;  %v1038_v30 = vadd.f32 %v2302_v42, %v967_v18  ;;  %v1070_v31 = vadd.f32 %v2302_v42, %v999_v19  ;;  %v523_v32 = vpop.f32.mrb[7].mxu0  ;;  %v651_v33 = vpop.f32.mrb[7].mxu1 }
 0x103   :  { %1942 = vst [vmem:[%s2630_s4 + $0x8] sm:$0xff] %v1790_v22   ;;  %1958 = vst [vmem:[%s2630_s4 + $0x88] sm:$0xff] %v1870_v23   ;;  %v965_v34 = vmul.f32 %v2297_v40, %v520_v20  ;;  %v997_v35 = vmul.f32 %v2297_v40, %v648_v21  ;;  %v968_v36 = vmul.f32 %v2036_v26, %v2297_v40 }
 0x104   :  { %v1000_v37 = vmul.f32 %v2068_v27, %v2297_v40  ;;  %1786 = vst [vmem:[%s2630_s4] sm:$0xff] %v1785_v28   ;;  %1957 = vst [vmem:[%s2630_s4 + $0x80] sm:$0xff] %v1865_v29   ;;  %vm1102_vm8 = vcmp.gt.f32.partialorder %v1038_v30, 0.0  ;;  %v1166_v38 = vmul.f32 0.2, %v1038_v30  ;;  %vm1134_vm9 = vcmp.gt.f32.partialorder %v1070_v31, 0.0 }
 0x105   :  { %v1198_v39 = vmul.f32 0.2, %v1070_v31  ;;  %v1036_v41 = vadd.f32 %v2302_v42, %v965_v34  ;;  %v1068_v43 = vadd.f32 %v2302_v42, %v997_v35  ;;  %v1039_v44 = vadd.f32 %v2302_v42, %v968_v36  ;;  %v2039_v46 = vpop.f32.mrb[8].mxu0  ;;  %v2071_v47 = vpop.f32.mrb[8].mxu1 }
 0x106   :  { %v1071_v45 = vadd.f32 %v2302_v42, %v1000_v37  ;;  %v1230_v48 = vsel %vm1102_vm8, %v1038_v30, %v1166_v38  ;;  %v966_v50 = vmul.f32 %v2297_v40, %v523_v32  ;;  %v998_v51 = vmul.f32 %v2297_v40, %v651_v33  ;;  %v536_v52 = vpop.f32.mrb[9].mxu0  ;;  %v664_v53 = vpop.f32.mrb[9].mxu1 }
 0x107   :  { %v1262_v49 = vsel %vm1134_vm9, %v1070_v31, %v1198_v39  ;;  %vm1100_vm10 = vcmp.gt.f32.partialorder %v1036_v41, 0.0  ;;  %v1164_v54 = vmul.f32 0.2, %v1036_v41  ;;  %vm1132_vm11 = vcmp.gt.f32.partialorder %v1068_v43, 0.0  ;;  %v2040_v62 = vpop.f32.mrb[10].mxu0  ;;  %v2072_v63 = vpop.f32.mrb[10].mxu1 }
 0x108   :  { %v1196_v55 = vmul.f32 0.2, %v1068_v43  ;;  %vm1103_vm12 = vcmp.gt.f32.partialorder %v1039_v44, 0.0  ;;  %v1167_v56 = vmul.f32 0.2, %v1039_v44  ;;  %vm1135_vm13 = vcmp.gt.f32.partialorder %v1071_v45, 0.0 }
 0x109   :  { %v1199_v57 = vmul.f32 0.2, %v1071_v45  ;;  %v1228_v58 = vsel %vm1100_vm10, %v1036_v41, %v1164_v54  ;;  %v1037_v60 = vadd.f32 %v2302_v42, %v966_v50  ;;  %v1069_v61 = vadd.f32 %v2302_v42, %v998_v51  ;;  %v539_v4 = vpop.f32.mrb[11].mxu0  ;;  %v667_v5 = vpop.f32.mrb[11].mxu1 }
 0x10a   :  { %v1260_v59 = vsel %vm1132_vm11, %v1068_v43, %v1196_v55  ;;  %v1231_v0 = vsel %vm1103_vm12, %v1039_v44, %v1167_v56  ;;  %v971_v2 = vmul.f32 %v2039_v46, %v2297_v40  ;;  %v1003_v3 = vmul.f32 %v2071_v47, %v2297_v40 }
 0x10b   :  { %v1263_v1 = vsel %vm1135_vm13, %v1071_v45, %v1199_v57  ;;  %v1800_v6 = vpack.c.bf16 %v1231_v0, %v1230_v48  ;;  %vm1101_vm14 = vcmp.gt.f32.partialorder %v1037_v60, 0.0  ;;  %v1165_v8 = vmul.f32 0.2, %v1037_v60 }
 0x10c   :  { %v1880_v7 = vpack.c.bf16 %v1263_v1, %v1262_v49  ;;  %vm1133_vm15 = vcmp.gt.f32.partialorder %v1069_v61, 0.0  ;;  %v1197_v9 = vmul.f32 0.2, %v1069_v61  ;;  %v1042_v10 = vadd.f32 %v2302_v42, %v971_v2 }
 0x10d   :  { %v1074_v11 = vadd.f32 %v2302_v42, %v1003_v3  ;;  %1944 = vst [vmem:[%s2630_s4 + $0x18] sm:$0xff] %v1800_v6   ;;  %v1229_v12 = vsel %vm1101_vm14, %v1037_v60, %v1165_v8  ;;  %v969_v13 = vmul.f32 %v2297_v40, %v536_v52  ;;  %v1001_v14 = vmul.f32 %v2297_v40, %v664_v53  ;;  %v2043_v16 = vpop.f32.mrb[12].mxu0  ;;  %v2075_v17 = vpop.f32.mrb[12].mxu1 }
 0x10e   :  { %1960 = vst [vmem:[%s2630_s4 + $0x98] sm:$0xff] %v1880_v7   ;;  %v972_v15 = vmul.f32 %v2040_v62, %v2297_v40  ;;  %v1795_v18 = vpack.c.bf16 %v1229_v12, %v1228_v58  ;;  %v1261_v19 = vsel %vm1133_vm15, %v1069_v61, %v1197_v9  ;;  %vm1106_vm0 = vcmp.gt.f32.partialorder %v1042_v10, 0.0  ;;  %v552_v21 = vpop.f32.mrb[13].mxu0  ;;  %v680_v22 = vpop.f32.mrb[13].mxu1 }
 0x10f   :  { %v1170_v20 = vmul.f32 0.2, %v1042_v10  ;;  %v1875_v23 = vpack.c.bf16 %v1261_v19, %v1260_v59  ;;  %vm1138_vm1 = vcmp.gt.f32.partialorder %v1074_v11, 0.0  ;;  %v1202_v24 = vmul.f32 0.2, %v1074_v11  ;;  %v2044_v26 = vpop.f32.mrb[14].mxu0 }
 0x110   :  { %v1040_v25 = vadd.f32 %v2302_v42, %v969_v13  ;;  %v2362_v27 = vpop.f32.mrb[14].mxu1  ;;  %1943 = vst [vmem:[%s2630_s4 + $0x10] sm:$0xff] %v1795_v18   ;;  %v1072_v29 = vadd.f32 %v2302_v42, %v1001_v14  ;;  %v1043_v30 = vadd.f32 %v2302_v42, %v972_v15  ;;  %v1004_v31 = vmul.f32 %v2072_v63, %v2297_v40  ;;  %v2370_v32 = vpop.f32.mrb[15].mxu0 }
 0x111   :  { %v1234_v28 = vsel %vm1106_vm0, %v1042_v10, %v1170_v20  ;;  %v2372_v33 = vpop.f32.mrb[15].mxu1  ;;  %1959 = vst [vmem:[%s2630_s4 + $0x90] sm:$0xff] %v1875_v23   ;;  %v1266_v34 = vsel %vm1138_vm1, %v1074_v11, %v1202_v24  ;;  %v970_v36 = vmul.f32 %v2297_v40, %v539_v4  ;;  %v1002_v44 = vmul.f32 %v2297_v40, %v667_v5 }
 0x112   :  { %vm1104_vm2 = vcmp.gt.f32.partialorder %v1040_v25, 0.0  ;;  %v1168_v35 = vmul.f32 0.2, %v1040_v25  ;;  %vm1136_vm3 = vcmp.gt.f32.partialorder %v1072_v29, 0.0  ;;  %v1200_v37 = vmul.f32 0.2, %v1072_v29 }
 0x113   :  { %vm1107_vm4 = vcmp.gt.f32.partialorder %v1043_v30, 0.0  ;;  %v1171_v38 = vmul.f32 0.2, %v1043_v30  ;;  %v1075_v41 = vadd.f32 %v2302_v42, %v1004_v31  ;;  %v1041_v43 = vadd.f32 %v2302_v42, %v970_v36 }
 0x114   :  { %v1232_v39 = vsel %vm1104_vm2, %v1040_v25, %v1168_v35  ;;  %v1264_v45 = vsel %vm1136_vm3, %v1072_v29, %v1200_v37  ;;  %v975_v47 = vmul.f32 %v2043_v16, %v2297_v40  ;;  %v1007_v48 = vmul.f32 %v2075_v17, %v2297_v40 }
 0x115   :  { %v1235_v46 = vsel %vm1107_vm4, %v1043_v30, %v1171_v38  ;;  %vm1139_vm5 = vcmp.gt.f32.partialorder %v1075_v41, 0.0  ;;  %v1203_v50 = vmul.f32 0.2, %v1075_v41  ;;  %vm1105_vm6 = vcmp.gt.f32.partialorder %v1041_v43, 0.0  ;;  %v2047_v51 = vpop.f32.mrb[16].mxu0  ;;  %v2383_v52 = vpop.f32.mrb[16].mxu1 }
 0x116   :  { %v1810_v49 = vpack.c.bf16 %v1235_v46, %v1234_v28  ;;  %v1169_v53 = vmul.f32 0.2, %v1041_v43  ;;  %v1073_v54 = vadd.f32 %v2302_v42, %v1002_v44  ;;  %v1046_v55 = vadd.f32 %v2302_v42, %v975_v47  ;;  %v568_v57 = vpop.f32.mrb[17].mxu0  ;;  %v696_v58 = vpop.f32.mrb[17].mxu1 }
 0x117   :  { %v1078_v56 = vadd.f32 %v2302_v42, %v1007_v48  ;;  %v1267_v59 = vsel %vm1139_vm5, %v1075_v41, %v1203_v50  ;;  %v973_v60 = vmul.f32 %v2297_v40, %v552_v21  ;;  %v1005_v61 = vmul.f32 %v2297_v40, %v680_v22  ;;  %v2394_v63 = vpop.f32.mrb[18].mxu0  ;;  %v2396_v0 = vpop.f32.mrb[18].mxu1 }
 0x118   :  { %1946 = vst [vmem:[%s2630_s4 + $0x28] sm:$0xff] %v1810_v49   ;;  %v976_v62 = vmul.f32 %v2044_v26, %v2297_v40  ;;  %v1890_v1 = vpack.c.bf16 %v1267_v59, %v1266_v34  ;;  %v1233_v2 = vsel %vm1105_vm6, %v1041_v43, %v1169_v53  ;;  %vm1137_vm7 = vcmp.gt.f32.partialorder %v1073_v54, 0.0  ;;  %v2399_v4 = vpop.f32.mrb[19].mxu0  ;;  %v2401_v5 = vpop.f32.mrb[19].mxu1 }
 0x119   :  { %v1201_v3 = vmul.f32 0.2, %v1073_v54  ;;  %v1805_v6 = vpack.c.bf16 %v1233_v2, %v1232_v39  ;;  %vm1110_vm8 = vcmp.gt.f32.partialorder %v1046_v55, 0.0  ;;  %v1174_v7 = vmul.f32 0.2, %v1046_v55 }
 0x11a   :  { %vm1142_vm9 = vcmp.gt.f32.partialorder %v1078_v56, 0.0  ;;  %1962 = vst [vmem:[%s2630_s4 + $0xa8] sm:$0xff] %v1890_v1   ;;  %v1206_v9 = vmul.f32 0.2, %v1078_v56  ;;  %v1044_v10 = vadd.f32 %v2302_v42, %v973_v60  ;;  %v1076_v11 = vadd.f32 %v2302_v42, %v1005_v61 }
 0x11b   :  { %v1265_v8 = vsel %vm1137_vm7, %v1073_v54, %v1201_v3  ;;  %1945 = vst [vmem:[%s2630_s4 + $0x20] sm:$0xff] %v1805_v6   ;;  %v1238_v13 = vsel %vm1110_vm8, %v1046_v55, %v1174_v7  ;;  %v1047_v14 = vadd.f32 %v2302_v42, %v976_v62  ;;  %v1008_v15 = vmul.f32 %v2362_v27, %v2297_v40 }
 0x11c   :  { %v1885_v12 = vpack.c.bf16 %v1265_v8, %v1264_v45  ;;  %v1270_v16 = vsel %vm1142_vm9, %v1078_v56, %v1206_v9  ;;  %vm1108_vm10 = vcmp.gt.f32.partialorder %v1044_v10, 0.0  ;;  %v1172_v17 = vmul.f32 0.2, %v1044_v10 }
 0x11d   :  { %vm1140_vm11 = vcmp.gt.f32.partialorder %v1076_v11, 0.0  ;;  %v1204_v18 = vmul.f32 0.2, %v1076_v11  ;;  %vm1111_vm12 = vcmp.gt.f32.partialorder %v1047_v14, 0.0  ;;  %v1175_v19 = vmul.f32 0.2, %v1047_v14 }
 0x11e   :  { %1961 = vst [vmem:[%s2630_s4 + $0xa0] sm:$0xff] %v1885_v12   ;;  %v1079_v20 = vadd.f32 %v2302_v42, %v1008_v15  ;;  %v2418_v21 = vpop.f32.mrb[20].mxu0  ;;  %v1236_v22 = vsel %vm1108_vm10, %v1044_v10, %v1172_v17  ;;  %v974_v23 = vmul.f32 %v2297_v40, %v2370_v32  ;;  %v1006_v24 = vmul.f32 %v2297_v40, %v2372_v33  ;;  %v2425_v26 = vpop.f32.mrb[20].mxu1 }
 0x11f   :  { %v979_v25 = vmul.f32 %v2047_v51, %v2297_v40  ;;  %v2427_v27 = vpop.f32.mrb[21].mxu0  ;;  %v1268_v28 = vsel %vm1140_vm11, %v1076_v11, %v1204_v18  ;;  %v1239_v29 = vsel %vm1111_vm12, %v1047_v14, %v1175_v19  ;;  %v2429_v31 = vpop.f32.mrb[21].mxu1  ;;  %v1011_v41 = vmul.f32 %v2383_v52, %v2297_v40 }
 0x120   :  { %vm1143_vm13 = vcmp.gt.f32.partialorder %v1079_v20, 0.0  ;;  %v1207_v30 = vmul.f32 0.2, %v1079_v20  ;;  %v2431_v34 = vpop.f32.mrb[22].mxu0  ;;  %v1820_v35 = vpack.c.bf16 %v1239_v29, %v1238_v13  ;;  %v1045_v32 = vadd.f32 %v2302_v42, %v974_v23  ;;  %v2436_v37 = vpop.f32.mrb[22].mxu1 }
 0x121   :  { %v1077_v36 = vadd.f32 %v2302_v42, %v1006_v24  ;;  %v1050_v33 = vadd.f32 %v2302_v42, %v979_v25  ;;  %v2438_v38 = vpop.f32.mrb[23].mxu0  ;;  %v977_v43 = vmul.f32 %v2297_v40, %v568_v57  ;;  %v1009_v44 = vmul.f32 %v2297_v40, %v696_v58  ;;  %v2444_v45 = vpop.f32.mrb[23].mxu1 }
 0x122   :  { %v1271_v39 = vsel %vm1143_vm13, %v1079_v20, %v1207_v30  ;;  %1948 = vst [vmem:[%s2630_s4 + $0x38] sm:$0xff] %v1820_v35   ;;  %vm1109_vm14 = vcmp.gt.f32.partialorder %v1045_v32, 0.0  ;;  %v1173_v47 = vmul.f32 0.2, %v1045_v32  ;;  %v1082_v50 = vadd.f32 %v2302_v42, %v1011_v41 }
 0x123   :  { %v1900_v46 = vpack.c.bf16 %v1271_v39, %v1270_v16  ;;  %vm1141_vm15 = vcmp.gt.f32.partialorder %v1077_v36, 0.0  ;;  %v1205_v48 = vmul.f32 0.2, %v1077_v36  ;;  %vm1114_vm0 = vcmp.gt.f32.partialorder %v1050_v33, 0.0 }
 0x124   :  { %v1178_v49 = vmul.f32 0.2, %v1050_v33  ;;  %v1237_v51 = vsel %vm1109_vm14, %v1045_v32, %v1173_v47  ;;  %v1048_v52 = vadd.f32 %v2302_v42, %v977_v43  ;;  %v1080_v53 = vadd.f32 %v2302_v42, %v1009_v44 }
 0x125   :  { %1964 = vst [vmem:[%s2630_s4 + $0xb8] sm:$0xff] %v1900_v46   ;;  %v980_v54 = vmul.f32 %v2394_v63, %v2297_v40  ;;  %v1815_v55 = vpack.c.bf16 %v1237_v51, %v1236_v22  ;;  %v1269_v56 = vsel %vm1141_vm15, %v1077_v36, %v1205_v48  ;;  %vm1146_vm1 = vcmp.gt.f32.partialorder %v1082_v50, 0.0  ;;  %v2457_v58 = vpop.f32.mrb[24].mxu0  ;;  %v2459_v59 = vpop.f32.mrb[24].mxu1 }
 0x126   :  { %v1242_v57 = vsel %vm1114_vm0, %v1050_v33, %v1178_v49  ;;  %v1895_v60 = vpack.c.bf16 %v1269_v56, %v1268_v28  ;;  %v1210_v61 = vmul.f32 0.2, %v1082_v50  ;;  %vm1112_vm2 = vcmp.gt.f32.partialorder %v1048_v52, 0.0  ;;  %v2461_v1 = vpop.f32.mrb[25].mxu0  ;;  %v2469_v6 = vpop.f32.mrb[25].mxu1 }
 0x127   :  { %v1176_v62 = vmul.f32 0.2, %v1048_v52  ;;  %1947 = vst [vmem:[%s2630_s4 + $0x30] sm:$0xff] %v1815_v55   ;;  %vm1144_vm3 = vcmp.gt.f32.partialorder %v1080_v53, 0.0  ;;  %v1208_v63 = vmul.f32 0.2, %v1080_v53  ;;  %v1051_v2 = vadd.f32 %v2302_v42, %v980_v54 }
 0x128   :  { %v1012_v3 = vmul.f32 %v2396_v0, %v2297_v40  ;;  %v2471_v7 = vpop.f32.mrb[26].mxu0  ;;  %1963 = vst [vmem:[%s2630_s4 + $0xb0] sm:$0xff] %v1895_v60   ;;  %v1274_v8 = vsel %vm1146_vm1, %v1082_v50, %v1210_v61  ;;  %v978_v10 = vmul.f32 %v2297_v40, %v2399_v4  ;;  %v1010_v11 = vmul.f32 %v2297_v40, %v2401_v5  ;;  %v2481_v12 = vpop.f32.mrb[26].mxu1 }
 0x129   :  { %v1240_v9 = vsel %vm1112_vm2, %v1048_v52, %v1176_v62  ;;  %v2483_v0 = vpop.f32.mrb[27].mxu0  ;;  %v1272_v13 = vsel %vm1144_vm3, %v1080_v53, %v1208_v63  ;;  %vm1115_vm4 = vcmp.gt.f32.partialorder %v1051_v2, 0.0  ;;  %v1179_v14 = vmul.f32 0.2, %v1051_v2  ;;  %v2486_v16 = vpop.f32.mrb[27].mxu1 }
 0x12a   :  { %v1083_v15 = vadd.f32 %v2302_v42, %v1012_v3  ;;  %v1049_v17 = vadd.f32 %v2302_v42, %v978_v10  ;;  %v1081_v18 = vadd.f32 %v2302_v42, %v1010_v11  ;;  %v983_v4 = vmul.f32 %v2418_v21, %v2297_v40 }
 0x12b   :  { %v1015_v5 = vmul.f32 %v2425_v26, %v2297_v40  ;;  %v1243_v19 = vsel %vm1115_vm4, %v1051_v2, %v1179_v14  ;;  %v981_v22 = vmul.f32 %v2297_v40, %v2427_v27  ;;  %v1013_v36 = vmul.f32 %v2297_v40, %v2429_v31 }
 0x12c   :  { %vm1147_vm5 = vcmp.gt.f32.partialorder %v1083_v15, 0.0  ;;  %v1211_v20 = vmul.f32 0.2, %v1083_v15  ;;  %v1830_v23 = vpack.c.bf16 %v1243_v19, %v1242_v57  ;;  %vm1113_vm6 = vcmp.gt.f32.partialorder %v1049_v17, 0.0 }
 0x12d   :  { %v1177_v24 = vmul.f32 0.2, %v1049_v17  ;;  %vm1145_vm7 = vcmp.gt.f32.partialorder %v1081_v18, 0.0  ;;  %v1209_v28 = vmul.f32 0.2, %v1081_v18  ;;  %v1054_v29 = vadd.f32 %v2302_v42, %v983_v4  ;;  %v2498_v21 = vpop.f32.mrb[28].mxu0 }
 0x12e   :  { %v1275_v25 = vsel %vm1147_vm5, %v1083_v15, %v1211_v20  ;;  %v1086_v30 = vadd.f32 %v2302_v42, %v1015_v5  ;;  %v2500_v35 = vpop.f32.mrb[28].mxu1  ;;  %1950 = vst [vmem:[%s2630_s4 + $0x48] sm:$0xff] %v1830_v23   ;;  %v1052_v32 = vadd.f32 %v2302_v42, %v981_v22  ;;  %v2508_v33 = vpop.f32.mrb[29].mxu0  ;;  %v1084_v53 = vadd.f32 %v2302_v42, %v1013_v36 }
 0x12f   :  { %v1910_v26 = vpack.c.bf16 %v1275_v25, %v1274_v8  ;;  %v1241_v27 = vsel %vm1113_vm6, %v1049_v17, %v1177_v24  ;;  %v2510_v39 = vpop.f32.mrb[29].mxu1  ;;  %v1273_v43 = vsel %vm1145_vm7, %v1081_v18, %v1209_v28  ;;  %vm1118_vm8 = vcmp.gt.f32.partialorder %v1054_v29, 0.0  ;;  %v2512_v46 = vpop.f32.mrb[30].mxu0 }
 0x130   :  { %v1825_v41 = vpack.c.bf16 %v1241_v27, %v1240_v9  ;;  %v1182_v44 = vmul.f32 0.2, %v1054_v29  ;;  %v2514_v47 = vpop.f32.mrb[30].mxu1  ;;  %v1905_v48 = vpack.c.bf16 %v1273_v43, %v1272_v13  ;;  %vm1150_vm9 = vcmp.gt.f32.partialorder %v1086_v30, 0.0  ;;  %v2519_v31 = vpop.f32.mrb[31].mxu0 }
 0x131   :  { %1966 = vst [vmem:[%s2630_s4 + $0xc8] sm:$0xff] %v1910_v26   ;;  %v1214_v49 = vmul.f32 0.2, %v1086_v30  ;;  %vm1116_vm10 = vcmp.gt.f32.partialorder %v1052_v32, 0.0  ;;  %v2521_v50 = vpop.f32.mrb[31].mxu1  ;;  %v984_v54 = vmul.f32 %v2431_v34, %v2297_v40  ;;  %v1016_v56 = vmul.f32 %v2436_v37, %v2297_v40 }
 0x132   :  { %1949 = vst [vmem:[%s2630_s4 + $0x40] sm:$0xff] %v1825_v41   ;;  %v1246_v51 = vsel %vm1118_vm8, %v1054_v29, %v1182_v44  ;;  %v1180_v52 = vmul.f32 0.2, %v1052_v32  ;;  %1965 = vst [vmem:[%s2630_s4 + $0xc0] sm:$0xff] %v1905_v48   ;;  %v982_v57 = vmul.f32 %v2297_v40, %v2438_v38  ;;  %v1014_v60 = vmul.f32 %v2297_v40, %v2444_v45 }
 0x133   :  { %v1278_v55 = vsel %vm1150_vm9, %v1086_v30, %v1214_v49  ;;  %vm1148_vm11 = vcmp.gt.f32.partialorder %v1084_v53, 0.0  ;;  %v1212_v62 = vmul.f32 0.2, %v1084_v53  ;;  %v1055_v63 = vadd.f32 %v2302_v42, %v984_v54 }
 0x134   :  { %v1244_v61 = vsel %vm1116_vm10, %v1052_v32, %v1180_v52  ;;  %v1087_v34 = vadd.f32 %v2302_v42, %v1016_v56  ;;  %v1053_v2 = vadd.f32 %v2302_v42, %v982_v57  ;;  %v1085_v3 = vadd.f32 %v2302_v42, %v1014_v60 }
 0x135   :  { %v987_v37 = vmul.f32 %v2457_v58, %v2297_v40  ;;  %v1276_v8 = vsel %vm1148_vm11, %v1084_v53, %v1212_v62  ;;  %vm1119_vm12 = vcmp.gt.f32.partialorder %v1055_v63, 0.0  ;;  %v1183_v38 = vmul.f32 0.2, %v1055_v63 }
 0x136   :  { %v1019_v45 = vmul.f32 %v2459_v59, %v2297_v40  ;;  %vm1151_vm13 = vcmp.gt.f32.partialorder %v1087_v34, 0.0  ;;  %v1215_v9 = vmul.f32 0.2, %v1087_v34  ;;  %vm1117_vm14 = vcmp.gt.f32.partialorder %v1053_v2, 0.0 }
 0x137   :  { %v1181_v10 = vmul.f32 0.2, %v1053_v2  ;;  %v1247_v11 = vsel %vm1119_vm12, %v1055_v63, %v1183_v38  ;;  %vm1149_vm15 = vcmp.gt.f32.partialorder %v1085_v3, 0.0  ;;  %v1213_v13 = vmul.f32 0.2, %v1085_v3 }
 0x138   :  { %v1058_v14 = vadd.f32 %v2302_v42, %v987_v37  ;;  %v1840_v15 = vpack.c.bf16 %v1247_v11, %v1246_v51  ;;  %v1279_v17 = vsel %vm1151_vm13, %v1087_v34, %v1215_v9  ;;  %v1090_v58 = vadd.f32 %v2302_v42, %v1019_v45 }
 0x139   :  { %v1245_v18 = vsel %vm1117_vm14, %v1053_v2, %v1181_v10  ;;  %v1920_v4 = vpack.c.bf16 %v1279_v17, %v1278_v55  ;;  %v1277_v19 = vsel %vm1149_vm15, %v1085_v3, %v1213_v13  ;;  %v985_v23 = vmul.f32 %v2297_v40, %v2461_v1 }
 0x13a   :  { %v1835_v5 = vpack.c.bf16 %v1245_v18, %v1244_v61  ;;  %vm1122_vm0 = vcmp.gt.f32.partialorder %v1058_v14, 0.0  ;;  %1952 = vst [vmem:[%s2630_s4 + $0x58] sm:$0xff] %v1840_v15   ;;  %v1915_v59 = vpack.c.bf16 %v1277_v19, %v1276_v8  ;;  %v1186_v20 = vmul.f32 0.2, %v1058_v14 }
 0x13b   :  { %vm1154_vm1 = vcmp.gt.f32.partialorder %v1090_v58, 0.0  ;;  %v1218_v22 = vmul.f32 0.2, %v1090_v58  ;;  %1968 = vst [vmem:[%s2630_s4 + $0xd8] sm:$0xff] %v1920_v4   ;;  %v1017_v24 = vmul.f32 %v2297_v40, %v2469_v6  ;;  %v988_v25 = vmul.f32 %v2471_v7, %v2297_v40 }
 0x13c   :  { %1951 = vst [vmem:[%s2630_s4 + $0x50] sm:$0xff] %v1835_v5   ;;  %v1020_v28 = vmul.f32 %v2481_v12, %v2297_v40  ;;  %1967 = vst [vmem:[%s2630_s4 + $0xd0] sm:$0xff] %v1915_v59   ;;  %v1250_v29 = vsel %vm1122_vm0, %v1058_v14, %v1186_v20  ;;  %v986_v26 = vmul.f32 %v2297_v40, %v2483_v0 }
 0x13d   :  { %v1282_v30 = vsel %vm1154_vm1, %v1090_v58, %v1218_v22  ;;  %v1018_v1 = vmul.f32 %v2297_v40, %v2486_v16  ;;  %v1056_v6 = vadd.f32 %v2302_v42, %v985_v23  ;;  %v1088_v27 = vadd.f32 %v2302_v42, %v1017_v24 }
 0x13e   :  { %v1059_v7 = vadd.f32 %v2302_v42, %v988_v25  ;;  %v1091_v12 = vadd.f32 %v2302_v42, %v1020_v28  ;;  %v1057_v32 = vadd.f32 %v2302_v42, %v986_v26  ;;  %v991_v41 = vmul.f32 %v2498_v21, %v2297_v40 }
 0x13f   :  { %v1089_v36 = vadd.f32 %v2302_v42, %v1018_v1  ;;  %v1023_v0 = vmul.f32 %v2500_v35, %v2297_v40  ;;  %vm1120_vm2 = vcmp.gt.f32.partialorder %v1056_v6, 0.0  ;;  %v1184_v16 = vmul.f32 0.2, %v1056_v6 }
 0x140   :  { %vm1152_vm3 = vcmp.gt.f32.partialorder %v1088_v27, 0.0  ;;  %v1216_v43 = vmul.f32 0.2, %v1088_v27  ;;  %vm1123_vm4 = vcmp.gt.f32.partialorder %v1059_v7, 0.0  ;;  %v1187_v44 = vmul.f32 0.2, %v1059_v7 }
 0x141   :  { %vm1155_vm5 = vcmp.gt.f32.partialorder %v1091_v12, 0.0  ;;  %v1219_v48 = vmul.f32 0.2, %v1091_v12  ;;  %v1248_v49 = vsel %vm1120_vm2, %v1056_v6, %v1184_v16  ;;  %vm1121_vm6 = vcmp.gt.f32.partialorder %v1057_v32, 0.0 }
 0x142   :  { %v1280_v51 = vsel %vm1152_vm3, %v1088_v27, %v1216_v43  ;;  %v1185_v52 = vmul.f32 0.2, %v1057_v32  ;;  %v1251_v53 = vsel %vm1123_vm4, %v1059_v7, %v1187_v44  ;;  %vm1153_vm7 = vcmp.gt.f32.partialorder %v1089_v36, 0.0 }
 0x143   :  { %v1283_v54 = vsel %vm1155_vm5, %v1091_v12, %v1219_v48  ;;  %v1217_v55 = vmul.f32 0.2, %v1089_v36  ;;  %v1850_v21 = vpack.c.bf16 %v1251_v53, %v1250_v29  ;;  %v1062_v35 = vadd.f32 %v2302_v42, %v991_v41 }
 0x144   :  { %v1930_v56 = vpack.c.bf16 %v1283_v54, %v1282_v30  ;;  %v1249_v57 = vsel %vm1121_vm6, %v1057_v32, %v1185_v52  ;;  %v1094_v62 = vadd.f32 %v2302_v42, %v1023_v0  ;;  %v989_v63 = vmul.f32 %v2297_v40, %v2508_v33 }
 0x145   :  { %v1845_v60 = vpack.c.bf16 %v1249_v57, %v1248_v49  ;;  %v1281_v61 = vsel %vm1153_vm7, %v1089_v36, %v1217_v55  ;;  %1954 = vst [vmem:[%s2630_s4 + $0x68] sm:$0xff] %v1850_v21   ;;  %v1190_v2 = vmul.f32 0.2, %v1062_v35  ;;  %v1021_v3 = vmul.f32 %v2297_v40, %v2510_v39 }
 0x146   :  { %1970 = vst [vmem:[%s2630_s4 + $0xe8] sm:$0xff] %v1930_v56   ;;  %v1925_v34 = vpack.c.bf16 %v1281_v61, %v1280_v51  ;;  %vm1126_vm8 = vcmp.gt.f32.partialorder %v1062_v35, 0.0  ;;  %v1060_v33 = vadd.f32 %v2302_v42, %v989_v63  ;;  %v992_v37 = vmul.f32 %v2512_v46, %v2297_v40 }
 0x147   :  { %1953 = vst [vmem:[%s2630_s4 + $0x60] sm:$0xff] %v1845_v60   ;;  %v1222_v8 = vmul.f32 0.2, %v1094_v62  ;;  %v1024_v38 = vmul.f32 %v2514_v47, %v2297_v40  ;;  %v990_v39 = vmul.f32 %v2297_v40, %v2519_v31  ;;  %vm1158_vm9 = vcmp.gt.f32.partialorder %v1094_v62, 0.0 }
 0x148   :  { %1969 = vst [vmem:[%s2630_s4 + $0xe0] sm:$0xff] %v1925_v34   ;;  %v1092_v45 = vadd.f32 %v2302_v42, %v1021_v3  ;;  %v1063_v9 = vadd.f32 %v2302_v42, %v992_v37  ;;  %v1254_v10 = vsel %vm1126_vm8, %v1062_v35, %v1190_v2  ;;  %v1188_v11 = vmul.f32 0.2, %v1060_v33 }
 0x149   :  { %v1095_v46 = vadd.f32 %v2302_v42, %v1024_v38  ;;  %v1061_v13 = vadd.f32 %v2302_v42, %v990_v39  ;;  %vm1124_vm10 = vcmp.gt.f32.partialorder %v1060_v33, 0.0  ;;  %v1022_v47 = vmul.f32 %v2297_v40, %v2521_v50 }
 0x14a   :  { %vm1127_vm11 = vcmp.gt.f32.partialorder %v1063_v9, 0.0  ;;  %v1191_v14 = vmul.f32 0.2, %v1063_v9  ;;  %v1286_v15 = vsel %vm1158_vm9, %v1094_v62, %v1222_v8  ;;  %v1220_v17 = vmul.f32 0.2, %v1092_v45 }
 0x14b   :  { %vm1159_vm12 = vcmp.gt.f32.partialorder %v1095_v46, 0.0  ;;  %v1223_v31 = vmul.f32 0.2, %v1095_v46  ;;  %vm1125_vm13 = vcmp.gt.f32.partialorder %v1061_v13, 0.0  ;;  %v1189_v58 = vmul.f32 0.2, %v1061_v13 }
 0x14c   :  { %v1255_v18 = vsel %vm1127_vm11, %v1063_v9, %v1191_v14  ;;  %v1093_v4 = vadd.f32 %v2302_v42, %v1022_v47  ;;  %v1252_v5 = vsel %vm1124_vm10, %v1060_v33, %v1188_v11  ;;  %vm1156_vm14 = vcmp.gt.f32.partialorder %v1092_v45, 0.0 }
 0x14d   :  { %v1860_v19 = vpack.c.bf16 %v1255_v18, %v1254_v10  ;;  %v1287_v59 = vsel %vm1159_vm12, %v1095_v46, %v1223_v31  ;;  %v1253_v22 = vsel %vm1125_vm13, %v1061_v13, %v1189_v58  ;;  %v1284_v50 = vsel %vm1156_vm14, %v1092_v45, %v1220_v17 }
 0x14e   :  { %v1940_v20 = vpack.c.bf16 %v1287_v59, %v1286_v15  ;;  %vm1157_vm15 = vcmp.gt.f32.partialorder %v1093_v4, 0.0  ;;  %v1221_v23 = vmul.f32 0.2, %v1093_v4  ;;  %v1855_v40 = vpack.c.bf16 %v1253_v22, %v1252_v5 }
 0x14f   :  { %1956 = vst [vmem:[%s2630_s4 + $0x78] sm:$0xff] %v1860_v19  }
 0x150   :  { %1972 = vst [vmem:[%s2630_s4 + $0xf8] sm:$0xff] %v1940_v20   ;;  %v1285_v24 = vsel %vm1157_vm15, %v1093_v4, %v1221_v23  ;;  %1955 = vst [vmem:[%s2630_s4 + $0x70] sm:$0xff] %v1855_v40  }
 0x151   :  { %v1935_v42 = vpack.c.bf16 %v1285_v24, %v1284_v50 }
 0x153   :  { %1971 = vst [vmem:[%s2630_s4 + $0xf0] sm:$0xff] %v1935_v42  }

// kernel: stage1_d_forward.5
= control target key start
LH: loop header
LB: loop body
LE: loop exit
PB: predicated region body
PF: predicated region fallthrough
CT: control target
= control target key end

     0   :  { %s4831_s1 = inlined_call_operand.vmem [shape: bf16[2048,128], index: 1, kind: input, shape index: {}]   ;;  %s4832_s0 = inlined_call_operand.vmem [shape: bf16[128,2048], index: 0, kind: input, shape index: {}]   ;;  %s4833_s2 = inlined_call_operand.vmem [shape: f32[1,128], index: 2, kind: input, shape index: {}]   ;;  %s4834_s3 = inlined_call_operand.vmem [shape: f32[1,128], index: 3, kind: input, shape index: {}]   ;;  %s4835_s4 = inlined_call_operand.vmem [shape: bf16[128,128], index: 4, kind: output, shape index: {}]  }
   0x1   :  { %v3700_v0 = vld [vmem:[%s4831_s1 + $0x40] sm:$0xff]   ;;  %v3704_v4 = vld [vmem:[%s4831_s1 + $0x48] sm:$0xff]   ;;  %v3708_v8 = vld [vmem:[%s4831_s1 + $0x50] sm:$0xff]  }
   0x2   :  { %v3701_v1 = vld [vmem:[%s4831_s1 + $0xc0] sm:$0xff]   ;;  %3188 = vmatprep.subr.bf16.mxu0 %v3700_v0  ;;  %v3705_v5 = vld [vmem:[%s4831_s1 + $0xc8] sm:$0xff]   ;;  %v3709_v9 = vld [vmem:[%s4831_s1 + $0xd0] sm:$0xff]  }
   0x3   :  { %v3702_v2 = vld [vmem:[%s4831_s1] sm:$0xff]   ;;  %3252 = vmatprep.subr.bf16.mxu1 %v3701_v1  ;;  %v3706_v6 = vld [vmem:[%s4831_s1 + $0x8] sm:$0xff]   ;;  %v3710_v10 = vld [vmem:[%s4831_s1 + $0x10] sm:$0xff]  }
   0x4   :  { %v3703_v3 = vld [vmem:[%s4831_s1 + $0x80] sm:$0xff]   ;;  %3189 = vmatpush3.bf16.msra.mxu0 %v3702_v2  ;;  %v3707_v7 = vld [vmem:[%s4831_s1 + $0x88] sm:$0xff]   ;;  %v3711_v11 = vld [vmem:[%s4831_s1 + $0x90] sm:$0xff]  }
   0x5   :  { %3253 = vmatpush3.bf16.msra.mxu1 %v3703_v3  ;;  %3190 = vmatprep.subr.bf16.mxu0 %v3704_v4  ;;  %v3712_v12 = vld [vmem:[%s4831_s1 + $0x58] sm:$0xff]   ;;  %v3716_v16 = vld [vmem:[%s4831_s1 + $0x60] sm:$0xff]   ;;  %v3720_v20 = vld [vmem:[%s4831_s1 + $0x68] sm:$0xff]  }
   0x6   :  { %3254 = vmatprep.subr.bf16.mxu1 %v3705_v5  ;;  %v3713_v13 = vld [vmem:[%s4831_s1 + $0xd8] sm:$0xff]   ;;  %v3717_v17 = vld [vmem:[%s4831_s1 + $0xe0] sm:$0xff]   ;;  %v3721_v21 = vld [vmem:[%s4831_s1 + $0xe8] sm:$0xff]  }
   0x7   :  { %v3714_v14 = vld [vmem:[%s4831_s1 + $0x18] sm:$0xff]   ;;  %v3718_v18 = vld [vmem:[%s4831_s1 + $0x20] sm:$0xff]   ;;  %v3722_v22 = vld [vmem:[%s4831_s1 + $0x28] sm:$0xff]  }
   0x8   :  { %3191 = vmatpush3.bf16.msra.mxu0 %v3706_v6  ;;  %v3715_v15 = vld [vmem:[%s4831_s1 + $0x98] sm:$0xff]   ;;  %v3719_v19 = vld [vmem:[%s4831_s1 + $0xa0] sm:$0xff]   ;;  %v3723_v23 = vld [vmem:[%s4831_s1 + $0xa8] sm:$0xff]  }
   0x9   :  { %3255 = vmatpush3.bf16.msra.mxu1 %v3707_v7  ;;  %3192 = vmatprep.subr.bf16.mxu0 %v3708_v8  ;;  %v3724_v24 = vld [vmem:[%s4831_s1 + $0x70] sm:$0xff]   ;;  %v3728_v28 = vld [vmem:[%s4831_s1 + $0x78] sm:$0xff]   ;;  %v54_v32 = vld [vmem:[%s4832_s0] sm:$0xff] }
   0xa   :  { %3256 = vmatprep.subr.bf16.mxu1 %v3709_v9  ;;  %v3725_v25 = vld [vmem:[%s4831_s1 + $0xf0] sm:$0xff]   ;;  %v3729_v29 = vld [vmem:[%s4831_s1 + $0xf8] sm:$0xff]   ;;  %v62_v33 = vld [vmem:[%s4832_s0 + $0x40] sm:$0xff] }
   0xb   :  { %v3726_v26 = vld [vmem:[%s4831_s1 + $0x30] sm:$0xff]   ;;  %v3730_v30 = vld [vmem:[%s4831_s1 + $0x38] sm:$0xff]   ;;  %v55_v34 = vld [vmem:[%s4832_s0 + $0x8] sm:$0xff]  ;;  %v2851_v35 = vcombine.low %v54_v32, %v62_v33  ;;  %v2852_v36 = vcombine.high %v54_v32, %v62_v33 }
   0xc   :  { %3193 = vmatpush3.bf16.msra.mxu0 %v3710_v10  ;;  %v3727_v27 = vld [vmem:[%s4831_s1 + $0xb0] sm:$0xff]   ;;  %v3731_v31 = vld [vmem:[%s4831_s1 + $0xb8] sm:$0xff]   ;;  %v63_v37 = vld [vmem:[%s4832_s0 + $0x48] sm:$0xff] }
   0xd   :  { %3257 = vmatpush3.bf16.msra.mxu1 %v3711_v11  ;;  %3194 = vmatprep.subr.bf16.mxu0 %v3712_v12  ;;  %v2853_v38 = vcombine.low %v55_v34, %v63_v37  ;;  %v2854_v39 = vcombine.high %v55_v34, %v63_v37  ;;  %v3732_v40 = vld [vmem:[%s4831_s1 + $0x140] sm:$0xff]   ;;  %v71_v47 = vld [vmem:[%s4832_s0 + $0x88] sm:$0xff]  ;;  %v3740_v62 = vld [vmem:[%s4831_s1 + $0x150] sm:$0xff]  }
   0xe   :  { %3258 = vmatprep.subr.bf16.mxu1 %v3713_v13  ;;  %1878 = vmatprep.mubr.bf16.mxu0 %v2852_v36  ;;  %v3733_v41 = vld [vmem:[%s4831_s1 + $0x100] sm:$0xff]   ;;  %v79_v48 = vld [vmem:[%s4832_s0 + $0xc8] sm:$0xff]  ;;  %v3741_v63 = vld [vmem:[%s4831_s1 + $0x110] sm:$0xff]  }
   0xf   :  { %1975 = vmatprep.mubr.bf16.mxu1 %v2854_v39  ;;  %v3734_v42 = vld [vmem:[%s4831_s1 + $0x1c0] sm:$0xff]   ;;  %v2870_v49 = vcombine.high %v71_v47, %v79_v48  ;;  %v3736_v50 = vld [vmem:[%s4831_s1 + $0x148] sm:$0xff]   ;;  %v2869_v53 = vcombine.low %v71_v47, %v79_v48  ;;  %v3742_v0 = vld [vmem:[%s4831_s1 + $0x1d0] sm:$0xff]  }
  0x10   :  { %3195 = vmatpush3.bf16.msra.mxu0 %v3714_v14  ;;  %v3735_v43 = vld [vmem:[%s4831_s1 + $0x180] sm:$0xff]   ;;  %v3737_v52 = vld [vmem:[%s4831_s1 + $0x108] sm:$0xff]   ;;  %v3743_v1 = vld [vmem:[%s4831_s1 + $0x190] sm:$0xff]  }
  0x11   :  { %3259 = vmatpush3.bf16.msra.mxu1 %v3715_v15  ;;  %3196 = vmatprep.subr.bf16.mxu0 %v3716_v16  ;;  %v70_v44 = vld [vmem:[%s4832_s0 + $0x80] sm:$0xff]  ;;  %v3738_v54 = vld [vmem:[%s4831_s1 + $0x1c8] sm:$0xff]   ;;  %v3744_v10 = vld [vmem:[%s4831_s1 + $0x158] sm:$0xff]  }
  0x12   :  { %3260 = vmatprep.subr.bf16.mxu1 %v3717_v17  ;;  %v78_v45 = vld [vmem:[%s4832_s0 + $0xc0] sm:$0xff]  ;;  %v3739_v55 = vld [vmem:[%s4831_s1 + $0x188] sm:$0xff]   ;;  %v3745_v11 = vld [vmem:[%s4831_s1 + $0x118] sm:$0xff]  }
  0x13   :  { %v2868_v46 = vcombine.high %v70_v44, %v78_v45  ;;  %v2867_v51 = vcombine.low %v70_v44, %v78_v45  ;;  %v86_v56 = vld [vmem:[%s4832_s0 + $0x100] sm:$0xff]  ;;  %v87_v58 = vld [vmem:[%s4832_s0 + $0x108] sm:$0xff]  ;;  %v3746_v12 = vld [vmem:[%s4831_s1 + $0x1d8] sm:$0xff]  }
  0x14   :  { %3197 = vmatpush3.bf16.msra.mxu0 %v3718_v18  ;;  %v94_v57 = vld [vmem:[%s4832_s0 + $0x140] sm:$0xff]  ;;  %v95_v59 = vld [vmem:[%s4832_s0 + $0x148] sm:$0xff]  ;;  %v3747_v13 = vld [vmem:[%s4831_s1 + $0x198] sm:$0xff]  }
  0x15   :  { %3261 = vmatpush3.bf16.msra.mxu1 %v3719_v19  ;;  %3198 = vmatprep.subr.bf16.mxu0 %v3720_v20  ;;  %v2884_v60 = vcombine.high %v86_v56, %v94_v57  ;;  %v2886_v61 = vcombine.high %v87_v58, %v95_v59  ;;  %v2883_v2 = vcombine.low %v86_v56, %v94_v57  ;;  %v102_v3 = vld [vmem:[%s4832_s0 + $0x180] sm:$0xff]  ;;  %v103_v5 = vld [vmem:[%s4832_s0 + $0x188] sm:$0xff]  ;;  %v3757_v39 = vld [vmem:[%s4831_s1 + $0x130] sm:$0xff]  }
  0x16   :  { %3262 = vmatprep.subr.bf16.mxu1 %v3721_v21  ;;  %v110_v4 = vld [vmem:[%s4832_s0 + $0x1c0] sm:$0xff]  ;;  %v2885_v6 = vcombine.low %v87_v58, %v95_v59  ;;  %v111_v8 = vld [vmem:[%s4832_s0 + $0x1c8] sm:$0xff]  ;;  %v3761_v48 = vld [vmem:[%s4831_s1 + $0x138] sm:$0xff]  }
  0x17   :  { %v2900_v7 = vcombine.high %v102_v3, %v110_v4  ;;  %v2902_v9 = vcombine.high %v103_v5, %v111_v8  ;;  %v118_v14 = vld [vmem:[%s4832_s0 + $0x200] sm:$0xff]  ;;  %v119_v16 = vld [vmem:[%s4832_s0 + $0x208] sm:$0xff]  ;;  %v2899_v19 = vcombine.low %v102_v3, %v110_v4  ;;  %v2901_v21 = vcombine.low %v103_v5, %v111_v8  ;;  %v65_v3 = vld [vmem:[%s4832_s0 + $0x58] sm:$0xff] }
  0x18   :  { %3199 = vmatpush3.bf16.msra.mxu0 %v3722_v22  ;;  %v126_v15 = vld [vmem:[%s4832_s0 + $0x240] sm:$0xff]  ;;  %v127_v17 = vld [vmem:[%s4832_s0 + $0x248] sm:$0xff]  ;;  %v72_v8 = vld [vmem:[%s4832_s0 + $0x90] sm:$0xff] }
  0x19   :  { %3263 = vmatpush3.bf16.msra.mxu1 %v3723_v23  ;;  %3200 = vmatprep.subr.bf16.mxu0 %v3724_v24  ;;  %v3748_v18 = vld [vmem:[%s4831_s1 + $0x160] sm:$0xff]   ;;  %v2916_v22 = vcombine.high %v118_v14, %v126_v15  ;;  %v2918_v24 = vcombine.high %v119_v16, %v127_v17  ;;  %v3754_v32 = vld [vmem:[%s4831_s1 + $0x1e8] sm:$0xff]   ;;  %v2915_v34 = vcombine.low %v118_v14, %v126_v15 }
  0x1a   :  { %3264 = vmatprep.subr.bf16.mxu1 %v3725_v25  ;;  %v3749_v20 = vld [vmem:[%s4831_s1 + $0x120] sm:$0xff]   ;;  %v3755_v33 = vld [vmem:[%s4831_s1 + $0x1a8] sm:$0xff]  }
  0x1b   :  { %v3750_v23 = vld [vmem:[%s4831_s1 + $0x1e0] sm:$0xff]   ;;  %v151_v44 = vld [vmem:[%s4832_s0 + $0x308] sm:$0xff] }
  0x1c   :  { %3201 = vmatpush3.bf16.msra.mxu0 %v3726_v26  ;;  %v3751_v25 = vld [vmem:[%s4831_s1 + $0x1a0] sm:$0xff]   ;;  %v159_v45 = vld [vmem:[%s4832_s0 + $0x348] sm:$0xff] }
  0x1d   :  { %3265 = vmatpush3.bf16.msra.mxu1 %v3727_v27  ;;  %3202 = vmatprep.subr.bf16.mxu0 %v3728_v28  ;;  %v134_v26 = vld [vmem:[%s4832_s0 + $0x280] sm:$0xff]  ;;  %v3752_v28 = vld [vmem:[%s4831_s1 + $0x168] sm:$0xff]  }
  0x1e   :  { %3266 = vmatprep.subr.bf16.mxu1 %v3729_v29  ;;  %v142_v27 = vld [vmem:[%s4832_s0 + $0x2c0] sm:$0xff]  ;;  %v135_v29 = vld [vmem:[%s4832_s0 + $0x288] sm:$0xff] }
  0x1f   :  { %v2932_v36 = vcombine.high %v134_v26, %v142_v27  ;;  %v2931_v47 = vcombine.low %v134_v26, %v142_v27  ;;  %v3764_v56 = vld [vmem:[%s4831_s1 + $0x240] sm:$0xff]   ;;  %v167_v57 = vld [vmem:[%s4832_s0 + $0x388] sm:$0xff]  ;;  %v3772_v26 = vld [vmem:[%s4831_s1 + $0x250] sm:$0xff]  }
  0x20   :  { %3203 = vmatpush3.bf16.msra.mxu0 %v3730_v30  ;;  %v143_v30 = vld [vmem:[%s4832_s0 + $0x2c8] sm:$0xff]  ;;  %v3766_v58 = vld [vmem:[%s4831_s1 + $0x2c0] sm:$0xff]   ;;  %v3774_v27 = vld [vmem:[%s4831_s1 + $0x2d0] sm:$0xff]  }
  0x21   :  { %3267 = vmatpush3.bf16.msra.mxu1 %v3731_v31  ;;  %3316 = vmatprep.subr.bf16.mxu0 %v3732_v40  ;;  %v3753_v31 = vld [vmem:[%s4831_s1 + $0x128] sm:$0xff]   ;;  %v2934_v37 = vcombine.high %v135_v29, %v143_v30  ;;  %v3758_v40 = vld [vmem:[%s4831_s1 + $0x1f0] sm:$0xff]   ;;  %v3767_v15 = vld [vmem:[%s4831_s1 + $0x280] sm:$0xff]  }
  0x22   :  { %3380 = vmatprep.subr.bf16.mxu1 %v3734_v42  ;;  %v158_v42 = vld [vmem:[%s4832_s0 + $0x340] sm:$0xff]  ;;  %v175_v59 = vld [vmem:[%s4832_s0 + $0x3c8] sm:$0xff] }
  0x23   :  { %1879 = vmatmul.mubr.bf16.vlgmr.msra.gmra.mrb[0].mxu0 %v2851_v35  ;;  %v2917_v35 = vcombine.low %v119_v16, %v127_v17  ;;  %v2965_v5 = vcombine.low %v167_v57, %v175_v59  ;;  %v3768_v17 = vld [vmem:[%s4831_s1 + $0x248] sm:$0xff]  }
  0x24   :  { %1976 = vmatmul.mubr.bf16.vlgmr.msra.gmra.mrb[0].mxu1 %v2853_v38  ;;  %3317 = vmatpush3.bf16.msra.mxu0 %v3733_v41  ;;  %v3756_v38 = vld [vmem:[%s4831_s1 + $0x170] sm:$0xff]   ;;  %v150_v41 = vld [vmem:[%s4832_s0 + $0x300] sm:$0xff] }
  0x25   :  { %3381 = vmatpush3.bf16.msra.mxu1 %v3735_v43  ;;  %1886 = vmatprep.mubr.bf16.mxu0 %v2868_v46  ;;  %v3759_v43 = vld [vmem:[%s4831_s1 + $0x1b0] sm:$0xff]   ;;  %v3760_v46 = vld [vmem:[%s4831_s1 + $0x178] sm:$0xff]  }
  0x26   :  { %1983 = vmatprep.mubr.bf16.mxu1 %v2870_v49  ;;  %3318 = vmatprep.subr.bf16.mxu0 %v3736_v50  ;;  %v2933_v49 = vcombine.low %v135_v29, %v143_v30  ;;  %v2948_v50 = vcombine.high %v150_v41, %v158_v42 }
  0x27   :  { %3382 = vmatprep.subr.bf16.mxu1 %v3738_v54  ;;  %v166_v54 = vld [vmem:[%s4832_s0 + $0x380] sm:$0xff] }
  0x28   :  { %3319 = vmatpush3.bf16.msra.mxu0 %v3737_v52  ;;  %v2950_v52 = vcombine.high %v151_v44, %v159_v45 }
  0x29   :  { %3383 = vmatpush3.bf16.msra.mxu1 %v3739_v55  ;;  %3320 = vmatprep.subr.bf16.mxu0 %v3740_v62  ;;  %v174_v55 = vld [vmem:[%s4832_s0 + $0x3c0] sm:$0xff] }
  0x2a   :  { %3384 = vmatprep.subr.bf16.mxu1 %v3742_v0  ;;  %v2964_v62 = vcombine.high %v166_v54, %v174_v55  ;;  %v56_v0 = vld [vmem:[%s4832_s0 + $0x10] sm:$0xff]  ;;  %v2963_v4 = vcombine.low %v166_v54, %v174_v55  ;;  %v121_v54 = vld [vmem:[%s4832_s0 + $0x218] sm:$0xff] }
  0x2b   :  { %1887 = vmatmul.mubr.bf16.gmra.mrb[4].mxu0 %v2867_v51  ;;  %v3762_v51 = vld [vmem:[%s4831_s1 + $0x1f8] sm:$0xff]  }
  0x2c   :  { %1984 = vmatmul.mubr.bf16.gmra.mrb[4].mxu1 %v2869_v53  ;;  %1894 = vmatprep.mubr.bf16.mxu0 %v2884_v60  ;;  %v3763_v53 = vld [vmem:[%s4831_s1 + $0x1b8] sm:$0xff]   ;;  %v2947_v60 = vcombine.low %v150_v41, %v158_v42  ;;  %v3780_v42 = vld [vmem:[%s4831_s1 + $0x260] sm:$0xff]  }
  0x2d   :  { %1991 = vmatprep.mubr.bf16.mxu1 %v2886_v61  ;;  %3321 = vmatpush3.bf16.msra.mxu0 %v3741_v63  ;;  %v2949_v61 = vcombine.low %v151_v44, %v159_v45  ;;  %v2966_v63 = vcombine.high %v167_v57, %v175_v59  ;;  %v3779_v41 = vld [vmem:[%s4831_s1 + $0x298] sm:$0xff]   ;;  %v3782_v44 = vld [vmem:[%s4831_s1 + $0x2e0] sm:$0xff]   ;;  %v3787_v57 = vld [vmem:[%s4831_s1 + $0x2a8] sm:$0xff]  }
  0x2e   :  { %3385 = vmatpush3.bf16.msra.mxu1 %v3743_v1  ;;  %3322 = vmatprep.subr.bf16.mxu0 %v3744_v10  ;;  %v64_v1 = vld [vmem:[%s4832_s0 + $0x50] sm:$0xff]  ;;  %v129_v55 = vld [vmem:[%s4832_s0 + $0x258] sm:$0xff] }
  0x2f   :  { %3386 = vmatprep.subr.bf16.mxu1 %v3746_v12  ;;  %v2855_v10 = vcombine.low %v56_v0, %v64_v1  ;;  %v73_v12 = vld [vmem:[%s4832_s0 + $0x98] sm:$0xff] }
  0x31   :  { %3323 = vmatpush3.bf16.msra.mxu0 %v3745_v11  ;;  %v3765_v11 = vld [vmem:[%s4831_s1 + $0x200] sm:$0xff]  }
  0x32   :  { %3387 = vmatpush3.bf16.msra.mxu1 %v3747_v13  ;;  %3324 = vmatprep.subr.bf16.mxu0 %v3748_v18  ;;  %v81_v13 = vld [vmem:[%s4832_s0 + $0xd8] sm:$0xff] }
  0x33   :  { %1895 = vmatmul.mubr.bf16.gmra.mrb[8].mxu0 %v2883_v2  ;;  %3388 = vmatprep.subr.bf16.mxu1 %v3750_v23  ;;  %v57_v2 = vld [vmem:[%s4832_s0 + $0x18] sm:$0xff]  ;;  %v2874_v18 = vcombine.high %v73_v12, %v81_v13  ;;  %v96_v23 = vld [vmem:[%s4832_s0 + $0x150] sm:$0xff]  ;;  %v2873_v29 = vcombine.low %v73_v12, %v81_v13  ;;  %v3798_v12 = vld [vmem:[%s4831_s1 + $0x3c0] sm:$0xff]   ;;  %v2921_v13 = vcombine.low %v121_v54, %v129_v55 }
  0x34   :  { %1992 = vmatmul.mubr.bf16.gmra.mrb[8].mxu1 %v2885_v6  ;;  %1902 = vmatprep.mubr.bf16.mxu0 %v2900_v7  ;;  %v2856_v6 = vcombine.high %v56_v0, %v64_v1  ;;  %v2858_v7 = vcombine.high %v57_v2, %v65_v3  ;;  %v2857_v14 = vcombine.low %v57_v2, %v65_v3  ;;  %v3789_v0 = vld [vmem:[%s4831_s1 + $0x230] sm:$0xff]   ;;  %v3792_v2 = vld [vmem:[%s4831_s1 + $0x278] sm:$0xff]  }
  0x35   :  { %1999 = vmatprep.mubr.bf16.mxu1 %v2902_v9  ;;  %3325 = vmatpush3.bf16.msra.mxu0 %v3749_v20  ;;  %v80_v9 = vld [vmem:[%s4832_s0 + $0xd0] sm:$0xff]  ;;  %v3770_v20 = vld [vmem:[%s4831_s1 + $0x2c8] sm:$0xff]  }
  0x36   :  { %3389 = vmatpush3.bf16.msra.mxu1 %v3751_v25  ;;  %3326 = vmatprep.subr.bf16.mxu0 %v3752_v28  ;;  %v2872_v16 = vcombine.high %v72_v8, %v80_v9  ;;  %v97_v25 = vld [vmem:[%s4832_s0 + $0x158] sm:$0xff]  ;;  %v2871_v28 = vcombine.low %v72_v8, %v80_v9  ;;  %v3791_v1 = vld [vmem:[%s4831_s1 + $0x2b0] sm:$0xff]  }
  0x37   :  { %3390 = vmatprep.subr.bf16.mxu1 %v3754_v32  ;;  %v3773_v32 = vld [vmem:[%s4831_s1 + $0x210] sm:$0xff]   ;;  %v3793_v8 = vld [vmem:[%s4831_s1 + $0x238] sm:$0xff]  }
  0x38   :  { %v136_v3 = vld [vmem:[%s4832_s0 + $0x290] sm:$0xff]  ;;  %v3795_v9 = vld [vmem:[%s4831_s1 + $0x2b8] sm:$0xff]  }
  0x39   :  { %3327 = vmatpush3.bf16.msra.mxu0 %v3753_v31 }
  0x3a   :  { %3391 = vmatpush3.bf16.msra.mxu1 %v3755_v33  ;;  %3328 = vmatprep.subr.bf16.mxu0 %v3756_v38  ;;  %v3775_v33 = vld [vmem:[%s4831_s1 + $0x290] sm:$0xff]   ;;  %v105_v38 = vld [vmem:[%s4832_s0 + $0x198] sm:$0xff] }
  0x3b   :  { %1903 = vmatmul.mubr.bf16.gmra.mrb[12].mxu0 %v2899_v19  ;;  %3392 = vmatprep.subr.bf16.mxu1 %v3758_v40  ;;  %v3769_v19 = vld [vmem:[%s4831_s1 + $0x208] sm:$0xff]   ;;  %v3777_v40 = vld [vmem:[%s4831_s1 + $0x218] sm:$0xff]  }
  0x3c   :  { %2000 = vmatmul.mubr.bf16.gmra.mrb[12].mxu1 %v2901_v21  ;;  %1910 = vmatprep.mubr.bf16.mxu0 %v2916_v22  ;;  %v3771_v21 = vld [vmem:[%s4831_s1 + $0x288] sm:$0xff]   ;;  %v88_v22 = vld [vmem:[%s4832_s0 + $0x110] sm:$0xff] }
  0x3d   :  { %2007 = vmatprep.mubr.bf16.mxu1 %v2918_v24  ;;  %3329 = vmatpush3.bf16.msra.mxu0 %v3757_v39  ;;  %v89_v24 = vld [vmem:[%s4832_s0 + $0x118] sm:$0xff]  ;;  %v2888_v30 = vcombine.high %v88_v22, %v96_v23 }
  0x3e   :  { %3393 = vmatpush3.bf16.msra.mxu1 %v3759_v43  ;;  %3330 = vmatprep.subr.bf16.mxu0 %v3760_v46  ;;  %v2890_v31 = vcombine.high %v89_v24, %v97_v25  ;;  %v113_v39 = vld [vmem:[%s4832_s0 + $0x1d8] sm:$0xff]  ;;  %v2887_v43 = vcombine.low %v88_v22, %v96_v23  ;;  %v2889_v45 = vcombine.low %v89_v24, %v97_v25  ;;  %v168_v24 = vld [vmem:[%s4832_s0 + $0x390] sm:$0xff] }
  0x3f   :  { %3394 = vmatprep.subr.bf16.mxu1 %v3762_v51  ;;  %v120_v51 = vld [vmem:[%s4832_s0 + $0x210] sm:$0xff] }
  0x40   :  { %v176_v25 = vld [vmem:[%s4832_s0 + $0x3d0] sm:$0xff] }
  0x41   :  { %3331 = vmatpush3.bf16.msra.mxu0 %v3761_v48  ;;  %v2906_v48 = vcombine.high %v105_v38, %v113_v39 }
  0x42   :  { %3395 = vmatpush3.bf16.msra.mxu1 %v3763_v53  ;;  %3444 = vmatprep.subr.bf16.mxu0 %v3764_v56  ;;  %v128_v53 = vld [vmem:[%s4832_s0 + $0x250] sm:$0xff]  ;;  %v3785_v56 = vld [vmem:[%s4831_s1 + $0x228] sm:$0xff]  }
  0x43   :  { %1911 = vmatmul.mubr.bf16.gmra.mrb[16].mxu0 %v2915_v34  ;;  %3508 = vmatprep.subr.bf16.mxu1 %v3766_v58  ;;  %v3776_v34 = vld [vmem:[%s4831_s1 + $0x258] sm:$0xff]   ;;  %v3788_v58 = vld [vmem:[%s4831_s1 + $0x270] sm:$0xff]  }
  0x44   :  { %2008 = vmatmul.mubr.bf16.gmra.mrb[16].mxu1 %v2917_v35  ;;  %1918 = vmatprep.mubr.bf16.mxu0 %v2932_v36  ;;  %v104_v35 = vld [vmem:[%s4832_s0 + $0x190] sm:$0xff] }
  0x45   :  { %2015 = vmatprep.mubr.bf16.mxu1 %v2934_v37  ;;  %v112_v36 = vld [vmem:[%s4832_s0 + $0x1d0] sm:$0xff]  ;;  %v3778_v37 = vld [vmem:[%s4831_s1 + $0x2d8] sm:$0xff]  }
  0x46   :  { %v2904_v46 = vcombine.high %v104_v35, %v112_v36  ;;  %v2903_v59 = vcombine.low %v104_v35, %v112_v36  ;;  %v67_v35 = vld [vmem:[%s4832_s0 + $0x68] sm:$0xff]  ;;  %v2967_v36 = vcombine.low %v168_v24, %v176_v25 }
  0x4b   :  { %1919 = vmatmul.mubr.bf16.gmra.mrb[20].mxu0 %v2931_v47  ;;  %v3781_v47 = vld [vmem:[%s4831_s1 + $0x220] sm:$0xff]  }
  0x4c   :  { %2016 = vmatmul.mubr.bf16.gmra.mrb[20].mxu1 %v2933_v49  ;;  %1926 = vmatprep.mubr.bf16.mxu0 %v2948_v50  ;;  %v3783_v49 = vld [vmem:[%s4831_s1 + $0x2a0] sm:$0xff]   ;;  %v3784_v50 = vld [vmem:[%s4831_s1 + $0x268] sm:$0xff]  }
  0x4d   :  { %2023 = vmatprep.mubr.bf16.mxu1 %v2950_v52  ;;  %v3786_v52 = vld [vmem:[%s4831_s1 + $0x2e8] sm:$0xff]  }
  0x53   :  { %1927 = vmatmul.mubr.bf16.gmra.mrb[24].mxu0 %v2947_v60  ;;  %v3790_v60 = vld [vmem:[%s4831_s1 + $0x2f0] sm:$0xff]  }
  0x54   :  { %2024 = vmatmul.mubr.bf16.gmra.mrb[24].mxu1 %v2949_v61  ;;  %1934 = vmatprep.mubr.bf16.mxu0 %v2964_v62  ;;  %v2905_v61 = vcombine.low %v105_v38, %v113_v39  ;;  %v2920_v62 = vcombine.high %v120_v51, %v128_v53 }
  0x55   :  { %2031 = vmatprep.mubr.bf16.mxu1 %v2966_v63  ;;  %v2922_v63 = vcombine.high %v121_v54, %v129_v55  ;;  %v90_v54 = vld [vmem:[%s4832_s0 + $0x120] sm:$0xff] }
  0x56   :  { %v98_v55 = vld [vmem:[%s4832_s0 + $0x160] sm:$0xff] }
  0x5b   :  { %1935 = vmatmul.mubr.bf16.gmra.mrb[28].mxu0 %v2963_v4  ;;  %v144_v4 = vld [vmem:[%s4832_s0 + $0x2d0] sm:$0xff] }
  0x5c   :  { %2032 = vmatmul.mubr.bf16.gmra.mrb[28].mxu1 %v2965_v5  ;;  %2072 = vmatprep.mubr.bf16.mxu0 %v2856_v6  ;;  %v3794_v5 = vld [vmem:[%s4831_s1 + $0x2f8] sm:$0xff]  }
  0x5d   :  { %2169 = vmatprep.mubr.bf16.mxu1 %v2858_v7  ;;  %v137_v6 = vld [vmem:[%s4832_s0 + $0x298] sm:$0xff] }
  0x5e   :  { %v145_v7 = vld [vmem:[%s4832_s0 + $0x2d8] sm:$0xff] }
  0x63   :  { %2073 = vmatmul.mubr.bf16.vlgmr.msra.gmra.mrb[32].mxu0 %v2855_v10  ;;  %v3796_v10 = vld [vmem:[%s4831_s1 + $0x340] sm:$0xff]  }
  0x64   :  { %2170 = vmatmul.mubr.bf16.vlgmr.msra.gmra.mrb[32].mxu1 %v2857_v14  ;;  %3445 = vmatpush3.bf16.msra.mxu0 %v3765_v11  ;;  %v2919_v11 = vcombine.low %v120_v51, %v128_v53  ;;  %v2936_v14 = vcombine.high %v136_v3, %v144_v4  ;;  %v3802_v51 = vld [vmem:[%s4831_s1 + $0x3c8] sm:$0xff]  }
  0x65   :  { %3509 = vmatpush3.bf16.msra.mxu1 %v3767_v15  ;;  %2080 = vmatprep.mubr.bf16.mxu0 %v2872_v16  ;;  %v2938_v15 = vcombine.high %v137_v6, %v145_v7  ;;  %v152_v16 = vld [vmem:[%s4832_s0 + $0x310] sm:$0xff]  ;;  %v3803_v53 = vld [vmem:[%s4831_s1 + $0x388] sm:$0xff]  }
  0x66   :  { %2177 = vmatprep.mubr.bf16.mxu1 %v2874_v18  ;;  %3446 = vmatprep.subr.bf16.mxu0 %v3768_v17  ;;  %v160_v17 = vld [vmem:[%s4832_s0 + $0x350] sm:$0xff]  ;;  %v153_v18 = vld [vmem:[%s4832_s0 + $0x318] sm:$0xff] }
  0x67   :  { %3510 = vmatprep.subr.bf16.mxu1 %v3770_v20  ;;  %v2935_v20 = vcombine.low %v136_v3, %v144_v4  ;;  %v2952_v22 = vcombine.high %v152_v16, %v160_v17  ;;  %v3810_v3 = vld [vmem:[%s4831_s1 + $0x3d8] sm:$0xff]   ;;  %v106_v4 = vld [vmem:[%s4832_s0 + $0x1a0] sm:$0xff] }
  0x68   :  { %3447 = vmatpush3.bf16.msra.mxu0 %v3769_v19  ;;  %v161_v19 = vld [vmem:[%s4832_s0 + $0x358] sm:$0xff] }
  0x69   :  { %3511 = vmatpush3.bf16.msra.mxu1 %v3771_v21  ;;  %3448 = vmatprep.subr.bf16.mxu0 %v3772_v26  ;;  %v2937_v21 = vcombine.low %v137_v6, %v145_v7  ;;  %v2954_v23 = vcombine.high %v153_v18, %v161_v19  ;;  %v169_v26 = vld [vmem:[%s4832_s0 + $0x398] sm:$0xff]  ;;  %v107_v6 = vld [vmem:[%s4832_s0 + $0x1a8] sm:$0xff] }
  0x6a   :  { %3512 = vmatprep.subr.bf16.mxu1 %v3774_v27  ;;  %v177_v27 = vld [vmem:[%s4832_s0 + $0x3d8] sm:$0xff] }
  0x6b   :  { %2081 = vmatmul.mubr.bf16.gmra.mrb[36].mxu0 %v2871_v28  ;;  %v2951_v28 = vcombine.low %v152_v16, %v160_v17  ;;  %v3809_v7 = vld [vmem:[%s4831_s1 + $0x318] sm:$0xff]   ;;  %v3813_v16 = vld [vmem:[%s4831_s1 + $0x320] sm:$0xff]  }
  0x6c   :  { %2178 = vmatmul.mubr.bf16.gmra.mrb[36].mxu1 %v2873_v29  ;;  %2088 = vmatprep.mubr.bf16.mxu0 %v2888_v30  ;;  %v2953_v29 = vcombine.low %v153_v18, %v161_v19  ;;  %v2968_v30 = vcombine.high %v168_v24, %v176_v25  ;;  %v3815_v17 = vld [vmem:[%s4831_s1 + $0x3a0] sm:$0xff]   ;;  %v3816_v18 = vld [vmem:[%s4831_s1 + $0x368] sm:$0xff]  }
  0x6d   :  { %2185 = vmatprep.mubr.bf16.mxu1 %v2890_v31  ;;  %3449 = vmatpush3.bf16.msra.mxu0 %v3773_v32  ;;  %v2970_v31 = vcombine.high %v169_v26, %v177_v27  ;;  %v58_v32 = vld [vmem:[%s4832_s0 + $0x20] sm:$0xff]  ;;  %v3818_v19 = vld [vmem:[%s4831_s1 + $0x3e8] sm:$0xff]  }
  0x6e   :  { %3513 = vmatpush3.bf16.msra.mxu1 %v3775_v33  ;;  %3450 = vmatprep.subr.bf16.mxu0 %v3776_v34  ;;  %v66_v33 = vld [vmem:[%s4832_s0 + $0x60] sm:$0xff]  ;;  %v59_v34 = vld [vmem:[%s4832_s0 + $0x28] sm:$0xff] }
  0x6f   :  { %3514 = vmatprep.subr.bf16.mxu1 %v3778_v37  ;;  %v2969_v37 = vcombine.low %v169_v26, %v177_v27  ;;  %v2860_v38 = vcombine.high %v58_v32, %v66_v33  ;;  %v2862_v39 = vcombine.high %v59_v34, %v67_v35  ;;  %v131_v24 = vld [vmem:[%s4832_s0 + $0x268] sm:$0xff]  ;;  %v3820_v26 = vld [vmem:[%s4831_s1 + $0x370] sm:$0xff]  }
  0x70   :  { %v3819_v25 = vld [vmem:[%s4831_s1 + $0x3a8] sm:$0xff]  }
  0x71   :  { %3451 = vmatpush3.bf16.msra.mxu0 %v3777_v40  ;;  %v74_v40 = vld [vmem:[%s4832_s0 + $0xa0] sm:$0xff] }
  0x72   :  { %3515 = vmatpush3.bf16.msra.mxu1 %v3779_v41  ;;  %3452 = vmatprep.subr.bf16.mxu0 %v3780_v42  ;;  %v82_v41 = vld [vmem:[%s4832_s0 + $0xe0] sm:$0xff]  ;;  %v2859_v42 = vcombine.low %v58_v32, %v66_v33  ;;  %v3821_v32 = vld [vmem:[%s4831_s1 + $0x330] sm:$0xff]  }
  0x73   :  { %2089 = vmatmul.mubr.bf16.gmra.mrb[40].mxu0 %v2887_v43  ;;  %3516 = vmatprep.subr.bf16.mxu1 %v3782_v44  ;;  %v75_v43 = vld [vmem:[%s4832_s0 + $0xa8] sm:$0xff]  ;;  %v3823_v33 = vld [vmem:[%s4831_s1 + $0x3b0] sm:$0xff]  }
  0x74   :  { %2186 = vmatmul.mubr.bf16.gmra.mrb[40].mxu1 %v2889_v45  ;;  %2096 = vmatprep.mubr.bf16.mxu0 %v2904_v46  ;;  %v83_v44 = vld [vmem:[%s4832_s0 + $0xe8] sm:$0xff]  ;;  %v2861_v45 = vcombine.low %v59_v34, %v67_v35  ;;  %v3797_v46 = vld [vmem:[%s4831_s1 + $0x300] sm:$0xff]   ;;  %v3824_v34 = vld [vmem:[%s4831_s1 + $0x378] sm:$0xff]  }
  0x75   :  { %2193 = vmatprep.mubr.bf16.mxu1 %v2906_v48  ;;  %3453 = vmatpush3.bf16.msra.mxu0 %v3781_v47  ;;  %v3799_v47 = vld [vmem:[%s4831_s1 + $0x380] sm:$0xff]   ;;  %v2876_v48 = vcombine.high %v74_v40, %v82_v41  ;;  %v3826_v35 = vld [vmem:[%s4831_s1 + $0x3f8] sm:$0xff]  }
  0x76   :  { %3517 = vmatpush3.bf16.msra.mxu1 %v3783_v49  ;;  %3454 = vmatprep.subr.bf16.mxu0 %v3784_v50  ;;  %v2878_v49 = vcombine.high %v75_v43, %v83_v44  ;;  %v3800_v50 = vld [vmem:[%s4831_s1 + $0x348] sm:$0xff]  }
  0x77   :  { %3518 = vmatprep.subr.bf16.mxu1 %v3786_v52  ;;  %v3801_v52 = vld [vmem:[%s4831_s1 + $0x308] sm:$0xff]  }
  0x79   :  { %3455 = vmatpush3.bf16.msra.mxu0 %v3785_v56  ;;  %v3804_v56 = vld [vmem:[%s4831_s1 + $0x350] sm:$0xff]  }
  0x7a   :  { %3519 = vmatpush3.bf16.msra.mxu1 %v3787_v57  ;;  %3456 = vmatprep.subr.bf16.mxu0 %v3788_v58  ;;  %v91_v57 = vld [vmem:[%s4832_s0 + $0x128] sm:$0xff] }
  0x7b   :  { %2097 = vmatmul.mubr.bf16.gmra.mrb[44].mxu0 %v2903_v59  ;;  %3520 = vmatprep.subr.bf16.mxu1 %v3790_v60  ;;  %v99_v58 = vld [vmem:[%s4832_s0 + $0x168] sm:$0xff]  ;;  %v3806_v59 = vld [vmem:[%s4831_s1 + $0x3d0] sm:$0xff]   ;;  %v2875_v60 = vcombine.low %v74_v40, %v82_v41  ;;  %v3827_v41 = vld [vmem:[%s4831_s1 + $0x3b8] sm:$0xff]  }
  0x7c   :  { %2194 = vmatmul.mubr.bf16.gmra.mrb[44].mxu1 %v2905_v61  ;;  %2104 = vmatprep.mubr.bf16.mxu0 %v2920_v62  ;;  %v2877_v61 = vcombine.low %v75_v43, %v83_v44  ;;  %v2892_v62 = vcombine.high %v90_v54, %v98_v55  ;;  %v147_v40 = vld [vmem:[%s4832_s0 + $0x2e8] sm:$0xff] }
  0x7d   :  { %2201 = vmatprep.mubr.bf16.mxu1 %v2922_v63  ;;  %3457 = vmatpush3.bf16.msra.mxu0 %v3789_v0  ;;  %v2894_v63 = vcombine.high %v91_v57, %v99_v58  ;;  %v3805_v0 = vld [vmem:[%s4831_s1 + $0x310] sm:$0xff]  }
  0x7e   :  { %3521 = vmatpush3.bf16.msra.mxu1 %v3791_v1  ;;  %3458 = vmatprep.subr.bf16.mxu0 %v3792_v2  ;;  %v3807_v1 = vld [vmem:[%s4831_s1 + $0x390] sm:$0xff]   ;;  %v3808_v2 = vld [vmem:[%s4831_s1 + $0x358] sm:$0xff]  }
  0x7f   :  { %3522 = vmatprep.subr.bf16.mxu1 %v3794_v5  ;;  %v114_v5 = vld [vmem:[%s4832_s0 + $0x1e0] sm:$0xff] }
  0x80   :  { %v2907_v27 = vcombine.low %v106_v4, %v114_v5 }
  0x81   :  { %3459 = vmatpush3.bf16.msra.mxu0 %v3793_v8  ;;  %v115_v8 = vld [vmem:[%s4832_s0 + $0x1e8] sm:$0xff] }
  0x82   :  { %3523 = vmatpush3.bf16.msra.mxu1 %v3795_v9  ;;  %3572 = vmatprep.subr.bf16.mxu0 %v3796_v10  ;;  %v3811_v9 = vld [vmem:[%s4831_s1 + $0x398] sm:$0xff]   ;;  %v3812_v10 = vld [vmem:[%s4831_s1 + $0x360] sm:$0xff]  }
  0x83   :  { %2105 = vmatmul.mubr.bf16.gmra.mrb[48].mxu0 %v2919_v11  ;;  %3636 = vmatprep.subr.bf16.mxu1 %v3798_v12  ;;  %v2891_v11 = vcombine.low %v90_v54, %v98_v55  ;;  %v3814_v12 = vld [vmem:[%s4831_s1 + $0x3e0] sm:$0xff]  }
  0x84   :  { %2202 = vmatmul.mubr.bf16.gmra.mrb[48].mxu1 %v2921_v13  ;;  %2112 = vmatprep.mubr.bf16.mxu0 %v2936_v14  ;;  %v2893_v13 = vcombine.low %v91_v57, %v99_v58  ;;  %v2908_v14 = vcombine.high %v106_v4, %v114_v5  ;;  %v170_v54 = vld [vmem:[%s4832_s0 + $0x3a0] sm:$0xff]  ;;  %v179_v57 = vld [vmem:[%s4832_s0 + $0x3e8] sm:$0xff] }
  0x85   :  { %2209 = vmatprep.mubr.bf16.mxu1 %v2938_v15  ;;  %v2910_v15 = vcombine.high %v107_v6, %v115_v8  ;;  %v178_v55 = vld [vmem:[%s4832_s0 + $0x3e0] sm:$0xff] }
  0x8b   :  { %2113 = vmatmul.mubr.bf16.gmra.mrb[52].mxu0 %v2935_v20  ;;  %v122_v20 = vld [vmem:[%s4832_s0 + $0x220] sm:$0xff] }
  0x8c   :  { %2210 = vmatmul.mubr.bf16.gmra.mrb[52].mxu1 %v2937_v21  ;;  %2120 = vmatprep.mubr.bf16.mxu0 %v2952_v22  ;;  %v130_v21 = vld [vmem:[%s4832_s0 + $0x260] sm:$0xff]  ;;  %v123_v22 = vld [vmem:[%s4832_s0 + $0x228] sm:$0xff] }
  0x8d   :  { %2217 = vmatprep.mubr.bf16.mxu1 %v2954_v23  ;;  %v3817_v23 = vld [vmem:[%s4831_s1 + $0x328] sm:$0xff]   ;;  %v2925_v43 = vcombine.low %v123_v22, %v131_v24 }
  0x93   :  { %2121 = vmatmul.mubr.bf16.gmra.mrb[56].mxu0 %v2951_v28  ;;  %v3822_v28 = vld [vmem:[%s4831_s1 + $0x3f0] sm:$0xff]  }
  0x94   :  { %2218 = vmatmul.mubr.bf16.gmra.mrb[56].mxu1 %v2953_v29  ;;  %2128 = vmatprep.mubr.bf16.mxu0 %v2968_v30  ;;  %v2909_v29 = vcombine.low %v107_v6, %v115_v8  ;;  %v2924_v30 = vcombine.high %v122_v20, %v130_v21  ;;  %v76_v6 = vld [vmem:[%s4832_s0 + $0xb0] sm:$0xff]  ;;  %v77_v8 = vld [vmem:[%s4832_s0 + $0xb8] sm:$0xff] }
  0x95   :  { %2225 = vmatprep.mubr.bf16.mxu1 %v2970_v31  ;;  %v2926_v31 = vcombine.high %v123_v22, %v131_v24  ;;  %v108_v22 = vld [vmem:[%s4832_s0 + $0x1b0] sm:$0xff]  ;;  %v109_v24 = vld [vmem:[%s4832_s0 + $0x1b8] sm:$0xff] }
  0x9b   :  { %2129 = vmatmul.mubr.bf16.gmra.mrb[60].mxu0 %v2967_v36  ;;  %v138_v36 = vld [vmem:[%s4832_s0 + $0x2a0] sm:$0xff] }
  0x9c   :  { %2226 = vmatmul.mubr.bf16.gmra.mrb[60].mxu1 %v2969_v37  ;;  %2266 = vmatprep.mubr.bf16.mxu0 %v2860_v38  ;;  %v146_v37 = vld [vmem:[%s4832_s0 + $0x2e0] sm:$0xff]  ;;  %v3825_v38 = vld [vmem:[%s4831_s1 + $0x338] sm:$0xff]  }
  0x9d   :  { %2363 = vmatprep.mubr.bf16.mxu1 %v2862_v39  ;;  %v139_v39 = vld [vmem:[%s4832_s0 + $0x2a8] sm:$0xff]  ;;  %v2940_v44 = vcombine.high %v138_v36, %v146_v37 }
  0xa3   :  { %2267 = vmatmul.mubr.bf16.vlgmr.msra.gmra.mrb[64].mxu0 %v2859_v42  ;;  %v2923_v42 = vcombine.low %v122_v20, %v130_v21 }
  0xa4   :  { %2364 = vmatmul.mubr.bf16.vlgmr.msra.gmra.mrb[64].mxu1 %v2861_v45  ;;  %3573 = vmatpush3.bf16.msra.mxu0 %v3797_v46  ;;  %v2942_v45 = vcombine.high %v139_v39, %v147_v40  ;;  %v154_v46 = vld [vmem:[%s4832_s0 + $0x320] sm:$0xff] }
  0xa5   :  { %3637 = vmatpush3.bf16.msra.mxu1 %v3799_v47  ;;  %2274 = vmatprep.mubr.bf16.mxu0 %v2876_v48  ;;  %v162_v47 = vld [vmem:[%s4832_s0 + $0x360] sm:$0xff]  ;;  %v155_v48 = vld [vmem:[%s4832_s0 + $0x328] sm:$0xff] }
  0xa6   :  { %2371 = vmatprep.mubr.bf16.mxu1 %v2878_v49  ;;  %3574 = vmatprep.subr.bf16.mxu0 %v3800_v50  ;;  %v163_v49 = vld [vmem:[%s4832_s0 + $0x368] sm:$0xff]  ;;  %v2939_v50 = vcombine.low %v138_v36, %v146_v37  ;;  %v2955_v58 = vcombine.low %v154_v46, %v162_v47 }
  0xa7   :  { %3638 = vmatprep.subr.bf16.mxu1 %v3802_v51  ;;  %v2941_v51 = vcombine.low %v139_v39, %v147_v40 }
  0xa8   :  { %3575 = vmatpush3.bf16.msra.mxu0 %v3801_v52  ;;  %v2956_v52 = vcombine.high %v154_v46, %v162_v47 }
  0xa9   :  { %3639 = vmatpush3.bf16.msra.mxu1 %v3803_v53  ;;  %3576 = vmatprep.subr.bf16.mxu0 %v3804_v56  ;;  %v2958_v53 = vcombine.high %v155_v48, %v163_v49  ;;  %v171_v56 = vld [vmem:[%s4832_s0 + $0x3a8] sm:$0xff] }
  0xaa   :  { %3640 = vmatprep.subr.bf16.mxu1 %v3806_v59  ;;  %v2957_v59 = vcombine.low %v155_v48, %v163_v49 }
  0xab   :  { %2275 = vmatmul.mubr.bf16.gmra.mrb[68].mxu0 %v2875_v60  ;;  %v2972_v60 = vcombine.high %v170_v54, %v178_v55 }
  0xac   :  { %2372 = vmatmul.mubr.bf16.gmra.mrb[68].mxu1 %v2877_v61  ;;  %2282 = vmatprep.mubr.bf16.mxu0 %v2892_v62  ;;  %v2974_v61 = vcombine.high %v171_v56, %v179_v57  ;;  %v60_v62 = vld [vmem:[%s4832_s0 + $0x30] sm:$0xff] }
  0xad   :  { %2379 = vmatprep.mubr.bf16.mxu1 %v2894_v63  ;;  %3577 = vmatpush3.bf16.msra.mxu0 %v3805_v0  ;;  %v68_v63 = vld [vmem:[%s4832_s0 + $0x70] sm:$0xff]  ;;  %v61_v0 = vld [vmem:[%s4832_s0 + $0x38] sm:$0xff] }
  0xae   :  { %3641 = vmatpush3.bf16.msra.mxu1 %v3807_v1  ;;  %3578 = vmatprep.subr.bf16.mxu0 %v3808_v2  ;;  %v69_v1 = vld [vmem:[%s4832_s0 + $0x78] sm:$0xff]  ;;  %v2971_v2 = vcombine.low %v170_v54, %v178_v55  ;;  %v2864_v4 = vcombine.high %v60_v62, %v68_v63 }
  0xaf   :  { %3642 = vmatprep.subr.bf16.mxu1 %v3810_v3  ;;  %v2973_v3 = vcombine.low %v171_v56, %v179_v57  ;;  %v2866_v5 = vcombine.high %v61_v0, %v69_v1  ;;  %v141_v55 = vld [vmem:[%s4832_s0 + $0x2b8] sm:$0xff] }
  0xb0   :  { %v149_v56 = vld [vmem:[%s4832_s0 + $0x2f8] sm:$0xff] }
  0xb1   :  { %3579 = vmatpush3.bf16.msra.mxu0 %v3809_v7  ;;  %v84_v7 = vld [vmem:[%s4832_s0 + $0xf0] sm:$0xff] }
  0xb2   :  { %3643 = vmatpush3.bf16.msra.mxu1 %v3811_v9  ;;  %3580 = vmatprep.subr.bf16.mxu0 %v3812_v10  ;;  %v85_v9 = vld [vmem:[%s4832_s0 + $0xf8] sm:$0xff]  ;;  %v2863_v10 = vcombine.low %v60_v62, %v68_v63 }
  0xb3   :  { %2283 = vmatmul.mubr.bf16.gmra.mrb[72].mxu0 %v2891_v11  ;;  %3644 = vmatprep.subr.bf16.mxu1 %v3814_v12  ;;  %v2865_v11 = vcombine.low %v61_v0, %v69_v1  ;;  %v2880_v12 = vcombine.high %v76_v6, %v84_v7 }
  0xb4   :  { %2380 = vmatmul.mubr.bf16.gmra.mrb[72].mxu1 %v2893_v13  ;;  %2290 = vmatprep.mubr.bf16.mxu0 %v2908_v14  ;;  %v2882_v13 = vcombine.high %v77_v8, %v85_v9  ;;  %v92_v14 = vld [vmem:[%s4832_s0 + $0x130] sm:$0xff] }
  0xb5   :  { %2387 = vmatprep.mubr.bf16.mxu1 %v2910_v15  ;;  %3581 = vmatpush3.bf16.msra.mxu0 %v3813_v16  ;;  %v100_v15 = vld [vmem:[%s4832_s0 + $0x170] sm:$0xff]  ;;  %v93_v16 = vld [vmem:[%s4832_s0 + $0x138] sm:$0xff] }
  0xb6   :  { %3645 = vmatpush3.bf16.msra.mxu1 %v3815_v17  ;;  %3582 = vmatprep.subr.bf16.mxu0 %v3816_v18  ;;  %v101_v17 = vld [vmem:[%s4832_s0 + $0x178] sm:$0xff]  ;;  %v2879_v18 = vcombine.low %v76_v6, %v84_v7  ;;  %v2896_v20 = vcombine.high %v92_v14, %v100_v15 }
  0xb7   :  { %3646 = vmatprep.subr.bf16.mxu1 %v3818_v19  ;;  %v2881_v19 = vcombine.low %v77_v8, %v85_v9  ;;  %v2898_v21 = vcombine.high %v93_v16, %v101_v17 }
  0xb9   :  { %3583 = vmatpush3.bf16.msra.mxu0 %v3817_v23  ;;  %v116_v23 = vld [vmem:[%s4832_s0 + $0x1f0] sm:$0xff] }
  0xba   :  { %3647 = vmatpush3.bf16.msra.mxu1 %v3819_v25  ;;  %3584 = vmatprep.subr.bf16.mxu0 %v3820_v26  ;;  %v117_v25 = vld [vmem:[%s4832_s0 + $0x1f8] sm:$0xff]  ;;  %v2895_v26 = vcombine.low %v92_v14, %v100_v15  ;;  %v2911_v37 = vcombine.low %v108_v22, %v116_v23 }
  0xbb   :  { %2291 = vmatmul.mubr.bf16.gmra.mrb[76].mxu0 %v2907_v27  ;;  %3648 = vmatprep.subr.bf16.mxu1 %v3822_v28  ;;  %v2897_v27 = vcombine.low %v93_v16, %v101_v17  ;;  %v2912_v28 = vcombine.high %v108_v22, %v116_v23  ;;  %v165_v14 = vld [vmem:[%s4832_s0 + $0x378] sm:$0xff] }
  0xbc   :  { %2388 = vmatmul.mubr.bf16.gmra.mrb[76].mxu1 %v2909_v29  ;;  %2298 = vmatprep.mubr.bf16.mxu0 %v2924_v30  ;;  %v2914_v29 = vcombine.high %v109_v24, %v117_v25  ;;  %v124_v30 = vld [vmem:[%s4832_s0 + $0x230] sm:$0xff] }
  0xbd   :  { %2395 = vmatprep.mubr.bf16.mxu1 %v2926_v31  ;;  %3585 = vmatpush3.bf16.msra.mxu0 %v3821_v32  ;;  %v132_v31 = vld [vmem:[%s4832_s0 + $0x270] sm:$0xff] }
  0xbe   :  { %3649 = vmatpush3.bf16.msra.mxu1 %v3823_v33  ;;  %3586 = vmatprep.subr.bf16.mxu0 %v3824_v34  ;;  %v125_v33 = vld [vmem:[%s4832_s0 + $0x238] sm:$0xff] }
  0xbf   :  { %3650 = vmatprep.subr.bf16.mxu1 %v3826_v35  ;;  %v133_v34 = vld [vmem:[%s4832_s0 + $0x278] sm:$0xff] }
  0xc0   :  { %v2930_v46 = vcombine.high %v125_v33, %v133_v34  ;;  %v2929_v63 = vcombine.low %v125_v33, %v133_v34  ;;  %v180_v33 = vld [vmem:[%s4832_s0 + $0x3f0] sm:$0xff] }
  0xc1   :  { %3587 = vmatpush3.bf16.msra.mxu0 %v3825_v38 }
  0xc2   :  { %3651 = vmatpush3.bf16.msra.mxu1 %v3827_v41  ;;  %v2913_v41 = vcombine.low %v109_v24, %v117_v25 }
  0xc3   :  { %2299 = vmatmul.mubr.bf16.gmra.mrb[80].mxu0 %v2923_v42  ;;  %v2928_v42 = vcombine.high %v124_v30, %v132_v31 }
  0xc4   :  { %2396 = vmatmul.mubr.bf16.gmra.mrb[80].mxu1 %v2925_v43  ;;  %2306 = vmatprep.mubr.bf16.mxu0 %v2940_v44 }
  0xc5   :  { %2403 = vmatprep.mubr.bf16.mxu1 %v2942_v45 }
  0xcb   :  { %2307 = vmatmul.mubr.bf16.gmra.mrb[84].mxu0 %v2939_v50 }
  0xcc   :  { %2404 = vmatmul.mubr.bf16.gmra.mrb[84].mxu1 %v2941_v51  ;;  %2314 = vmatprep.mubr.bf16.mxu0 %v2956_v52  ;;  %v140_v52 = vld [vmem:[%s4832_s0 + $0x2b0] sm:$0xff] }
  0xcd   :  { %2411 = vmatprep.mubr.bf16.mxu1 %v2958_v53  ;;  %v148_v53 = vld [vmem:[%s4832_s0 + $0x2f0] sm:$0xff] }
  0xce   :  { %v2944_v0 = vcombine.high %v140_v52, %v148_v53  ;;  %v2943_v17 = vcombine.low %v140_v52, %v148_v53 }
  0xd3   :  { %2315 = vmatmul.mubr.bf16.gmra.mrb[88].mxu0 %v2955_v58 }
  0xd4   :  { %2412 = vmatmul.mubr.bf16.gmra.mrb[88].mxu1 %v2957_v59  ;;  %2322 = vmatprep.mubr.bf16.mxu0 %v2972_v60  ;;  %v2927_v59 = vcombine.low %v124_v30, %v132_v31 }
  0xd5   :  { %2419 = vmatprep.mubr.bf16.mxu1 %v2974_v61 }
  0xdb   :  { %2323 = vmatmul.mubr.bf16.gmra.mrb[92].mxu0 %v2971_v2 }
  0xdc   :  { %2420 = vmatmul.mubr.bf16.gmra.mrb[92].mxu1 %v2973_v3  ;;  %2460 = vmatprep.mubr.bf16.mxu0 %v2864_v4  ;;  %v2946_v4 = vcombine.high %v141_v55, %v149_v56 }
  0xdd   :  { %2557 = vmatprep.mubr.bf16.mxu1 %v2866_v5 }
  0xe3   :  { %2461 = vmatmul.mubr.bf16.vlgmr.msra.gmra.mrb[96].mxu0 %v2863_v10  ;;  %v156_v10 = vld [vmem:[%s4832_s0 + $0x330] sm:$0xff] }
  0xe4   :  { %2558 = vmatmul.mubr.bf16.vlgmr.msra.gmra.mrb[96].mxu1 %v2865_v11  ;;  %2468 = vmatprep.mubr.bf16.mxu0 %v2880_v12  ;;  %v164_v11 = vld [vmem:[%s4832_s0 + $0x370] sm:$0xff] }
  0xe5   :  { %2565 = vmatprep.mubr.bf16.mxu1 %v2882_v13  ;;  %v157_v13 = vld [vmem:[%s4832_s0 + $0x338] sm:$0xff]  ;;  %v2960_v22 = vcombine.high %v156_v10, %v164_v11 }
  0xeb   :  { %2469 = vmatmul.mubr.bf16.gmra.mrb[100].mxu0 %v2879_v18 }
  0xec   :  { %2566 = vmatmul.mubr.bf16.gmra.mrb[100].mxu1 %v2881_v19  ;;  %2476 = vmatprep.mubr.bf16.mxu0 %v2896_v20 }
  0xed   :  { %2573 = vmatprep.mubr.bf16.mxu1 %v2898_v21  ;;  %v2945_v21 = vcombine.low %v141_v55, %v149_v56 }
  0xf3   :  { %2477 = vmatmul.mubr.bf16.gmra.mrb[104].mxu0 %v2895_v26  ;;  %v2962_v26 = vcombine.high %v157_v13, %v165_v14 }
  0xf4   :  { %2574 = vmatmul.mubr.bf16.gmra.mrb[104].mxu1 %v2897_v27  ;;  %2484 = vmatprep.mubr.bf16.mxu0 %v2912_v28 }
  0xf5   :  { %2581 = vmatprep.mubr.bf16.mxu1 %v2914_v29 }
  0xf6   :  { %v3204_v32 = vpop.f32.mrb[0].mxu0 }
  0xf7   :  { %v3268_v35 = vpop.f32.mrb[0].mxu1  ;;  %v3205_v36 = vpop.f32.mrb[1].mxu0 }
  0xf8   :  { %v3206_v38 = vadd.f32 %v3205_v36, %v3204_v32  ;;  %v3269_v39 = vpop.f32.mrb[1].mxu1  ;;  %v3207_v40 = vpop.f32.mrb[2].mxu0  ;;  %v172_v32 = vld [vmem:[%s4832_s0 + $0x3b0] sm:$0xff]  ;;  %v181_v36 = vld [vmem:[%s4832_s0 + $0x3f8] sm:$0xff] }
  0xf9   :  { %v3270_v43 = vadd.f32 %v3269_v39, %v3268_v35  ;;  %v3271_v44 = vpop.f32.mrb[2].mxu1  ;;  %v3208_v45 = vpop.f32.mrb[3].mxu0  ;;  %v173_v35 = vld [vmem:[%s4832_s0 + $0x3b8] sm:$0xff]  ;;  %v2959_v39 = vcombine.low %v156_v10, %v164_v11 }
  0xfa   :  { %v3209_v47 = vadd.f32 %v3208_v45, %v3207_v40  ;;  %v3272_v48 = vpop.f32.mrb[3].mxu1 }
  0xfb   :  { %v4585_v49 = vadd.f32 %v3270_v43, %v3206_v38  ;;  %v3273_v50 = vadd.f32 %v3272_v48, %v3271_v44  ;;  %2485 = vmatmul.mubr.bf16.gmra.mrb[108].mxu0 %v2911_v37  ;;  %v2961_v43 = vcombine.low %v157_v13, %v165_v14  ;;  %v2976_v44 = vcombine.high %v172_v32, %v180_v33 }
  0xfc   :  { %2582 = vmatmul.mubr.bf16.gmra.mrb[108].mxu1 %v2913_v41  ;;  %2492 = vmatprep.mubr.bf16.mxu0 %v2928_v42  ;;  %v2978_v48 = vcombine.high %v173_v35, %v181_v36 }
  0xfd   :  { %v4587_v51 = vadd.f32 %v3273_v50, %v3209_v47  ;;  %2589 = vmatprep.mubr.bf16.mxu1 %v2930_v46 }
  0xfe   :  { %v3210_v54 = vpop.f32.mrb[4].mxu0 }
  0xff   :  { %v3274_v57 = vpop.f32.mrb[4].mxu1  ;;  %v3211_v58 = vpop.f32.mrb[5].mxu0 }
 0x100   :  { %v3212_v60 = vadd.f32 %v3211_v58, %v3210_v54  ;;  %v3275_v61 = vpop.f32.mrb[5].mxu1  ;;  %v3213_v62 = vpop.f32.mrb[6].mxu0 }
 0x101   :  { %v3276_v1 = vadd.f32 %v3275_v61, %v3274_v57  ;;  %v3277_v2 = vpop.f32.mrb[6].mxu1  ;;  %v3214_v3 = vpop.f32.mrb[7].mxu0 }
 0x102   :  { %v3215_v5 = vadd.f32 %v3214_v3, %v3213_v62  ;;  %v3278_v6 = vpop.f32.mrb[7].mxu1 }
 0x103   :  { %v4601_v7 = vadd.f32 %v3276_v1, %v3212_v60  ;;  %v3279_v8 = vadd.f32 %v3278_v6, %v3277_v2  ;;  %2493 = vmatmul.mubr.bf16.gmra.mrb[112].mxu0 %v2927_v59  ;;  %v2975_v59 = vcombine.low %v172_v32, %v180_v33 }
 0x104   :  { %2590 = vmatmul.mubr.bf16.gmra.mrb[112].mxu1 %v2929_v63  ;;  %2500 = vmatprep.mubr.bf16.mxu0 %v2944_v0  ;;  %v2977_v63 = vcombine.low %v173_v35, %v181_v36 }
 0x105   :  { %v4603_v9 = vadd.f32 %v3279_v8, %v3215_v5  ;;  %2597 = vmatprep.mubr.bf16.mxu1 %v2946_v4 }
 0x106   :  { %v3216_v12 = vpop.f32.mrb[8].mxu0 }
 0x107   :  { %v3280_v15 = vpop.f32.mrb[8].mxu1  ;;  %v3217_v16 = vpop.f32.mrb[9].mxu0 }
 0x108   :  { %v3218_v18 = vadd.f32 %v3217_v16, %v3216_v12  ;;  %v3281_v19 = vpop.f32.mrb[9].mxu1  ;;  %v3219_v20 = vpop.f32.mrb[10].mxu0 }
 0x109   :  { %v3282_v23 = vadd.f32 %v3281_v19, %v3280_v15  ;;  %v3283_v24 = vpop.f32.mrb[10].mxu1  ;;  %v3220_v25 = vpop.f32.mrb[11].mxu0 }
 0x10a   :  { %v3221_v27 = vadd.f32 %v3220_v25, %v3219_v20  ;;  %v3284_v28 = vpop.f32.mrb[11].mxu1 }
 0x10b   :  { %v4617_v29 = vadd.f32 %v3282_v23, %v3218_v18  ;;  %v3285_v30 = vadd.f32 %v3284_v28, %v3283_v24  ;;  %2501 = vmatmul.mubr.bf16.gmra.mrb[116].mxu0 %v2943_v17 }
 0x10c   :  { %2598 = vmatmul.mubr.bf16.gmra.mrb[116].mxu1 %v2945_v21  ;;  %2508 = vmatprep.mubr.bf16.mxu0 %v2960_v22 }
 0x10d   :  { %v4619_v31 = vadd.f32 %v3285_v30, %v3221_v27  ;;  %2605 = vmatprep.mubr.bf16.mxu1 %v2962_v26 }
 0x10e   :  { %v3222_v34 = vpop.f32.mrb[12].mxu0 }
 0x10f   :  { %v3286_v37 = vpop.f32.mrb[12].mxu1  ;;  %v3223_v38 = vpop.f32.mrb[13].mxu0 }
 0x110   :  { %v3224_v40 = vadd.f32 %v3223_v38, %v3222_v34  ;;  %v3287_v41 = vpop.f32.mrb[13].mxu1  ;;  %v3225_v42 = vpop.f32.mrb[14].mxu0 }
 0x111   :  { %v3288_v45 = vadd.f32 %v3287_v41, %v3286_v37  ;;  %v3289_v46 = vpop.f32.mrb[14].mxu1  ;;  %v3226_v47 = vpop.f32.mrb[15].mxu0 }
 0x112   :  { %v3227_v50 = vadd.f32 %v3226_v47, %v3225_v42  ;;  %v3290_v52 = vpop.f32.mrb[15].mxu1 }
 0x113   :  { %v4633_v53 = vadd.f32 %v3288_v45, %v3224_v40  ;;  %v3291_v54 = vadd.f32 %v3290_v52, %v3289_v46  ;;  %2509 = vmatmul.mubr.bf16.gmra.mrb[120].mxu0 %v2959_v39 }
 0x114   :  { %2606 = vmatmul.mubr.bf16.gmra.mrb[120].mxu1 %v2961_v43  ;;  %2516 = vmatprep.mubr.bf16.mxu0 %v2976_v44 }
 0x115   :  { %v4635_v55 = vadd.f32 %v3291_v54, %v3227_v50  ;;  %2613 = vmatprep.mubr.bf16.mxu1 %v2978_v48 }
 0x116   :  { %v3228_v56 = vpop.f32.mrb[16].mxu0 }
 0x117   :  { %v3292_v57 = vpop.f32.mrb[16].mxu1  ;;  %v3229_v58 = vpop.f32.mrb[17].mxu0 }
 0x118   :  { %v3230_v60 = vadd.f32 %v3229_v58, %v3228_v56  ;;  %v3293_v61 = vpop.f32.mrb[17].mxu1  ;;  %v3231_v62 = vpop.f32.mrb[18].mxu0 }
 0x119   :  { %v3294_v0 = vadd.f32 %v3293_v61, %v3292_v57  ;;  %v3295_v1 = vpop.f32.mrb[18].mxu1  ;;  %v3232_v2 = vpop.f32.mrb[19].mxu0 }
 0x11a   :  { %v3233_v3 = vadd.f32 %v3232_v2, %v3231_v62  ;;  %v3296_v4 = vpop.f32.mrb[19].mxu1 }
 0x11b   :  { %v4637_v5 = vadd.f32 %v3294_v0, %v3230_v60  ;;  %v3297_v6 = vadd.f32 %v3296_v4, %v3295_v1  ;;  %2517 = vmatmul.mubr.bf16.gmra.mrb[124].mxu0 %v2975_v59 }
 0x11c   :  { %2614 = vmatmul.mubr.bf16.gmra.mrb[124].mxu1 %v2977_v63 }
 0x11d   :  { %v4639_v8 = vadd.f32 %v3297_v6, %v3233_v3 }
 0x11e   :  { %v3234_v10 = vpop.f32.mrb[20].mxu0 }
 0x11f   :  { %v3298_v11 = vpop.f32.mrb[20].mxu1  ;;  %v3235_v12 = vpop.f32.mrb[21].mxu0 }
 0x120   :  { %v3236_v13 = vadd.f32 %v3235_v12, %v3234_v10  ;;  %v3299_v14 = vpop.f32.mrb[21].mxu1  ;;  %v3237_v15 = vpop.f32.mrb[22].mxu0 }
 0x121   :  { %v3300_v16 = vadd.f32 %v3299_v14, %v3298_v11  ;;  %v3301_v17 = vpop.f32.mrb[22].mxu1  ;;  %v3238_v18 = vpop.f32.mrb[23].mxu0 }
 0x122   :  { %v3239_v19 = vadd.f32 %v3238_v18, %v3237_v15  ;;  %v3302_v20 = vpop.f32.mrb[23].mxu1 }
 0x123   :  { %v4641_v21 = vadd.f32 %v3300_v16, %v3236_v13  ;;  %v3303_v22 = vadd.f32 %v3302_v20, %v3301_v17 }
 0x125   :  { %v4643_v23 = vadd.f32 %v3303_v22, %v3239_v19 }
 0x126   :  { %v3240_v24 = vpop.f32.mrb[24].mxu0 }
 0x127   :  { %v3304_v25 = vpop.f32.mrb[24].mxu1  ;;  %v3241_v26 = vpop.f32.mrb[25].mxu0 }
 0x128   :  { %v3242_v27 = vadd.f32 %v3241_v26, %v3240_v24  ;;  %v3305_v28 = vpop.f32.mrb[25].mxu1  ;;  %v3243_v30 = vpop.f32.mrb[26].mxu0 }
 0x129   :  { %v3306_v32 = vadd.f32 %v3305_v28, %v3304_v25  ;;  %v3307_v33 = vpop.f32.mrb[26].mxu1  ;;  %v3244_v34 = vpop.f32.mrb[27].mxu0 }
 0x12a   :  { %v3245_v35 = vadd.f32 %v3244_v34, %v3243_v30  ;;  %v3308_v36 = vpop.f32.mrb[27].mxu1 }
 0x12b   :  { %v4645_v37 = vadd.f32 %v3306_v32, %v3242_v27  ;;  %v3309_v38 = vadd.f32 %v3308_v36, %v3307_v33 }
 0x12d   :  { %v4647_v39 = vadd.f32 %v3309_v38, %v3245_v35 }
 0x12e   :  { %v3246_v40 = vpop.f32.mrb[28].mxu0 }
 0x12f   :  { %v3310_v41 = vpop.f32.mrb[28].mxu1  ;;  %v3247_v42 = vpop.f32.mrb[29].mxu0 }
 0x130   :  { %v3248_v43 = vadd.f32 %v3247_v42, %v3246_v40  ;;  %v3311_v44 = vpop.f32.mrb[29].mxu1  ;;  %v3249_v45 = vpop.f32.mrb[30].mxu0 }
 0x131   :  { %v3312_v46 = vadd.f32 %v3311_v44, %v3310_v41  ;;  %v3313_v47 = vpop.f32.mrb[30].mxu1  ;;  %v3250_v48 = vpop.f32.mrb[31].mxu0 }
 0x132   :  { %v3251_v50 = vadd.f32 %v3250_v48, %v3249_v45  ;;  %v3314_v52 = vpop.f32.mrb[31].mxu1 }
 0x133   :  { %v4649_v54 = vadd.f32 %v3312_v46, %v3248_v43  ;;  %v3315_v56 = vadd.f32 %v3314_v52, %v3313_v47 }
 0x135   :  { %v4651_v57 = vadd.f32 %v3315_v56, %v3251_v50 }
 0x136   :  { %v3332_v58 = vpop.f32.mrb[32].mxu0 }
 0x137   :  { %v3396_v59 = vpop.f32.mrb[32].mxu1  ;;  %v3333_v60 = vpop.f32.mrb[33].mxu0 }
 0x138   :  { %v3334_v61 = vadd.f32 %v3333_v60, %v3332_v58  ;;  %v3397_v62 = vpop.f32.mrb[33].mxu1  ;;  %v3335_v63 = vpop.f32.mrb[34].mxu0 }
 0x139   :  { %v3398_v0 = vadd.f32 %v3397_v62, %v3396_v59  ;;  %v3399_v1 = vpop.f32.mrb[34].mxu1  ;;  %v3336_v2 = vpop.f32.mrb[35].mxu0 }
 0x13a   :  { %v2075_v3 = vadd.f32 %v3334_v61, %v4585_v49  ;;  %v3337_v4 = vadd.f32 %v3336_v2, %v3335_v63  ;;  %v3400_v6 = vpop.f32.mrb[35].mxu1 }
 0x13b   :  { %v3401_v10 = vadd.f32 %v3400_v6, %v3399_v1 }
 0x13c   :  { %v4654_v11 = vadd.f32 %v3398_v0, %v2075_v3  ;;  %v2078_v12 = vadd.f32 %v3337_v4, %v4587_v51 }
 0x13e   :  { %v4657_v13 = vadd.f32 %v3401_v10, %v2078_v12  ;;  %v3338_v14 = vpop.f32.mrb[36].mxu0 }
 0x13f   :  { %v3402_v15 = vpop.f32.mrb[36].mxu1  ;;  %v3339_v16 = vpop.f32.mrb[37].mxu0 }
 0x140   :  { %v3340_v17 = vadd.f32 %v3339_v16, %v3338_v14  ;;  %v3403_v18 = vpop.f32.mrb[37].mxu1  ;;  %v3341_v19 = vpop.f32.mrb[38].mxu0 }
 0x141   :  { %v3404_v20 = vadd.f32 %v3403_v18, %v3402_v15  ;;  %v3405_v22 = vpop.f32.mrb[38].mxu1  ;;  %v3342_v24 = vpop.f32.mrb[39].mxu0 }
 0x142   :  { %v2083_v49 = vadd.f32 %v3340_v17, %v4601_v7  ;;  %v3343_v25 = vadd.f32 %v3342_v24, %v3341_v19  ;;  %v3406_v26 = vpop.f32.mrb[39].mxu1 }
 0x143   :  { %v3407_v27 = vadd.f32 %v3406_v26, %v3405_v22 }
 0x144   :  { %v4660_v28 = vadd.f32 %v3404_v20, %v2083_v49  ;;  %v2086_v51 = vadd.f32 %v3343_v25, %v4603_v9 }
 0x146   :  { %v4663_v30 = vadd.f32 %v3407_v27, %v2086_v51  ;;  %v3344_v32 = vpop.f32.mrb[40].mxu0 }
 0x147   :  { %v3408_v33 = vpop.f32.mrb[40].mxu1  ;;  %v3345_v34 = vpop.f32.mrb[41].mxu0 }
 0x148   :  { %v3346_v35 = vadd.f32 %v3345_v34, %v3344_v32  ;;  %v3409_v36 = vpop.f32.mrb[41].mxu1  ;;  %v3347_v38 = vpop.f32.mrb[42].mxu0 }
 0x149   :  { %v3410_v40 = vadd.f32 %v3409_v36, %v3408_v33  ;;  %v3411_v41 = vpop.f32.mrb[42].mxu1  ;;  %v3348_v42 = vpop.f32.mrb[43].mxu0 }
 0x14a   :  { %v2091_v7 = vadd.f32 %v3346_v35, %v4617_v29  ;;  %v3349_v43 = vadd.f32 %v3348_v42, %v3347_v38  ;;  %v3412_v44 = vpop.f32.mrb[43].mxu1 }
 0x14b   :  { %v3413_v45 = vadd.f32 %v3412_v44, %v3411_v41 }
 0x14c   :  { %v4666_v46 = vadd.f32 %v3410_v40, %v2091_v7  ;;  %v2094_v9 = vadd.f32 %v3349_v43, %v4619_v31 }
 0x14e   :  { %v4669_v47 = vadd.f32 %v3413_v45, %v2094_v9  ;;  %v3350_v48 = vpop.f32.mrb[44].mxu0 }
 0x14f   :  { %v3414_v50 = vpop.f32.mrb[44].mxu1  ;;  %v3351_v52 = vpop.f32.mrb[45].mxu0 }
 0x150   :  { %v3352_v56 = vadd.f32 %v3351_v52, %v3350_v48  ;;  %v3415_v58 = vpop.f32.mrb[45].mxu1  ;;  %v3353_v59 = vpop.f32.mrb[46].mxu0 }
 0x151   :  { %v3416_v60 = vadd.f32 %v3415_v58, %v3414_v50  ;;  %v3417_v61 = vpop.f32.mrb[46].mxu1  ;;  %v3354_v62 = vpop.f32.mrb[47].mxu0 }
 0x152   :  { %v2099_v29 = vadd.f32 %v3352_v56, %v4633_v53  ;;  %v3355_v63 = vadd.f32 %v3354_v62, %v3353_v59  ;;  %v3418_v0 = vpop.f32.mrb[47].mxu1 }
 0x153   :  { %v3419_v1 = vadd.f32 %v3418_v0, %v3417_v61 }
 0x154   :  { %v4672_v2 = vadd.f32 %v3416_v60, %v2099_v29  ;;  %v2102_v31 = vadd.f32 %v3355_v63, %v4635_v55 }
 0x156   :  { %v4675_v3 = vadd.f32 %v3419_v1, %v2102_v31  ;;  %v3356_v4 = vpop.f32.mrb[48].mxu0 }
 0x157   :  { %v3420_v6 = vpop.f32.mrb[48].mxu1  ;;  %v3357_v10 = vpop.f32.mrb[49].mxu0 }
 0x158   :  { %v3358_v12 = vadd.f32 %v3357_v10, %v3356_v4  ;;  %v3421_v14 = vpop.f32.mrb[49].mxu1  ;;  %v3359_v15 = vpop.f32.mrb[50].mxu0 }
 0x159   :  { %v3422_v16 = vadd.f32 %v3421_v14, %v3420_v6  ;;  %v3423_v17 = vpop.f32.mrb[50].mxu1  ;;  %v3360_v18 = vpop.f32.mrb[51].mxu0 }
 0x15a   :  { %v2107_v53 = vadd.f32 %v3358_v12, %v4637_v5  ;;  %v3361_v19 = vadd.f32 %v3360_v18, %v3359_v15  ;;  %v3424_v20 = vpop.f32.mrb[51].mxu1 }
 0x15b   :  { %v3425_v22 = vadd.f32 %v3424_v20, %v3423_v17 }
 0x15c   :  { %v4678_v24 = vadd.f32 %v3422_v16, %v2107_v53  ;;  %v2110_v55 = vadd.f32 %v3361_v19, %v4639_v8 }
 0x15e   :  { %v4681_v49 = vadd.f32 %v3425_v22, %v2110_v55  ;;  %v3362_v25 = vpop.f32.mrb[52].mxu0 }
 0x15f   :  { %v3426_v26 = vpop.f32.mrb[52].mxu1  ;;  %v3363_v27 = vpop.f32.mrb[53].mxu0 }
 0x160   :  { %v3364_v51 = vadd.f32 %v3363_v27, %v3362_v25  ;;  %v3427_v32 = vpop.f32.mrb[53].mxu1  ;;  %v3365_v33 = vpop.f32.mrb[54].mxu0 }
 0x161   :  { %v3428_v34 = vadd.f32 %v3427_v32, %v3426_v26  ;;  %v3429_v35 = vpop.f32.mrb[54].mxu1  ;;  %v3366_v36 = vpop.f32.mrb[55].mxu0 }
 0x162   :  { %v2115_v5 = vadd.f32 %v3364_v51, %v4641_v21  ;;  %v3367_v38 = vadd.f32 %v3366_v36, %v3365_v33  ;;  %v3430_v40 = vpop.f32.mrb[55].mxu1 }
 0x163   :  { %v3431_v41 = vadd.f32 %v3430_v40, %v3429_v35 }
 0x164   :  { %v4684_v42 = vadd.f32 %v3428_v34, %v2115_v5  ;;  %v2118_v8 = vadd.f32 %v3367_v38, %v4643_v23 }
 0x166   :  { %v4687_v7 = vadd.f32 %v3431_v41, %v2118_v8  ;;  %v3368_v43 = vpop.f32.mrb[56].mxu0 }
 0x167   :  { %v3432_v44 = vpop.f32.mrb[56].mxu1  ;;  %v3369_v45 = vpop.f32.mrb[57].mxu0 }
 0x168   :  { %v3370_v9 = vadd.f32 %v3369_v45, %v3368_v43  ;;  %v3433_v48 = vpop.f32.mrb[57].mxu1  ;;  %v3371_v50 = vpop.f32.mrb[58].mxu0 }
 0x169   :  { %v3434_v52 = vadd.f32 %v3433_v48, %v3432_v44  ;;  %v3435_v56 = vpop.f32.mrb[58].mxu1  ;;  %v3372_v58 = vpop.f32.mrb[59].mxu0 }
 0x16a   :  { %v2123_v21 = vadd.f32 %v3370_v9, %v4645_v37  ;;  %v3373_v59 = vadd.f32 %v3372_v58, %v3371_v50  ;;  %v3436_v60 = vpop.f32.mrb[59].mxu1 }
 0x16b   :  { %v3437_v61 = vadd.f32 %v3436_v60, %v3435_v56 }
 0x16c   :  { %v4690_v62 = vadd.f32 %v3434_v52, %v2123_v21  ;;  %v2126_v23 = vadd.f32 %v3373_v59, %v4647_v39 }
 0x16e   :  { %v4693_v29 = vadd.f32 %v3437_v61, %v2126_v23  ;;  %v3374_v63 = vpop.f32.mrb[60].mxu0 }
 0x16f   :  { %v3438_v0 = vpop.f32.mrb[60].mxu1  ;;  %v3375_v1 = vpop.f32.mrb[61].mxu0 }
 0x170   :  { %v3376_v31 = vadd.f32 %v3375_v1, %v3374_v63  ;;  %v3439_v4 = vpop.f32.mrb[61].mxu1  ;;  %v3377_v6 = vpop.f32.mrb[62].mxu0 }
 0x171   :  { %v3440_v10 = vadd.f32 %v3439_v4, %v3438_v0  ;;  %v3441_v12 = vpop.f32.mrb[62].mxu1  ;;  %v3378_v14 = vpop.f32.mrb[63].mxu0 }
 0x172   :  { %v2131_v37 = vadd.f32 %v3376_v31, %v4649_v54  ;;  %v3379_v15 = vadd.f32 %v3378_v14, %v3377_v6  ;;  %v3442_v16 = vpop.f32.mrb[63].mxu1 }
 0x173   :  { %v3443_v17 = vadd.f32 %v3442_v16, %v3441_v12 }
 0x174   :  { %v4696_v18 = vadd.f32 %v3440_v10, %v2131_v37  ;;  %v2134_v39 = vadd.f32 %v3379_v15, %v4651_v57 }
 0x176   :  { %v4699_v53 = vadd.f32 %v3443_v17, %v2134_v39  ;;  %v3460_v19 = vpop.f32.mrb[64].mxu0 }
 0x177   :  { %v3524_v20 = vpop.f32.mrb[64].mxu1  ;;  %v3461_v22 = vpop.f32.mrb[65].mxu0 }
 0x178   :  { %v3462_v55 = vadd.f32 %v3461_v22, %v3460_v19  ;;  %v3525_v25 = vpop.f32.mrb[65].mxu1  ;;  %v3463_v26 = vpop.f32.mrb[66].mxu0 }
 0x179   :  { %v3526_v27 = vadd.f32 %v3525_v25, %v3524_v20  ;;  %v3527_v51 = vpop.f32.mrb[66].mxu1  ;;  %v3464_v32 = vpop.f32.mrb[67].mxu0 }
 0x17a   :  { %v2269_v54 = vadd.f32 %v3462_v55, %v4654_v11  ;;  %v3465_v33 = vadd.f32 %v3464_v32, %v3463_v26  ;;  %v3528_v34 = vpop.f32.mrb[67].mxu1 }
 0x17b   :  { %v3529_v35 = vadd.f32 %v3528_v34, %v3527_v51 }
 0x17c   :  { %v4702_v36 = vadd.f32 %v3526_v27, %v2269_v54  ;;  %v2272_v57 = vadd.f32 %v3465_v33, %v4657_v13 }
 0x17e   :  { %v4705_v5 = vadd.f32 %v3529_v35, %v2272_v57  ;;  %v3466_v38 = vpop.f32.mrb[68].mxu0 }
 0x17f   :  { %v3530_v40 = vpop.f32.mrb[68].mxu1  ;;  %v3467_v41 = vpop.f32.mrb[69].mxu0 }
 0x180   :  { %v3468_v8 = vadd.f32 %v3467_v41, %v3466_v38  ;;  %v3531_v43 = vpop.f32.mrb[69].mxu1  ;;  %v3469_v44 = vpop.f32.mrb[70].mxu0 }
 0x181   :  { %v3532_v45 = vadd.f32 %v3531_v43, %v3530_v40  ;;  %v3533_v9 = vpop.f32.mrb[70].mxu1  ;;  %v3470_v48 = vpop.f32.mrb[71].mxu0 }
 0x182   :  { %v2277_v11 = vadd.f32 %v3468_v8, %v4660_v28  ;;  %v3471_v50 = vadd.f32 %v3470_v48, %v3469_v44  ;;  %v3534_v52 = vpop.f32.mrb[71].mxu1 }
 0x183   :  { %v3535_v56 = vadd.f32 %v3534_v52, %v3533_v9 }
 0x184   :  { %v4708_v58 = vadd.f32 %v3532_v45, %v2277_v11  ;;  %v2280_v13 = vadd.f32 %v3471_v50, %v4663_v30 }
 0x186   :  { %v4711_v21 = vadd.f32 %v3535_v56, %v2280_v13  ;;  %v3472_v59 = vpop.f32.mrb[72].mxu0 }
 0x187   :  { %v3536_v60 = vpop.f32.mrb[72].mxu1  ;;  %v3473_v61 = vpop.f32.mrb[73].mxu0 }
 0x188   :  { %v3474_v23 = vadd.f32 %v3473_v61, %v3472_v59  ;;  %v3537_v63 = vpop.f32.mrb[73].mxu1  ;;  %v3475_v0 = vpop.f32.mrb[74].mxu0 }
 0x189   :  { %v3538_v1 = vadd.f32 %v3537_v63, %v3536_v60  ;;  %v3539_v31 = vpop.f32.mrb[74].mxu1  ;;  %v3476_v4 = vpop.f32.mrb[75].mxu0 }
 0x18a   :  { %v2285_v28 = vadd.f32 %v3474_v23, %v4666_v46  ;;  %v3477_v6 = vadd.f32 %v3476_v4, %v3475_v0  ;;  %v3540_v10 = vpop.f32.mrb[75].mxu1 }
 0x18b   :  { %v3541_v12 = vadd.f32 %v3540_v10, %v3539_v31 }
 0x18c   :  { %v4714_v14 = vadd.f32 %v3538_v1, %v2285_v28  ;;  %v2288_v30 = vadd.f32 %v3477_v6, %v4669_v47 }
 0x18e   :  { %v4717_v37 = vadd.f32 %v3541_v12, %v2288_v30  ;;  %v3478_v15 = vpop.f32.mrb[76].mxu0 }
 0x18f   :  { %v3542_v16 = vpop.f32.mrb[76].mxu1  ;;  %v3479_v17 = vpop.f32.mrb[77].mxu0 }
 0x190   :  { %v3480_v39 = vadd.f32 %v3479_v17, %v3478_v15  ;;  %v3543_v19 = vpop.f32.mrb[77].mxu1  ;;  %v3481_v20 = vpop.f32.mrb[78].mxu0 }
 0x191   :  { %v3544_v22 = vadd.f32 %v3543_v19, %v3542_v16  ;;  %v3545_v55 = vpop.f32.mrb[78].mxu1  ;;  %v3482_v25 = vpop.f32.mrb[79].mxu0 }
 0x192   :  { %v2293_v46 = vadd.f32 %v3480_v39, %v4672_v2  ;;  %v3483_v26 = vadd.f32 %v3482_v25, %v3481_v20  ;;  %v3546_v27 = vpop.f32.mrb[79].mxu1 }
 0x193   :  { %v3547_v51 = vadd.f32 %v3546_v27, %v3545_v55 }
 0x194   :  { %v4720_v32 = vadd.f32 %v3544_v22, %v2293_v46  ;;  %v2296_v47 = vadd.f32 %v3483_v26, %v4675_v3 }
 0x196   :  { %v4723_v54 = vadd.f32 %v3547_v51, %v2296_v47  ;;  %v3484_v33 = vpop.f32.mrb[80].mxu0 }
 0x197   :  { %v3548_v34 = vpop.f32.mrb[80].mxu1  ;;  %v3485_v35 = vpop.f32.mrb[81].mxu0 }
 0x198   :  { %v3486_v57 = vadd.f32 %v3485_v35, %v3484_v33  ;;  %v3549_v38 = vpop.f32.mrb[81].mxu1  ;;  %v3487_v40 = vpop.f32.mrb[82].mxu0 }
 0x199   :  { %v3550_v41 = vadd.f32 %v3549_v38, %v3548_v34  ;;  %v3551_v8 = vpop.f32.mrb[82].mxu1  ;;  %v3488_v43 = vpop.f32.mrb[83].mxu0 }
 0x19a   :  { %v2301_v2 = vadd.f32 %v3486_v57, %v4678_v24  ;;  %v3489_v44 = vadd.f32 %v3488_v43, %v3487_v40  ;;  %v3552_v45 = vpop.f32.mrb[83].mxu1 }
 0x19b   :  { %v3553_v9 = vadd.f32 %v3552_v45, %v3551_v8 }
 0x19c   :  { %v4726_v48 = vadd.f32 %v3550_v41, %v2301_v2  ;;  %v2304_v3 = vadd.f32 %v3489_v44, %v4681_v49 }
 0x19e   :  { %v4729_v11 = vadd.f32 %v3553_v9, %v2304_v3  ;;  %v3490_v50 = vpop.f32.mrb[84].mxu0 }
 0x19f   :  { %v3554_v52 = vpop.f32.mrb[84].mxu1  ;;  %v3491_v56 = vpop.f32.mrb[85].mxu0 }
 0x1a0   :  { %v3492_v13 = vadd.f32 %v3491_v56, %v3490_v50  ;;  %v3555_v59 = vpop.f32.mrb[85].mxu1  ;;  %v3493_v60 = vpop.f32.mrb[86].mxu0 }
 0x1a1   :  { %v3556_v61 = vadd.f32 %v3555_v59, %v3554_v52  ;;  %v3557_v23 = vpop.f32.mrb[86].mxu1  ;;  %v3494_v63 = vpop.f32.mrb[87].mxu0 }
 0x1a2   :  { %v2309_v24 = vadd.f32 %v3492_v13, %v4684_v42  ;;  %v3495_v0 = vadd.f32 %v3494_v63, %v3493_v60  ;;  %v3558_v1 = vpop.f32.mrb[87].mxu1 }
 0x1a3   :  { %v3559_v31 = vadd.f32 %v3558_v1, %v3557_v23  ;;  %v4753_v23 = vld [vmem:[%s4833_s2] ss:$0 sm:$0xff] }
 0x1a4   :  { %v4732_v4 = vadd.f32 %v3556_v61, %v2309_v24  ;;  %v2312_v49 = vadd.f32 %v3495_v0, %v4687_v7  ;;  %v4759_v0 = vld [vmem:[%s4834_s3] ss:$0 sm:$0xff] }
 0x1a6   :  { %v4735_v28 = vadd.f32 %v3559_v31, %v2312_v49  ;;  %v3496_v6 = vpop.f32.mrb[88].mxu0 }
 0x1a7   :  { %v3560_v10 = vpop.f32.mrb[88].mxu1  ;;  %v3497_v12 = vpop.f32.mrb[89].mxu0 }
 0x1a8   :  { %v3498_v30 = vadd.f32 %v3497_v12, %v3496_v6  ;;  %v3561_v15 = vpop.f32.mrb[89].mxu1  ;;  %v3499_v16 = vpop.f32.mrb[90].mxu0 }
 0x1a9   :  { %v3562_v17 = vadd.f32 %v3561_v15, %v3560_v10  ;;  %v3563_v39 = vpop.f32.mrb[90].mxu1  ;;  %v3500_v19 = vpop.f32.mrb[91].mxu0 }
 0x1aa   :  { %v2317_v42 = vadd.f32 %v3498_v30, %v4690_v62  ;;  %v3501_v20 = vadd.f32 %v3500_v19, %v3499_v16  ;;  %v3564_v22 = vpop.f32.mrb[91].mxu1 }
 0x1ab   :  { %v3565_v55 = vadd.f32 %v3564_v22, %v3563_v39 }
 0x1ac   :  { %v4738_v25 = vadd.f32 %v3562_v17, %v2317_v42  ;;  %v2320_v7 = vadd.f32 %v3501_v20, %v4693_v29 }
 0x1ae   :  { %v4741_v46 = vadd.f32 %v3565_v55, %v2320_v7  ;;  %v3502_v26 = vpop.f32.mrb[92].mxu0 }
 0x1af   :  { %v3566_v27 = vpop.f32.mrb[92].mxu1  ;;  %v3503_v51 = vpop.f32.mrb[93].mxu0 }
 0x1b0   :  { %v3504_v47 = vadd.f32 %v3503_v51, %v3502_v26  ;;  %v3567_v33 = vpop.f32.mrb[93].mxu1  ;;  %v3505_v34 = vpop.f32.mrb[94].mxu0 }
 0x1b1   :  { %v3568_v35 = vadd.f32 %v3567_v33, %v3566_v27  ;;  %v3569_v57 = vpop.f32.mrb[94].mxu1  ;;  %v3506_v38 = vpop.f32.mrb[95].mxu0 }
 0x1b2   :  { %v2325_v62 = vadd.f32 %v3504_v47, %v4696_v18  ;;  %v3507_v40 = vadd.f32 %v3506_v38, %v3505_v34  ;;  %v3570_v41 = vpop.f32.mrb[95].mxu1 }
 0x1b3   :  { %v3571_v8 = vadd.f32 %v3570_v41, %v3569_v57 }
 0x1b4   :  { %v4744_v43 = vadd.f32 %v3568_v35, %v2325_v62  ;;  %v2328_v29 = vadd.f32 %v3507_v40, %v4699_v53 }
 0x1b6   :  { %v4747_v2 = vadd.f32 %v3571_v8, %v2328_v29  ;;  %v3588_v44 = vpop.f32.mrb[96].mxu0 }
 0x1b7   :  { %v3652_v45 = vpop.f32.mrb[96].mxu1  ;;  %v3589_v9 = vpop.f32.mrb[97].mxu0 }
 0x1b8   :  { %v3590_v3 = vadd.f32 %v3589_v9, %v3588_v44  ;;  %v3653_v50 = vpop.f32.mrb[97].mxu1  ;;  %v3591_v52 = vpop.f32.mrb[98].mxu0 }
 0x1b9   :  { %v3654_v56 = vadd.f32 %v3653_v50, %v3652_v45  ;;  %v3655_v13 = vpop.f32.mrb[98].mxu1  ;;  %v3592_v59 = vpop.f32.mrb[99].mxu0 }
 0x1ba   :  { %v2463_v18 = vadd.f32 %v3590_v3, %v4702_v36  ;;  %v3593_v60 = vadd.f32 %v3592_v59, %v3591_v52  ;;  %v3656_v61 = vpop.f32.mrb[99].mxu1 }
 0x1bb   :  { %v3657_v53 = vadd.f32 %v3656_v61, %v3655_v13 }
 0x1bc   :  { %v2560_v63 = vadd.f32 %v3654_v56, %v2463_v18  ;;  %v2466_v24 = vadd.f32 %v3593_v60, %v4705_v5 }
 0x1be   :  { %v2680_v1 = vmul.f32 %v4753_v23, %v2560_v63  ;;  %v2563_v31 = vadd.f32 %v3657_v53, %v2466_v24  ;;  %v3594_v36 = vpop.f32.mrb[100].mxu0 }
 0x1bf   :  { %v3658_v49 = vpop.f32.mrb[100].mxu1  ;;  %v3595_v6 = vpop.f32.mrb[101].mxu0 }
 0x1c0   :  { %v2703_v10 = vadd.f32 %v4759_v0, %v2680_v1  ;;  %v2681_v12 = vmul.f32 %v4753_v23, %v2563_v31  ;;  %v3596_v30 = vadd.f32 %v3595_v6, %v3594_v36  ;;  %v3659_v15 = vpop.f32.mrb[101].mxu1  ;;  %v3597_v16 = vpop.f32.mrb[102].mxu0 }
 0x1c1   :  { %v3660_v17 = vadd.f32 %v3659_v15, %v3658_v49  ;;  %v3661_v5 = vpop.f32.mrb[102].mxu1  ;;  %v3598_v39 = vpop.f32.mrb[103].mxu0 }
 0x1c2   :  { %v2735_v19 = vmul.f32 0.2, %v2703_v10  ;;  %v2704_v42 = vadd.f32 %v4759_v0, %v2681_v12  ;;  %v2471_v20 = vadd.f32 %v3596_v30, %v4708_v58  ;;  %v3662_v22 = vpop.f32.mrb[103].mxu1  ;;  %vm2719_vm0 = vcmp.gt.f32.partialorder %v2703_v10, 0.0 }
 0x1c3   :  { %v3599_v55 = vadd.f32 %v3598_v39, %v3597_v16  ;;  %v3663_v7 = vadd.f32 %v3662_v22, %v3661_v5 }
 0x1c4   :  { %vm2720_vm1 = vcmp.gt.f32.partialorder %v2704_v42, 0.0  ;;  %v2736_v26 = vmul.f32 0.2, %v2704_v42  ;;  %v2568_v27 = vadd.f32 %v3660_v17, %v2471_v20  ;;  %v2751_v47 = vsel %vm2719_vm0, %v2703_v10, %v2735_v19 }
 0x1c5   :  { %v2474_v51 = vadd.f32 %v3599_v55, %v4711_v21 }
 0x1c6   :  { %v2752_v33 = vsel %vm2720_vm1, %v2704_v42, %v2736_v26  ;;  %v2682_v34 = vmul.f32 %v4753_v23, %v2568_v27  ;;  %v3600_v35 = vpop.f32.mrb[104].mxu0 }
 0x1c7   :  { %v3144_v57 = vpack.c.bf16 %v2752_v33, %v2751_v47  ;;  %v2571_v38 = vadd.f32 %v3663_v7, %v2474_v51  ;;  %v3664_v62 = vpop.f32.mrb[104].mxu1  ;;  %v3601_v40 = vpop.f32.mrb[105].mxu0 }
 0x1c8   :  { %v2705_v58 = vadd.f32 %v4759_v0, %v2682_v34  ;;  %v3602_v41 = vadd.f32 %v3601_v40, %v3600_v35  ;;  %v3665_v8 = vpop.f32.mrb[105].mxu1  ;;  %v3603_v29 = vpop.f32.mrb[106].mxu0 }
 0x1c9   :  { %3145 = vst [vmem:[%s4835_s4] sm:$0xff] %v3144_v57   ;;  %v2683_v21 = vmul.f32 %v4753_v23, %v2571_v38  ;;  %v3666_v44 = vadd.f32 %v3665_v8, %v3664_v62  ;;  %v3667_v45 = vpop.f32.mrb[106].mxu1  ;;  %v3604_v9 = vpop.f32.mrb[107].mxu0 }
 0x1ca   :  { %v2479_v3 = vadd.f32 %v3602_v41, %v4714_v14  ;;  %v3605_v50 = vadd.f32 %v3604_v9, %v3603_v29  ;;  %v3668_v52 = vpop.f32.mrb[107].mxu1  ;;  %v2737_v56 = vmul.f32 0.2, %v2705_v58  ;;  %vm2721_vm2 = vcmp.gt.f32.partialorder %v2705_v58, 0.0 }
 0x1cb   :  { %v2706_v13 = vadd.f32 %v4759_v0, %v2683_v21  ;;  %v3669_v59 = vadd.f32 %v3668_v52, %v3667_v45 }
 0x1cc   :  { %v2576_v18 = vadd.f32 %v3666_v44, %v2479_v3  ;;  %v2482_v60 = vadd.f32 %v3605_v50, %v4717_v37  ;;  %v2753_v1 = vsel %vm2721_vm2, %v2705_v58, %v2737_v56 }
 0x1cd   :  { %vm2722_vm3 = vcmp.gt.f32.partialorder %v2706_v13, 0.0  ;;  %v2738_v61 = vmul.f32 0.2, %v2706_v13 }
 0x1ce   :  { %v2684_v53 = vmul.f32 %v4753_v23, %v2576_v18  ;;  %v2579_v63 = vadd.f32 %v3669_v59, %v2482_v60  ;;  %v3606_v24 = vpop.f32.mrb[108].mxu0 }
 0x1cf   :  { %v2754_v31 = vsel %vm2722_vm3, %v2706_v13, %v2738_v61  ;;  %v3670_v36 = vpop.f32.mrb[108].mxu1  ;;  %v3607_v14 = vpop.f32.mrb[109].mxu0 }
 0x1d0   :  { %v3149_v49 = vpack.c.bf16 %v2754_v31, %v2753_v1  ;;  %v2707_v6 = vadd.f32 %v4759_v0, %v2684_v53  ;;  %v2685_v10 = vmul.f32 %v4753_v23, %v2579_v63  ;;  %v3608_v12 = vadd.f32 %v3607_v14, %v3606_v24  ;;  %v3671_v30 = vpop.f32.mrb[109].mxu1  ;;  %v3609_v15 = vpop.f32.mrb[110].mxu0 }
 0x1d1   :  { %v3672_v16 = vadd.f32 %v3671_v30, %v3670_v36  ;;  %v3673_v37 = vpop.f32.mrb[110].mxu1  ;;  %v3610_v17 = vpop.f32.mrb[111].mxu0 }
 0x1d2   :  { %3181 = vst [vmem:[%s4835_s4 + $0x8] sm:$0xff] %v3149_v49   ;;  %v2739_v5 = vmul.f32 0.2, %v2707_v6  ;;  %v2708_v39 = vadd.f32 %v4759_v0, %v2685_v10  ;;  %v2487_v19 = vadd.f32 %v3608_v12, %v4720_v32  ;;  %v3674_v42 = vpop.f32.mrb[111].mxu1  ;;  %vm2723_vm4 = vcmp.gt.f32.partialorder %v2707_v6, 0.0 }
 0x1d3   :  { %v3611_v20 = vadd.f32 %v3610_v17, %v3609_v15  ;;  %v3675_v22 = vadd.f32 %v3674_v42, %v3673_v37 }
 0x1d4   :  { %vm2724_vm5 = vcmp.gt.f32.partialorder %v2708_v39, 0.0  ;;  %v2740_v55 = vmul.f32 0.2, %v2708_v39  ;;  %v2584_v7 = vadd.f32 %v3672_v16, %v2487_v19  ;;  %v2755_v27 = vsel %vm2723_vm4, %v2707_v6, %v2739_v5 }
 0x1d5   :  { %v2490_v26 = vadd.f32 %v3611_v20, %v4723_v54 }
 0x1d6   :  { %v2756_v51 = vsel %vm2724_vm5, %v2708_v39, %v2740_v55  ;;  %v2686_v47 = vmul.f32 %v4753_v23, %v2584_v7  ;;  %v3612_v33 = vpop.f32.mrb[112].mxu0 }
 0x1d7   :  { %v3154_v34 = vpack.c.bf16 %v2756_v51, %v2755_v27  ;;  %v2587_v35 = vadd.f32 %v3675_v22, %v2490_v26  ;;  %v3676_v57 = vpop.f32.mrb[112].mxu1  ;;  %v3613_v38 = vpop.f32.mrb[113].mxu0 }
 0x1d8   :  { %v2709_v32 = vadd.f32 %v4759_v0, %v2686_v47  ;;  %v3614_v62 = vadd.f32 %v3613_v38, %v3612_v33  ;;  %v3677_v40 = vpop.f32.mrb[113].mxu1  ;;  %v3615_v58 = vpop.f32.mrb[114].mxu0 }
 0x1d9   :  { %3182 = vst [vmem:[%s4835_s4 + $0x10] sm:$0xff] %v3154_v34   ;;  %v2687_v54 = vmul.f32 %v4753_v23, %v2587_v35  ;;  %v3678_v41 = vadd.f32 %v3677_v40, %v3676_v57  ;;  %v3679_v8 = vpop.f32.mrb[114].mxu1  ;;  %v3616_v29 = vpop.f32.mrb[115].mxu0 }
 0x1da   :  { %v2495_v21 = vadd.f32 %v3614_v62, %v4726_v48  ;;  %v3617_v44 = vadd.f32 %v3616_v29, %v3615_v58  ;;  %v3680_v45 = vpop.f32.mrb[115].mxu1  ;;  %v2741_v9 = vmul.f32 0.2, %v2709_v32  ;;  %vm2725_vm6 = vcmp.gt.f32.partialorder %v2709_v32, 0.0 }
 0x1db   :  { %v2710_v3 = vadd.f32 %v4759_v0, %v2687_v54  ;;  %v3681_v50 = vadd.f32 %v3680_v45, %v3679_v8 }
 0x1dc   :  { %v2592_v52 = vadd.f32 %v3678_v41, %v2495_v21  ;;  %v2498_v56 = vadd.f32 %v3617_v44, %v4729_v11  ;;  %v2757_v61 = vsel %vm2725_vm6, %v2709_v32, %v2741_v9 }
 0x1dd   :  { %vm2726_vm7 = vcmp.gt.f32.partialorder %v2710_v3, 0.0  ;;  %v2742_v13 = vmul.f32 0.2, %v2710_v3 }
 0x1de   :  { %v2688_v59 = vmul.f32 %v4753_v23, %v2592_v52  ;;  %v2595_v18 = vadd.f32 %v3681_v50, %v2498_v56  ;;  %v3618_v60 = vpop.f32.mrb[116].mxu0 }
 0x1df   :  { %v2758_v53 = vsel %vm2726_vm7, %v2710_v3, %v2742_v13  ;;  %v3682_v63 = vpop.f32.mrb[116].mxu1  ;;  %v3619_v48 = vpop.f32.mrb[117].mxu0 }
 0x1e0   :  { %v3159_v24 = vpack.c.bf16 %v2758_v53, %v2757_v61  ;;  %v2711_v1 = vadd.f32 %v4759_v0, %v2688_v59  ;;  %v2689_v31 = vmul.f32 %v4753_v23, %v2595_v18  ;;  %v3620_v36 = vadd.f32 %v3619_v48, %v3618_v60  ;;  %v3683_v14 = vpop.f32.mrb[117].mxu1  ;;  %v3621_v49 = vpop.f32.mrb[118].mxu0 }
 0x1e1   :  { %v3684_v6 = vadd.f32 %v3683_v14, %v3682_v63  ;;  %v3685_v11 = vpop.f32.mrb[118].mxu1  ;;  %v3622_v10 = vpop.f32.mrb[119].mxu0 }
 0x1e2   :  { %3183 = vst [vmem:[%s4835_s4 + $0x18] sm:$0xff] %v3159_v24   ;;  %v2743_v12 = vmul.f32 0.2, %v2711_v1  ;;  %v2712_v30 = vadd.f32 %v4759_v0, %v2689_v31  ;;  %v2503_v15 = vadd.f32 %v3620_v36, %v4732_v4  ;;  %v3686_v16 = vpop.f32.mrb[119].mxu1  ;;  %vm2727_vm8 = vcmp.gt.f32.partialorder %v2711_v1, 0.0 }
 0x1e3   :  { %v3623_v37 = vadd.f32 %v3622_v10, %v3621_v49  ;;  %v3687_v17 = vadd.f32 %v3686_v16, %v3685_v11 }
 0x1e4   :  { %vm2728_vm9 = vcmp.gt.f32.partialorder %v2712_v30, 0.0  ;;  %v2744_v5 = vmul.f32 0.2, %v2712_v30  ;;  %v2600_v39 = vadd.f32 %v3684_v6, %v2503_v15  ;;  %v2759_v42 = vsel %vm2727_vm8, %v2711_v1, %v2743_v12 }
 0x1e5   :  { %v2506_v19 = vadd.f32 %v3623_v37, %v4735_v28 }
 0x1e6   :  { %v2760_v20 = vsel %vm2728_vm9, %v2712_v30, %v2744_v5  ;;  %v2690_v22 = vmul.f32 %v4753_v23, %v2600_v39  ;;  %v3624_v55 = vpop.f32.mrb[120].mxu0 }
 0x1e7   :  { %v3164_v7 = vpack.c.bf16 %v2760_v20, %v2759_v42  ;;  %v2603_v26 = vadd.f32 %v3687_v17, %v2506_v19  ;;  %v3688_v27 = vpop.f32.mrb[120].mxu1  ;;  %v3625_v51 = vpop.f32.mrb[121].mxu0 }
 0x1e8   :  { %v2713_v4 = vadd.f32 %v4759_v0, %v2690_v22  ;;  %v3626_v47 = vadd.f32 %v3625_v51, %v3624_v55  ;;  %v3689_v33 = vpop.f32.mrb[121].mxu1  ;;  %v3627_v34 = vpop.f32.mrb[122].mxu0 }
 0x1e9   :  { %3184 = vst [vmem:[%s4835_s4 + $0x20] sm:$0xff] %v3164_v7   ;;  %v2691_v28 = vmul.f32 %v4753_v23, %v2603_v26  ;;  %v3690_v35 = vadd.f32 %v3689_v33, %v3688_v27  ;;  %v3691_v57 = vpop.f32.mrb[122].mxu1  ;;  %v3628_v38 = vpop.f32.mrb[123].mxu0 }
 0x1ea   :  { %v2511_v32 = vadd.f32 %v3626_v47, %v4738_v25  ;;  %v3629_v62 = vadd.f32 %v3628_v38, %v3627_v34  ;;  %v3692_v40 = vpop.f32.mrb[123].mxu1  ;;  %v2745_v58 = vmul.f32 0.2, %v2713_v4  ;;  %vm2729_vm10 = vcmp.gt.f32.partialorder %v2713_v4, 0.0 }
 0x1eb   :  { %v2714_v54 = vadd.f32 %v4759_v0, %v2691_v28  ;;  %v3693_v41 = vadd.f32 %v3692_v40, %v3691_v57 }
 0x1ec   :  { %v2608_v8 = vadd.f32 %v3690_v35, %v2511_v32  ;;  %v2514_v29 = vadd.f32 %v3629_v62, %v4741_v46  ;;  %v2761_v3 = vsel %vm2729_vm10, %v2713_v4, %v2745_v58 }
 0x1ed   :  { %vm2730_vm11 = vcmp.gt.f32.partialorder %v2714_v54, 0.0  ;;  %v2746_v21 = vmul.f32 0.2, %v2714_v54 }
 0x1ee   :  { %v2692_v44 = vmul.f32 %v4753_v23, %v2608_v8  ;;  %v2611_v45 = vadd.f32 %v3693_v41, %v2514_v29  ;;  %v3630_v9 = vpop.f32.mrb[124].mxu0 }
 0x1ef   :  { %v2762_v50 = vsel %vm2730_vm11, %v2714_v54, %v2746_v21  ;;  %v3694_v52 = vpop.f32.mrb[124].mxu1  ;;  %v3631_v25 = vpop.f32.mrb[125].mxu0 }
 0x1f0   :  { %v3169_v56 = vpack.c.bf16 %v2762_v50, %v2761_v3  ;;  %v2715_v13 = vadd.f32 %v4759_v0, %v2692_v44  ;;  %v2693_v59 = vmul.f32 %v4753_v23, %v2611_v45  ;;  %v3632_v18 = vadd.f32 %v3631_v25, %v3630_v9  ;;  %v3695_v60 = vpop.f32.mrb[125].mxu1  ;;  %v3633_v61 = vpop.f32.mrb[126].mxu0 }
 0x1f1   :  { %v3696_v53 = vadd.f32 %v3695_v60, %v3694_v52  ;;  %v3697_v46 = vpop.f32.mrb[126].mxu1  ;;  %v3634_v63 = vpop.f32.mrb[127].mxu0 }
 0x1f2   :  { %3185 = vst [vmem:[%s4835_s4 + $0x28] sm:$0xff] %v3169_v56   ;;  %v2747_v48 = vmul.f32 0.2, %v2715_v13  ;;  %v2716_v24 = vadd.f32 %v4759_v0, %v2693_v59  ;;  %v2519_v1 = vadd.f32 %v3632_v18, %v4744_v43  ;;  %v3698_v31 = vpop.f32.mrb[127].mxu1  ;;  %vm2731_vm12 = vcmp.gt.f32.partialorder %v2715_v13, 0.0 }
 0x1f3   :  { %v3635_v36 = vadd.f32 %v3634_v63, %v3633_v61  ;;  %v3699_v14 = vadd.f32 %v3698_v31, %v3697_v46 }
 0x1f4   :  { %vm2732_vm13 = vcmp.gt.f32.partialorder %v2716_v24, 0.0  ;;  %v2748_v49 = vmul.f32 0.2, %v2716_v24  ;;  %v2616_v6 = vadd.f32 %v3696_v53, %v2519_v1  ;;  %v2763_v10 = vsel %vm2731_vm12, %v2715_v13, %v2747_v48 }
 0x1f5   :  { %v2522_v11 = vadd.f32 %v3635_v36, %v4747_v2 }
 0x1f6   :  { %v2764_v12 = vsel %vm2732_vm13, %v2716_v24, %v2748_v49  ;;  %v2694_v30 = vmul.f32 %v4753_v23, %v2616_v6 }
 0x1f7   :  { %v3174_v15 = vpack.c.bf16 %v2764_v12, %v2763_v10  ;;  %v2619_v16 = vadd.f32 %v3699_v14, %v2522_v11 }
 0x1f8   :  { %v2717_v37 = vadd.f32 %v4759_v0, %v2694_v30 }
 0x1f9   :  { %3186 = vst [vmem:[%s4835_s4 + $0x30] sm:$0xff] %v3174_v15   ;;  %v2695_v43 = vmul.f32 %v4753_v23, %v2619_v16 }
 0x1fa   :  { %v2749_v17 = vmul.f32 0.2, %v2717_v37  ;;  %vm2733_vm14 = vcmp.gt.f32.partialorder %v2717_v37, 0.0 }
 0x1fb   :  { %v2718_v5 = vadd.f32 %v4759_v0, %v2695_v43 }
 0x1fc   :  { %v2765_v39 = vsel %vm2733_vm14, %v2717_v37, %v2749_v17 }
 0x1fd   :  { %vm2734_vm15 = vcmp.gt.f32.partialorder %v2718_v5, 0.0  ;;  %v2750_v2 = vmul.f32 0.2, %v2718_v5 }
 0x1ff   :  { %v2766_v19 = vsel %vm2734_vm15, %v2718_v5, %v2750_v2 }
 0x200   :  { %v3179_v42 = vpack.c.bf16 %v2766_v19, %v2765_v39 }
 0x202   :  { %3187 = vst [vmem:[%s4835_s4 + $0x38] sm:$0xff] %v3179_v42  }

// kernel: stage1_d_forward.6
= control target key start
LH: loop header
LB: loop body
LE: loop exit
PB: predicated region body
PF: predicated region fallthrough
CT: control target
= control target key end

     0   :  { %s2761_s1 = inlined_call_operand.vmem [shape: bf16[2048,128], index: 1, kind: input, shape index: {}]   ;;  %s2762_s0 = inlined_call_operand.vmem [shape: bf16[32,2048], index: 0, kind: input, shape index: {}]   ;;  %s2763_s2 = inlined_call_operand.vmem [shape: f32[1,128], index: 2, kind: input, shape index: {}]   ;;  %s2764_s3 = inlined_call_operand.vmem [shape: f32[1,128], index: 3, kind: input, shape index: {}]   ;;  %s2765_s4 = inlined_call_operand.vmem [shape: bf16[32,128], index: 4, kind: output, shape index: {}]  }
   0x1   :  { %v2116_v0 = vld [vmem:[%s2761_s1 + $0x40] sm:$0xff]   ;;  %v2120_v4 = vld [vmem:[%s2761_s1 + $0x48] sm:$0xff]   ;;  %v2124_v8 = vld [vmem:[%s2761_s1 + $0x50] sm:$0xff]  }
   0x2   :  { %v2117_v1 = vld [vmem:[%s2761_s1 + $0xc0] sm:$0xff]   ;;  %1892 = vmatprep.subr.bf16.mxu0 %v2116_v0  ;;  %v2121_v5 = vld [vmem:[%s2761_s1 + $0xc8] sm:$0xff]   ;;  %v2125_v9 = vld [vmem:[%s2761_s1 + $0xd0] sm:$0xff]  }
   0x3   :  { %v2118_v2 = vld [vmem:[%s2761_s1] sm:$0xff]   ;;  %1920 = vmatprep.subr.bf16.mxu1 %v2117_v1  ;;  %v2122_v6 = vld [vmem:[%s2761_s1 + $0x8] sm:$0xff]   ;;  %v2126_v10 = vld [vmem:[%s2761_s1 + $0x10] sm:$0xff]  }
   0x4   :  { %v2119_v3 = vld [vmem:[%s2761_s1 + $0x80] sm:$0xff]   ;;  %1893 = vmatpush3.bf16.msra.mxu0 %v2118_v2  ;;  %v2123_v7 = vld [vmem:[%s2761_s1 + $0x88] sm:$0xff]   ;;  %v2127_v11 = vld [vmem:[%s2761_s1 + $0x90] sm:$0xff]  }
   0x5   :  { %1921 = vmatpush3.bf16.msra.mxu1 %v2119_v3  ;;  %1894 = vmatprep.subr.bf16.mxu0 %v2120_v4  ;;  %v2128_v12 = vld [vmem:[%s2761_s1 + $0x58] sm:$0xff]   ;;  %v2132_v16 = vld [vmem:[%s2761_s1 + $0x60] sm:$0xff]   ;;  %v2136_v20 = vld [vmem:[%s2761_s1 + $0x68] sm:$0xff]  }
   0x6   :  { %1922 = vmatprep.subr.bf16.mxu1 %v2121_v5  ;;  %v2129_v13 = vld [vmem:[%s2761_s1 + $0xd8] sm:$0xff]   ;;  %v2133_v17 = vld [vmem:[%s2761_s1 + $0xe0] sm:$0xff]   ;;  %v2137_v21 = vld [vmem:[%s2761_s1 + $0xe8] sm:$0xff]  }
   0x7   :  { %v2130_v14 = vld [vmem:[%s2761_s1 + $0x18] sm:$0xff]   ;;  %v2134_v18 = vld [vmem:[%s2761_s1 + $0x20] sm:$0xff]   ;;  %v2138_v22 = vld [vmem:[%s2761_s1 + $0x28] sm:$0xff]  }
   0x8   :  { %1895 = vmatpush3.bf16.msra.mxu0 %v2122_v6  ;;  %v2131_v15 = vld [vmem:[%s2761_s1 + $0x98] sm:$0xff]   ;;  %v2135_v19 = vld [vmem:[%s2761_s1 + $0xa0] sm:$0xff]   ;;  %v2139_v23 = vld [vmem:[%s2761_s1 + $0xa8] sm:$0xff]  }
   0x9   :  { %1923 = vmatpush3.bf16.msra.mxu1 %v2123_v7  ;;  %1896 = vmatprep.subr.bf16.mxu0 %v2124_v8  ;;  %v2140_v24 = vld [vmem:[%s2761_s1 + $0x70] sm:$0xff]   ;;  %v2144_v28 = vld [vmem:[%s2761_s1 + $0x78] sm:$0xff]   ;;  %v30_v32 = vld [vmem:[%s2762_s0] sm:$0xff] }
   0xa   :  { %1924 = vmatprep.subr.bf16.mxu1 %v2125_v9  ;;  %v2141_v25 = vld [vmem:[%s2761_s1 + $0xf0] sm:$0xff]   ;;  %v2145_v29 = vld [vmem:[%s2761_s1 + $0xf8] sm:$0xff]   ;;  %v38_v33 = vld [vmem:[%s2762_s0 + $0x40] sm:$0xff] }
   0xb   :  { %v2142_v26 = vld [vmem:[%s2761_s1 + $0x30] sm:$0xff]   ;;  %v2146_v30 = vld [vmem:[%s2761_s1 + $0x38] sm:$0xff]   ;;  %v31_v34 = vld [vmem:[%s2762_s0 + $0x8] sm:$0xff]  ;;  %v1711_v35 = vcombine.low %v30_v32, %v38_v33  ;;  %v1712_v36 = vcombine.high %v30_v32, %v38_v33 }
   0xc   :  { %1897 = vmatpush3.bf16.msra.mxu0 %v2126_v10  ;;  %v2143_v27 = vld [vmem:[%s2761_s1 + $0xb0] sm:$0xff]   ;;  %v2147_v31 = vld [vmem:[%s2761_s1 + $0xb8] sm:$0xff]   ;;  %v39_v37 = vld [vmem:[%s2762_s0 + $0x48] sm:$0xff] }
   0xd   :  { %1925 = vmatpush3.bf16.msra.mxu1 %v2127_v11  ;;  %1898 = vmatprep.subr.bf16.mxu0 %v2128_v12  ;;  %v1713_v38 = vcombine.low %v31_v34, %v39_v37  ;;  %v1714_v39 = vcombine.high %v31_v34, %v39_v37  ;;  %v2148_v40 = vld [vmem:[%s2761_s1 + $0x140] sm:$0xff]   ;;  %v2152_v44 = vld [vmem:[%s2761_s1 + $0x148] sm:$0xff]   ;;  %v2156_v48 = vld [vmem:[%s2761_s1 + $0x150] sm:$0xff]  }
   0xe   :  { %1926 = vmatprep.subr.bf16.mxu1 %v2129_v13  ;;  %1278 = vmatprep.mubr.bf16.mxu0 %v1712_v36  ;;  %v2149_v41 = vld [vmem:[%s2761_s1 + $0x1c0] sm:$0xff]   ;;  %v2153_v45 = vld [vmem:[%s2761_s1 + $0x1c8] sm:$0xff]   ;;  %v2157_v49 = vld [vmem:[%s2761_s1 + $0x1d0] sm:$0xff]  }
   0xf   :  { %1327 = vmatprep.mubr.bf16.mxu1 %v1714_v39  ;;  %v2150_v42 = vld [vmem:[%s2761_s1 + $0x100] sm:$0xff]   ;;  %v2154_v46 = vld [vmem:[%s2761_s1 + $0x108] sm:$0xff]   ;;  %v2158_v50 = vld [vmem:[%s2761_s1 + $0x110] sm:$0xff]  }
  0x10   :  { %1899 = vmatpush3.bf16.msra.mxu0 %v2130_v14  ;;  %v2151_v43 = vld [vmem:[%s2761_s1 + $0x180] sm:$0xff]   ;;  %v2155_v47 = vld [vmem:[%s2761_s1 + $0x188] sm:$0xff]   ;;  %v2159_v51 = vld [vmem:[%s2761_s1 + $0x190] sm:$0xff]  }
  0x11   :  { %1927 = vmatpush3.bf16.msra.mxu1 %v2131_v15  ;;  %1900 = vmatprep.subr.bf16.mxu0 %v2132_v16  ;;  %v2160_v52 = vld [vmem:[%s2761_s1 + $0x158] sm:$0xff]   ;;  %v2164_v56 = vld [vmem:[%s2761_s1 + $0x160] sm:$0xff]   ;;  %v2168_v60 = vld [vmem:[%s2761_s1 + $0x168] sm:$0xff]  }
  0x12   :  { %1928 = vmatprep.subr.bf16.mxu1 %v2133_v17  ;;  %v2161_v53 = vld [vmem:[%s2761_s1 + $0x1d8] sm:$0xff]   ;;  %v2165_v57 = vld [vmem:[%s2761_s1 + $0x1e0] sm:$0xff]   ;;  %v2169_v61 = vld [vmem:[%s2761_s1 + $0x1e8] sm:$0xff]  }
  0x13   :  { %v2162_v54 = vld [vmem:[%s2761_s1 + $0x118] sm:$0xff]   ;;  %v2166_v58 = vld [vmem:[%s2761_s1 + $0x120] sm:$0xff]   ;;  %v47_v1 = vld [vmem:[%s2762_s0 + $0x88] sm:$0xff] }
  0x14   :  { %1901 = vmatpush3.bf16.msra.mxu0 %v2134_v18  ;;  %v2163_v55 = vld [vmem:[%s2761_s1 + $0x198] sm:$0xff]   ;;  %v2167_v59 = vld [vmem:[%s2761_s1 + $0x1a0] sm:$0xff]   ;;  %v55_v2 = vld [vmem:[%s2762_s0 + $0xc8] sm:$0xff] }
  0x15   :  { %1929 = vmatpush3.bf16.msra.mxu1 %v2135_v19  ;;  %1902 = vmatprep.subr.bf16.mxu0 %v2136_v20  ;;  %v46_v62 = vld [vmem:[%s2762_s0 + $0x80] sm:$0xff]  ;;  %v1730_v4 = vcombine.high %v47_v1, %v55_v2  ;;  %v2170_v5 = vld [vmem:[%s2761_s1 + $0x128] sm:$0xff]   ;;  %v1729_v6 = vcombine.low %v47_v1, %v55_v2  ;;  %v2172_v8 = vld [vmem:[%s2761_s1 + $0x170] sm:$0xff]  }
  0x16   :  { %1930 = vmatprep.subr.bf16.mxu1 %v2137_v21  ;;  %v54_v63 = vld [vmem:[%s2762_s0 + $0xc0] sm:$0xff]  ;;  %v2171_v7 = vld [vmem:[%s2761_s1 + $0x1a8] sm:$0xff]   ;;  %v2173_v9 = vld [vmem:[%s2761_s1 + $0x1f0] sm:$0xff]  }
  0x17   :  { %v1728_v0 = vcombine.high %v46_v62, %v54_v63  ;;  %v1727_v3 = vcombine.low %v46_v62, %v54_v63  ;;  %v2174_v10 = vld [vmem:[%s2761_s1 + $0x130] sm:$0xff]   ;;  %v2176_v12 = vld [vmem:[%s2761_s1 + $0x178] sm:$0xff]   ;;  %v42_v1 = vld [vmem:[%s2762_s0 + $0x60] sm:$0xff] }
  0x18   :  { %1903 = vmatpush3.bf16.msra.mxu0 %v2138_v22  ;;  %v2175_v11 = vld [vmem:[%s2761_s1 + $0x1b0] sm:$0xff]   ;;  %v2177_v13 = vld [vmem:[%s2761_s1 + $0x1f8] sm:$0xff]  }
  0x19   :  { %1931 = vmatpush3.bf16.msra.mxu1 %v2139_v23  ;;  %1904 = vmatprep.subr.bf16.mxu0 %v2140_v24  ;;  %v2178_v14 = vld [vmem:[%s2761_s1 + $0x138] sm:$0xff]   ;;  %v32_v16 = vld [vmem:[%s2762_s0 + $0x10] sm:$0xff]  ;;  %v2180_v24 = vld [vmem:[%s2761_s1 + $0x240] sm:$0xff]  }
  0x1a   :  { %1932 = vmatprep.subr.bf16.mxu1 %v2141_v25  ;;  %v2179_v15 = vld [vmem:[%s2761_s1 + $0x1b8] sm:$0xff]   ;;  %v40_v17 = vld [vmem:[%s2762_s0 + $0x50] sm:$0xff]  ;;  %v2181_v25 = vld [vmem:[%s2761_s1 + $0x2c0] sm:$0xff]  }
  0x1b   :  { %v33_v18 = vld [vmem:[%s2762_s0 + $0x18] sm:$0xff]  ;;  %v1715_v20 = vcombine.low %v32_v16, %v40_v17  ;;  %v1716_v21 = vcombine.high %v32_v16, %v40_v17  ;;  %v48_v32 = vld [vmem:[%s2762_s0 + $0x90] sm:$0xff]  ;;  %v50_v16 = vld [vmem:[%s2762_s0 + $0xa0] sm:$0xff] }
  0x1c   :  { %1905 = vmatpush3.bf16.msra.mxu0 %v2142_v26  ;;  %v41_v19 = vld [vmem:[%s2762_s0 + $0x58] sm:$0xff]  ;;  %v2182_v26 = vld [vmem:[%s2761_s1 + $0x200] sm:$0xff]   ;;  %v56_v33 = vld [vmem:[%s2762_s0 + $0xd0] sm:$0xff] }
  0x1d   :  { %1933 = vmatpush3.bf16.msra.mxu1 %v2143_v27  ;;  %1906 = vmatprep.subr.bf16.mxu0 %v2144_v28  ;;  %v1717_v22 = vcombine.low %v33_v18, %v41_v19  ;;  %v1718_v23 = vcombine.high %v33_v18, %v41_v19  ;;  %v2183_v27 = vld [vmem:[%s2761_s1 + $0x280] sm:$0xff]   ;;  %v2184_v28 = vld [vmem:[%s2761_s1 + $0x248] sm:$0xff]   ;;  %v1732_v34 = vcombine.high %v48_v32, %v56_v33  ;;  %v2188_v36 = vld [vmem:[%s2761_s1 + $0x250] sm:$0xff]  }
  0x1e   :  { %1934 = vmatprep.subr.bf16.mxu1 %v2145_v29  ;;  %v2185_v29 = vld [vmem:[%s2761_s1 + $0x2c8] sm:$0xff]   ;;  %v2189_v37 = vld [vmem:[%s2761_s1 + $0x2d0] sm:$0xff]   ;;  %v57_v39 = vld [vmem:[%s2762_s0 + $0xd8] sm:$0xff] }
  0x1f   :  { %v2210_v62 = vld [vmem:[%s2761_s1 + $0x238] sm:$0xff]   ;;  %v58_v17 = vld [vmem:[%s2762_s0 + $0xe0] sm:$0xff] }
  0x20   :  { %1907 = vmatpush3.bf16.msra.mxu0 %v2146_v30  ;;  %v2186_v30 = vld [vmem:[%s2761_s1 + $0x208] sm:$0xff]   ;;  %v2211_v63 = vld [vmem:[%s2761_s1 + $0x2b8] sm:$0xff]   ;;  %v1736_v18 = vcombine.high %v50_v16, %v58_v17  ;;  %v1735_v19 = vcombine.low %v50_v16, %v58_v17 }
  0x21   :  { %1935 = vmatpush3.bf16.msra.mxu1 %v2147_v31  ;;  %1948 = vmatprep.subr.bf16.mxu0 %v2148_v40  ;;  %v2187_v31 = vld [vmem:[%s2761_s1 + $0x288] sm:$0xff]  }
  0x22   :  { %1976 = vmatprep.subr.bf16.mxu1 %v2149_v41  ;;  %v2190_v41 = vld [vmem:[%s2761_s1 + $0x210] sm:$0xff]  }
  0x23   :  { %1279 = vmatmul.mubr.bf16.vlgmr.msra.gmra.mrb[0].mxu0 %v1711_v35  ;;  %v1731_v35 = vcombine.low %v48_v32, %v56_v33  ;;  %v2228_v32 = vld [vmem:[%s2761_s1 + $0x360] sm:$0xff]  }
  0x24   :  { %1328 = vmatmul.mubr.bf16.vlgmr.msra.gmra.mrb[0].mxu1 %v1713_v38  ;;  %1949 = vmatpush3.bf16.msra.mxu0 %v2150_v42  ;;  %v49_v38 = vld [vmem:[%s2762_s0 + $0x98] sm:$0xff]  ;;  %v2229_v33 = vld [vmem:[%s2761_s1 + $0x3e0] sm:$0xff]  }
  0x25   :  { %1977 = vmatpush3.bf16.msra.mxu1 %v2151_v43  ;;  %1950 = vmatprep.subr.bf16.mxu0 %v2152_v44  ;;  %v1734_v40 = vcombine.high %v49_v38, %v57_v39  ;;  %v1733_v42 = vcombine.low %v49_v38, %v57_v39  ;;  %v2191_v43 = vld [vmem:[%s2761_s1 + $0x290] sm:$0xff]   ;;  %v2192_v44 = vld [vmem:[%s2761_s1 + $0x258] sm:$0xff]   ;;  %v2234_v38 = vld [vmem:[%s2761_s1 + $0x328] sm:$0xff]  }
  0x26   :  { %1978 = vmatprep.subr.bf16.mxu1 %v2153_v45  ;;  %1286 = vmatprep.mubr.bf16.mxu0 %v1728_v0  ;;  %v2193_v45 = vld [vmem:[%s2761_s1 + $0x2d8] sm:$0xff]   ;;  %v34_v0 = vld [vmem:[%s2762_s0 + $0x20] sm:$0xff]  ;;  %v2235_v39 = vld [vmem:[%s2761_s1 + $0x3a8] sm:$0xff]  }
  0x27   :  { %1335 = vmatprep.mubr.bf16.mxu1 %v1730_v4  ;;  %v1719_v2 = vcombine.low %v34_v0, %v42_v1  ;;  %v35_v4 = vld [vmem:[%s2762_s0 + $0x28] sm:$0xff] }
  0x28   :  { %1951 = vmatpush3.bf16.msra.mxu0 %v2154_v46  ;;  %v2194_v46 = vld [vmem:[%s2761_s1 + $0x218] sm:$0xff]  }
  0x29   :  { %1979 = vmatpush3.bf16.msra.mxu1 %v2155_v47  ;;  %1952 = vmatprep.subr.bf16.mxu0 %v2156_v48  ;;  %v2195_v47 = vld [vmem:[%s2761_s1 + $0x298] sm:$0xff]   ;;  %v2196_v48 = vld [vmem:[%s2761_s1 + $0x260] sm:$0xff]  }
  0x2a   :  { %1980 = vmatprep.subr.bf16.mxu1 %v2157_v49  ;;  %v2197_v49 = vld [vmem:[%s2761_s1 + $0x2e0] sm:$0xff]  }
  0x2b   :  { %1287 = vmatmul.mubr.bf16.gmra.mrb[4].mxu0 %v1727_v3  ;;  %v1720_v3 = vcombine.high %v34_v0, %v42_v1 }
  0x2c   :  { %1953 = vmatpush3.bf16.msra.mxu0 %v2158_v50  ;;  %1336 = vmatmul.mubr.bf16.gmra.mrb[4].mxu1 %v1729_v6  ;;  %v2198_v50 = vld [vmem:[%s2761_s1 + $0x220] sm:$0xff]  }
  0x2d   :  { %1981 = vmatpush3.bf16.msra.mxu1 %v2159_v51  ;;  %1954 = vmatprep.subr.bf16.mxu0 %v2160_v52  ;;  %v2199_v51 = vld [vmem:[%s2761_s1 + $0x2a0] sm:$0xff]   ;;  %v2200_v52 = vld [vmem:[%s2761_s1 + $0x268] sm:$0xff]  }
  0x2e   :  { %1982 = vmatprep.subr.bf16.mxu1 %v2161_v53  ;;  %1376 = vmatprep.mubr.bf16.mxu0 %v1716_v21  ;;  %v2201_v53 = vld [vmem:[%s2761_s1 + $0x2e8] sm:$0xff]   ;;  %v2221_v21 = vld [vmem:[%s2761_s1 + $0x3d0] sm:$0xff]  }
  0x2f   :  { %1425 = vmatprep.mubr.bf16.mxu1 %v1718_v23  ;;  %v59_v23 = vld [vmem:[%s2762_s0 + $0xe8] sm:$0xff] }
  0x30   :  { %1955 = vmatpush3.bf16.msra.mxu0 %v2162_v54  ;;  %v2202_v54 = vld [vmem:[%s2761_s1 + $0x228] sm:$0xff]  }
  0x31   :  { %1983 = vmatpush3.bf16.msra.mxu1 %v2163_v55  ;;  %1956 = vmatprep.subr.bf16.mxu0 %v2164_v56  ;;  %v2203_v55 = vld [vmem:[%s2761_s1 + $0x2a8] sm:$0xff]   ;;  %v2204_v56 = vld [vmem:[%s2761_s1 + $0x270] sm:$0xff]  }
  0x32   :  { %1984 = vmatprep.subr.bf16.mxu1 %v2165_v57  ;;  %v2205_v57 = vld [vmem:[%s2761_s1 + $0x2f0] sm:$0xff]  }
  0x34   :  { %1957 = vmatpush3.bf16.msra.mxu0 %v2166_v58  ;;  %v2206_v58 = vld [vmem:[%s2761_s1 + $0x230] sm:$0xff]  }
  0x35   :  { %1985 = vmatpush3.bf16.msra.mxu1 %v2167_v59  ;;  %1958 = vmatprep.subr.bf16.mxu0 %v2168_v60  ;;  %v2207_v59 = vld [vmem:[%s2761_s1 + $0x2b0] sm:$0xff]   ;;  %v2208_v60 = vld [vmem:[%s2761_s1 + $0x278] sm:$0xff]  }
  0x36   :  { %1986 = vmatprep.subr.bf16.mxu1 %v2169_v61  ;;  %v2209_v61 = vld [vmem:[%s2761_s1 + $0x2f8] sm:$0xff]  }
  0x38   :  { %1959 = vmatpush3.bf16.msra.mxu0 %v2170_v5  ;;  %v43_v5 = vld [vmem:[%s2762_s0 + $0x68] sm:$0xff] }
  0x39   :  { %1987 = vmatpush3.bf16.msra.mxu1 %v2171_v7  ;;  %1960 = vmatprep.subr.bf16.mxu0 %v2172_v8  ;;  %v1721_v6 = vcombine.low %v35_v4, %v43_v5  ;;  %v1722_v7 = vcombine.high %v35_v4, %v43_v5  ;;  %v2212_v8 = vld [vmem:[%s2761_s1 + $0x340] sm:$0xff]  }
  0x3a   :  { %1988 = vmatprep.subr.bf16.mxu1 %v2173_v9  ;;  %v2213_v9 = vld [vmem:[%s2761_s1 + $0x3c0] sm:$0xff]  }
  0x3c   :  { %1961 = vmatpush3.bf16.msra.mxu0 %v2174_v10  ;;  %v2214_v10 = vld [vmem:[%s2761_s1 + $0x300] sm:$0xff]  }
  0x3d   :  { %1989 = vmatpush3.bf16.msra.mxu1 %v2175_v11  ;;  %1962 = vmatprep.subr.bf16.mxu0 %v2176_v12  ;;  %v2215_v11 = vld [vmem:[%s2761_s1 + $0x380] sm:$0xff]   ;;  %v2216_v12 = vld [vmem:[%s2761_s1 + $0x348] sm:$0xff]  }
  0x3e   :  { %1990 = vmatprep.subr.bf16.mxu1 %v2177_v13  ;;  %v2217_v13 = vld [vmem:[%s2761_s1 + $0x3c8] sm:$0xff]  }
  0x40   :  { %1963 = vmatpush3.bf16.msra.mxu0 %v2178_v14  ;;  %v2218_v14 = vld [vmem:[%s2761_s1 + $0x308] sm:$0xff]  }
  0x41   :  { %1991 = vmatpush3.bf16.msra.mxu1 %v2179_v15  ;;  %2004 = vmatprep.subr.bf16.mxu0 %v2180_v24  ;;  %v2219_v15 = vld [vmem:[%s2761_s1 + $0x388] sm:$0xff]  }
  0x42   :  { %2032 = vmatprep.subr.bf16.mxu1 %v2181_v25  ;;  %v2222_v25 = vld [vmem:[%s2761_s1 + $0x310] sm:$0xff]  }
  0x43   :  { %1377 = vmatmul.mubr.bf16.vlgmr.msra.gmra.mrb[8].mxu0 %v1715_v20  ;;  %v2220_v20 = vld [vmem:[%s2761_s1 + $0x350] sm:$0xff]  }
  0x44   :  { %1426 = vmatmul.mubr.bf16.vlgmr.msra.gmra.mrb[8].mxu1 %v1717_v22  ;;  %2005 = vmatpush3.bf16.msra.mxu0 %v2182_v26  ;;  %v51_v22 = vld [vmem:[%s2762_s0 + $0xa8] sm:$0xff] }
  0x45   :  { %2033 = vmatpush3.bf16.msra.mxu1 %v2183_v27  ;;  %2006 = vmatprep.subr.bf16.mxu0 %v2184_v28  ;;  %v1738_v24 = vcombine.high %v51_v22, %v59_v23  ;;  %v1737_v26 = vcombine.low %v51_v22, %v59_v23  ;;  %v2223_v27 = vld [vmem:[%s2761_s1 + $0x390] sm:$0xff]   ;;  %v2224_v28 = vld [vmem:[%s2761_s1 + $0x358] sm:$0xff]  }
  0x46   :  { %2034 = vmatprep.subr.bf16.mxu1 %v2185_v29  ;;  %1384 = vmatprep.mubr.bf16.mxu0 %v1732_v34  ;;  %v2225_v29 = vld [vmem:[%s2761_s1 + $0x3d8] sm:$0xff]   ;;  %v2230_v34 = vld [vmem:[%s2761_s1 + $0x320] sm:$0xff]  }
  0x47   :  { %1433 = vmatprep.mubr.bf16.mxu1 %v1734_v40  ;;  %v2236_v40 = vld [vmem:[%s2761_s1 + $0x370] sm:$0xff]  }
  0x48   :  { %2007 = vmatpush3.bf16.msra.mxu0 %v2186_v30  ;;  %v2226_v30 = vld [vmem:[%s2761_s1 + $0x318] sm:$0xff]  }
  0x49   :  { %2035 = vmatpush3.bf16.msra.mxu1 %v2187_v31  ;;  %2008 = vmatprep.subr.bf16.mxu0 %v2188_v36  ;;  %v2227_v31 = vld [vmem:[%s2761_s1 + $0x398] sm:$0xff]   ;;  %v2232_v36 = vld [vmem:[%s2761_s1 + $0x368] sm:$0xff]  }
  0x4a   :  { %2036 = vmatprep.subr.bf16.mxu1 %v2189_v37  ;;  %v2233_v37 = vld [vmem:[%s2761_s1 + $0x3e8] sm:$0xff]  }
  0x4b   :  { %1385 = vmatmul.mubr.bf16.gmra.mrb[12].mxu0 %v1731_v35  ;;  %v2231_v35 = vld [vmem:[%s2761_s1 + $0x3a0] sm:$0xff]  }
  0x4c   :  { %2009 = vmatpush3.bf16.msra.mxu0 %v2190_v41  ;;  %1434 = vmatmul.mubr.bf16.gmra.mrb[12].mxu1 %v1733_v42  ;;  %v2237_v41 = vld [vmem:[%s2761_s1 + $0x3f0] sm:$0xff]  }
  0x4d   :  { %2037 = vmatpush3.bf16.msra.mxu1 %v2191_v43  ;;  %2010 = vmatprep.subr.bf16.mxu0 %v2192_v44  ;;  %v2238_v42 = vld [vmem:[%s2761_s1 + $0x330] sm:$0xff]   ;;  %v2240_v44 = vld [vmem:[%s2761_s1 + $0x378] sm:$0xff]  }
  0x4e   :  { %2038 = vmatprep.subr.bf16.mxu1 %v2193_v45  ;;  %1474 = vmatprep.mubr.bf16.mxu0 %v1720_v3  ;;  %v2239_v43 = vld [vmem:[%s2761_s1 + $0x3b0] sm:$0xff]   ;;  %v2241_v45 = vld [vmem:[%s2761_s1 + $0x3f8] sm:$0xff]  }
  0x4f   :  { %1523 = vmatprep.mubr.bf16.mxu1 %v1722_v7 }
  0x50   :  { %2011 = vmatpush3.bf16.msra.mxu0 %v2194_v46  ;;  %v2242_v46 = vld [vmem:[%s2761_s1 + $0x338] sm:$0xff]  }
  0x51   :  { %2039 = vmatpush3.bf16.msra.mxu1 %v2195_v47  ;;  %2012 = vmatprep.subr.bf16.mxu0 %v2196_v48  ;;  %v2243_v47 = vld [vmem:[%s2761_s1 + $0x3b8] sm:$0xff]   ;;  %v36_v48 = vld [vmem:[%s2762_s0 + $0x30] sm:$0xff] }
  0x52   :  { %2040 = vmatprep.subr.bf16.mxu1 %v2197_v49  ;;  %v44_v49 = vld [vmem:[%s2762_s0 + $0x70] sm:$0xff] }
  0x54   :  { %2013 = vmatpush3.bf16.msra.mxu0 %v2198_v50  ;;  %v37_v50 = vld [vmem:[%s2762_s0 + $0x38] sm:$0xff] }
  0x55   :  { %2041 = vmatpush3.bf16.msra.mxu1 %v2199_v51  ;;  %2014 = vmatprep.subr.bf16.mxu0 %v2200_v52  ;;  %v1723_v51 = vcombine.low %v36_v48, %v44_v49  ;;  %v1724_v52 = vcombine.high %v36_v48, %v44_v49 }
  0x56   :  { %2042 = vmatprep.subr.bf16.mxu1 %v2201_v53  ;;  %v45_v53 = vld [vmem:[%s2762_s0 + $0x78] sm:$0xff] }
  0x58   :  { %2015 = vmatpush3.bf16.msra.mxu0 %v2202_v54  ;;  %v52_v54 = vld [vmem:[%s2762_s0 + $0xb0] sm:$0xff] }
  0x59   :  { %2043 = vmatpush3.bf16.msra.mxu1 %v2203_v55  ;;  %2016 = vmatprep.subr.bf16.mxu0 %v2204_v56  ;;  %v60_v55 = vld [vmem:[%s2762_s0 + $0xf0] sm:$0xff]  ;;  %v1725_v56 = vcombine.low %v37_v50, %v45_v53 }
  0x5a   :  { %2044 = vmatprep.subr.bf16.mxu1 %v2205_v57  ;;  %v1726_v57 = vcombine.high %v37_v50, %v45_v53 }
  0x5c   :  { %2017 = vmatpush3.bf16.msra.mxu0 %v2206_v58  ;;  %v1740_v58 = vcombine.high %v52_v54, %v60_v55 }
  0x5d   :  { %2045 = vmatpush3.bf16.msra.mxu1 %v2207_v59  ;;  %2018 = vmatprep.subr.bf16.mxu0 %v2208_v60  ;;  %v53_v59 = vld [vmem:[%s2762_s0 + $0xb8] sm:$0xff] }
  0x5e   :  { %2046 = vmatprep.subr.bf16.mxu1 %v2209_v61  ;;  %v61_v60 = vld [vmem:[%s2762_s0 + $0xf8] sm:$0xff] }
  0x5f   :  { %v1742_v61 = vcombine.high %v53_v59, %v61_v60 }
  0x60   :  { %2019 = vmatpush3.bf16.msra.mxu0 %v2210_v62  ;;  %v1739_v62 = vcombine.low %v52_v54, %v60_v55 }
  0x61   :  { %2047 = vmatpush3.bf16.msra.mxu1 %v2211_v63  ;;  %2060 = vmatprep.subr.bf16.mxu0 %v2212_v8  ;;  %v1741_v63 = vcombine.low %v53_v59, %v61_v60 }
  0x62   :  { %2088 = vmatprep.subr.bf16.mxu1 %v2213_v9 }
  0x63   :  { %1475 = vmatmul.mubr.bf16.vlgmr.msra.gmra.mrb[16].mxu0 %v1719_v2 }
  0x64   :  { %1524 = vmatmul.mubr.bf16.vlgmr.msra.gmra.mrb[16].mxu1 %v1721_v6  ;;  %2061 = vmatpush3.bf16.msra.mxu0 %v2214_v10 }
  0x65   :  { %2089 = vmatpush3.bf16.msra.mxu1 %v2215_v11  ;;  %2062 = vmatprep.subr.bf16.mxu0 %v2216_v12 }
  0x66   :  { %2090 = vmatprep.subr.bf16.mxu1 %v2217_v13  ;;  %1482 = vmatprep.mubr.bf16.mxu0 %v1736_v18 }
  0x67   :  { %1531 = vmatprep.mubr.bf16.mxu1 %v1738_v24 }
  0x68   :  { %2063 = vmatpush3.bf16.msra.mxu0 %v2218_v14 }
  0x69   :  { %2091 = vmatpush3.bf16.msra.mxu1 %v2219_v15  ;;  %2064 = vmatprep.subr.bf16.mxu0 %v2220_v20 }
  0x6a   :  { %2092 = vmatprep.subr.bf16.mxu1 %v2221_v21 }
  0x6b   :  { %1483 = vmatmul.mubr.bf16.gmra.mrb[20].mxu0 %v1735_v19 }
  0x6c   :  { %2065 = vmatpush3.bf16.msra.mxu0 %v2222_v25  ;;  %1532 = vmatmul.mubr.bf16.gmra.mrb[20].mxu1 %v1737_v26 }
  0x6d   :  { %2093 = vmatpush3.bf16.msra.mxu1 %v2223_v27  ;;  %2066 = vmatprep.subr.bf16.mxu0 %v2224_v28 }
  0x6e   :  { %2094 = vmatprep.subr.bf16.mxu1 %v2225_v29  ;;  %1572 = vmatprep.mubr.bf16.mxu0 %v1724_v52 }
  0x6f   :  { %1621 = vmatprep.mubr.bf16.mxu1 %v1726_v57 }
  0x70   :  { %2067 = vmatpush3.bf16.msra.mxu0 %v2226_v30 }
  0x71   :  { %2095 = vmatpush3.bf16.msra.mxu1 %v2227_v31  ;;  %2068 = vmatprep.subr.bf16.mxu0 %v2228_v32 }
  0x72   :  { %2096 = vmatprep.subr.bf16.mxu1 %v2229_v33 }
  0x74   :  { %2069 = vmatpush3.bf16.msra.mxu0 %v2230_v34 }
  0x75   :  { %2097 = vmatpush3.bf16.msra.mxu1 %v2231_v35  ;;  %2070 = vmatprep.subr.bf16.mxu0 %v2232_v36 }
  0x76   :  { %2098 = vmatprep.subr.bf16.mxu1 %v2233_v37 }
  0x78   :  { %2071 = vmatpush3.bf16.msra.mxu0 %v2234_v38 }
  0x79   :  { %2099 = vmatpush3.bf16.msra.mxu1 %v2235_v39  ;;  %2072 = vmatprep.subr.bf16.mxu0 %v2236_v40 }
  0x7a   :  { %2100 = vmatprep.subr.bf16.mxu1 %v2237_v41 }
  0x7c   :  { %2073 = vmatpush3.bf16.msra.mxu0 %v2238_v42 }
  0x7d   :  { %2101 = vmatpush3.bf16.msra.mxu1 %v2239_v43  ;;  %2074 = vmatprep.subr.bf16.mxu0 %v2240_v44 }
  0x7e   :  { %2102 = vmatprep.subr.bf16.mxu1 %v2241_v45 }
  0x80   :  { %2075 = vmatpush3.bf16.msra.mxu0 %v2242_v46 }
  0x81   :  { %2103 = vmatpush3.bf16.msra.mxu1 %v2243_v47 }
  0x83   :  { %1573 = vmatmul.mubr.bf16.vlgmr.msra.gmra.mrb[24].mxu0 %v1723_v51 }
  0x84   :  { %1622 = vmatmul.mubr.bf16.vlgmr.msra.gmra.mrb[24].mxu1 %v1725_v56  ;;  %1580 = vmatprep.mubr.bf16.mxu0 %v1740_v58 }
  0x85   :  { %1629 = vmatprep.mubr.bf16.mxu1 %v1742_v61 }
  0x8b   :  { %1581 = vmatmul.mubr.bf16.gmra.mrb[28].mxu0 %v1739_v62 }
  0x8c   :  { %1630 = vmatmul.mubr.bf16.gmra.mrb[28].mxu1 %v1741_v63 }
  0xf6   :  { %v1908_v0 = vpop.f32.mrb[0].mxu0 }
  0xf7   :  { %v1936_v1 = vpop.f32.mrb[0].mxu1  ;;  %v1909_v2 = vpop.f32.mrb[1].mxu0 }
  0xf8   :  { %v1910_v3 = vadd.f32 %v1909_v2, %v1908_v0  ;;  %v1937_v4 = vpop.f32.mrb[1].mxu1  ;;  %v1911_v5 = vpop.f32.mrb[2].mxu0 }
  0xf9   :  { %v1938_v6 = vadd.f32 %v1937_v4, %v1936_v1  ;;  %v1939_v7 = vpop.f32.mrb[2].mxu1  ;;  %v1912_v8 = vpop.f32.mrb[3].mxu0 }
  0xfa   :  { %v1913_v9 = vadd.f32 %v1912_v8, %v1911_v5  ;;  %v1940_v10 = vpop.f32.mrb[3].mxu1 }
  0xfb   :  { %v1330_v11 = vadd.f32 %v1938_v6, %v1910_v3  ;;  %v1941_v12 = vadd.f32 %v1940_v10, %v1939_v7 }
  0xfd   :  { %v1333_v13 = vadd.f32 %v1941_v12, %v1913_v9 }
  0xfe   :  { %v1914_v14 = vpop.f32.mrb[4].mxu0 }
  0xff   :  { %v1942_v15 = vpop.f32.mrb[4].mxu1  ;;  %v1915_v16 = vpop.f32.mrb[5].mxu0 }
 0x100   :  { %v1916_v17 = vadd.f32 %v1915_v16, %v1914_v14  ;;  %v1943_v18 = vpop.f32.mrb[5].mxu1  ;;  %v1917_v19 = vpop.f32.mrb[6].mxu0 }
 0x101   :  { %v1944_v20 = vadd.f32 %v1943_v18, %v1942_v15  ;;  %v1945_v21 = vpop.f32.mrb[6].mxu1  ;;  %v1918_v22 = vpop.f32.mrb[7].mxu0 }
 0x102   :  { %v1919_v23 = vadd.f32 %v1918_v22, %v1917_v19  ;;  %v1946_v24 = vpop.f32.mrb[7].mxu1 }
 0x103   :  { %v1338_v25 = vadd.f32 %v1944_v20, %v1916_v17  ;;  %v1947_v26 = vadd.f32 %v1946_v24, %v1945_v21 }
 0x105   :  { %v1341_v27 = vadd.f32 %v1947_v26, %v1919_v23 }
 0x116   :  { %v1964_v28 = vpop.f32.mrb[8].mxu0 }
 0x117   :  { %v1992_v29 = vpop.f32.mrb[8].mxu1  ;;  %v1965_v30 = vpop.f32.mrb[9].mxu0 }
 0x118   :  { %v1993_v31 = vpop.f32.mrb[9].mxu1  ;;  %v1966_v32 = vadd.f32 %v1965_v30, %v1964_v28  ;;  %v1967_v34 = vpop.f32.mrb[10].mxu0 }
 0x119   :  { %v1994_v33 = vadd.f32 %v1993_v31, %v1992_v29  ;;  %v1995_v35 = vpop.f32.mrb[10].mxu1  ;;  %v1968_v36 = vpop.f32.mrb[11].mxu0 }
 0x11a   :  { %v1996_v37 = vpop.f32.mrb[11].mxu1  ;;  %v1379_v38 = vadd.f32 %v1966_v32, %v1330_v11  ;;  %v1969_v39 = vadd.f32 %v1968_v36, %v1967_v34 }
 0x11b   :  { %v1997_v40 = vadd.f32 %v1996_v37, %v1995_v35 }
 0x11c   :  { %v1428_v41 = vadd.f32 %v1994_v33, %v1379_v38  ;;  %v1382_v42 = vadd.f32 %v1969_v39, %v1333_v13 }
 0x11e   :  { %v1431_v43 = vadd.f32 %v1997_v40, %v1382_v42  ;;  %v1970_v44 = vpop.f32.mrb[12].mxu0  ;;  %v1871_v40 = vld [vmem:[%s2763_s2] ss:$0 sm:$0xff] }
 0x11f   :  { %v1971_v45 = vpop.f32.mrb[13].mxu0  ;;  %v1998_v50 = vpop.f32.mrb[12].mxu1 }
 0x120   :  { %v1972_v46 = vadd.f32 %v1971_v45, %v1970_v44  ;;  %v1973_v47 = vpop.f32.mrb[14].mxu0  ;;  %v1999_v52 = vpop.f32.mrb[13].mxu1  ;;  %v1872_v44 = vld [vmem:[%s2764_s3] ss:$0 sm:$0xff] }
 0x121   :  { %v1974_v48 = vpop.f32.mrb[15].mxu0  ;;  %v2000_v54 = vadd.f32 %v1999_v52, %v1998_v50  ;;  %v2001_v55 = vpop.f32.mrb[14].mxu1 }
 0x122   :  { %v1387_v49 = vadd.f32 %v1972_v46, %v1338_v25  ;;  %v1975_v51 = vadd.f32 %v1974_v48, %v1973_v47  ;;  %v2002_v56 = vpop.f32.mrb[15].mxu1 }
 0x123   :  { %v2003_v58 = vadd.f32 %v2002_v56, %v2001_v55 }
 0x124   :  { %v1390_v53 = vadd.f32 %v1975_v51, %v1341_v27  ;;  %v1436_v57 = vadd.f32 %v2000_v54, %v1387_v49 }
 0x126   :  { %v1439_v59 = vadd.f32 %v2003_v58, %v1390_v53 }
 0x136   :  { %v2020_v60 = vpop.f32.mrb[16].mxu0 }
 0x137   :  { %v2048_v61 = vpop.f32.mrb[16].mxu1  ;;  %v2021_v62 = vpop.f32.mrb[17].mxu0 }
 0x138   :  { %v2022_v63 = vadd.f32 %v2021_v62, %v2020_v60  ;;  %v2049_v0 = vpop.f32.mrb[17].mxu1  ;;  %v2023_v1 = vpop.f32.mrb[18].mxu0 }
 0x139   :  { %v2050_v2 = vadd.f32 %v2049_v0, %v2048_v61  ;;  %v2051_v3 = vpop.f32.mrb[18].mxu1  ;;  %v2024_v4 = vpop.f32.mrb[19].mxu0 }
 0x13a   :  { %v1477_v5 = vadd.f32 %v2022_v63, %v1428_v41  ;;  %v2025_v6 = vadd.f32 %v2024_v4, %v2023_v1  ;;  %v2052_v7 = vpop.f32.mrb[19].mxu1 }
 0x13b   :  { %v2053_v8 = vadd.f32 %v2052_v7, %v2051_v3 }
 0x13c   :  { %v1526_v9 = vadd.f32 %v2050_v2, %v1477_v5  ;;  %v1480_v10 = vadd.f32 %v2025_v6, %v1431_v43 }
 0x13e   :  { %v1529_v11 = vadd.f32 %v2053_v8, %v1480_v10  ;;  %v2026_v12 = vpop.f32.mrb[20].mxu0 }
 0x13f   :  { %v2027_v13 = vpop.f32.mrb[21].mxu0  ;;  %v2054_v16 = vpop.f32.mrb[20].mxu1 }
 0x140   :  { %v2028_v14 = vadd.f32 %v2027_v13, %v2026_v12  ;;  %v2029_v15 = vpop.f32.mrb[22].mxu0  ;;  %v2055_v20 = vpop.f32.mrb[21].mxu1 }
 0x141   :  { %v2030_v17 = vpop.f32.mrb[23].mxu0  ;;  %v2056_v21 = vadd.f32 %v2055_v20, %v2054_v16  ;;  %v2057_v22 = vpop.f32.mrb[22].mxu1 }
 0x142   :  { %v1485_v18 = vadd.f32 %v2028_v14, %v1436_v57  ;;  %v2031_v19 = vadd.f32 %v2030_v17, %v2029_v15  ;;  %v2058_v24 = vpop.f32.mrb[23].mxu1 }
 0x143   :  { %v2059_v26 = vadd.f32 %v2058_v24, %v2057_v22 }
 0x144   :  { %v1488_v23 = vadd.f32 %v2031_v19, %v1439_v59  ;;  %v1534_v25 = vadd.f32 %v2056_v21, %v1485_v18 }
 0x146   :  { %v1537_v27 = vadd.f32 %v2059_v26, %v1488_v23 }
 0x156   :  { %v2076_v28 = vpop.f32.mrb[24].mxu0 }
 0x157   :  { %v2104_v29 = vpop.f32.mrb[24].mxu1  ;;  %v2077_v30 = vpop.f32.mrb[25].mxu0 }
 0x158   :  { %v2078_v31 = vadd.f32 %v2077_v30, %v2076_v28  ;;  %v2105_v32 = vpop.f32.mrb[25].mxu1  ;;  %v2079_v33 = vpop.f32.mrb[26].mxu0 }
 0x159   :  { %v2106_v34 = vadd.f32 %v2105_v32, %v2104_v29  ;;  %v2107_v35 = vpop.f32.mrb[26].mxu1  ;;  %v2080_v36 = vpop.f32.mrb[27].mxu0 }
 0x15a   :  { %v1575_v37 = vadd.f32 %v2078_v31, %v1526_v9  ;;  %v2081_v38 = vadd.f32 %v2080_v36, %v2079_v33  ;;  %v2108_v39 = vpop.f32.mrb[27].mxu1 }
 0x15b   :  { %v2109_v41 = vadd.f32 %v2108_v39, %v2107_v35 }
 0x15c   :  { %v1624_v42 = vadd.f32 %v2106_v34, %v1575_v37  ;;  %v1578_v43 = vadd.f32 %v2081_v38, %v1529_v11 }
 0x15e   :  { %v1660_v45 = vmul.f32 %v1871_v40, %v1624_v42  ;;  %v1627_v46 = vadd.f32 %v2109_v41, %v1578_v43  ;;  %v2082_v47 = vpop.f32.mrb[28].mxu0 }
 0x15f   :  { %v2110_v48 = vpop.f32.mrb[28].mxu1  ;;  %v2083_v49 = vpop.f32.mrb[29].mxu0 }
 0x160   :  { %v1671_v50 = vadd.f32 %v1872_v44, %v1660_v45  ;;  %v1661_v51 = vmul.f32 %v1871_v40, %v1627_v46  ;;  %v2084_v52 = vadd.f32 %v2083_v49, %v2082_v47  ;;  %v2111_v53 = vpop.f32.mrb[29].mxu1  ;;  %v2085_v54 = vpop.f32.mrb[30].mxu0 }
 0x161   :  { %v2112_v55 = vadd.f32 %v2111_v53, %v2110_v48  ;;  %v2113_v56 = vpop.f32.mrb[30].mxu1  ;;  %v2086_v57 = vpop.f32.mrb[31].mxu0 }
 0x162   :  { %v1679_v58 = vmul.f32 0.2, %v1671_v50  ;;  %v1672_v59 = vadd.f32 %v1872_v44, %v1661_v51  ;;  %v1583_v60 = vadd.f32 %v2084_v52, %v1534_v25  ;;  %v2114_v61 = vpop.f32.mrb[31].mxu1  ;;  %vm1675_vm0 = vcmp.gt.f32.partialorder %v1671_v50, 0.0 }
 0x163   :  { %v2087_v62 = vadd.f32 %v2086_v57, %v2085_v54  ;;  %v2115_v63 = vadd.f32 %v2114_v61, %v2113_v56 }
 0x164   :  { %vm1676_vm1 = vcmp.gt.f32.partialorder %v1672_v59, 0.0  ;;  %v1680_v0 = vmul.f32 0.2, %v1672_v59  ;;  %v1632_v1 = vadd.f32 %v2112_v55, %v1583_v60  ;;  %v1683_v3 = vsel %vm1675_vm0, %v1671_v50, %v1679_v58 }
 0x165   :  { %v1586_v2 = vadd.f32 %v2087_v62, %v1537_v27 }
 0x166   :  { %v1684_v4 = vsel %vm1676_vm1, %v1672_v59, %v1680_v0  ;;  %v1662_v5 = vmul.f32 %v1871_v40, %v1632_v1 }
 0x167   :  { %v1884_v6 = vpack.c.bf16 %v1684_v4, %v1683_v3  ;;  %v1635_v7 = vadd.f32 %v2115_v63, %v1586_v2 }
 0x168   :  { %v1673_v8 = vadd.f32 %v1872_v44, %v1662_v5 }
 0x169   :  { %1885 = vst [vmem:[%s2765_s4] sm:$0xff] %v1884_v6   ;;  %v1663_v9 = vmul.f32 %v1871_v40, %v1635_v7 }
 0x16a   :  { %v1681_v10 = vmul.f32 0.2, %v1673_v8  ;;  %vm1677_vm2 = vcmp.gt.f32.partialorder %v1673_v8, 0.0 }
 0x16b   :  { %v1674_v11 = vadd.f32 %v1872_v44, %v1663_v9 }
 0x16c   :  { %v1685_v13 = vsel %vm1677_vm2, %v1673_v8, %v1681_v10 }
 0x16d   :  { %vm1678_vm3 = vcmp.gt.f32.partialorder %v1674_v11, 0.0  ;;  %v1682_v12 = vmul.f32 0.2, %v1674_v11 }
 0x16f   :  { %v1686_v14 = vsel %vm1678_vm3, %v1674_v11, %v1682_v12 }
 0x170   :  { %v1889_v15 = vpack.c.bf16 %v1686_v14, %v1685_v13 }
 0x172   :  { %1891 = vst [vmem:[%s2765_s4 + $0x8] sm:$0xff] %v1889_v15  }

// kernel: stage1_d_forward.7
= control target key start
LH: loop header
LB: loop body
LE: loop exit
PB: predicated region body
PF: predicated region fallthrough
CT: control target
= control target key end

     0   :  { %s2370_s1 = inlined_call_operand.vmem [shape: bf16[2048,128], index: 1, kind: input, shape index: {}]   ;;  %s2371_s0 = inlined_call_operand.vmem [shape: bf16[8,2048], index: 0, kind: input, shape index: {}]   ;;  %s2372_s2 = inlined_call_operand.vmem [shape: f32[1,128], index: 2, kind: input, shape index: {}]   ;;  %s2373_s3 = inlined_call_operand.vmem [shape: f32[1,128], index: 3, kind: input, shape index: {}]   ;;  %s2374_s4 = inlined_call_operand.vmem [shape: f32[8,128], index: 4, kind: output, shape index: {}]  }
   0x1   :  { %v1784_v0 = vld [vmem:[%s2370_s1 + $0x40] sm:$0xff]   ;;  %v1788_v4 = vld [vmem:[%s2370_s1 + $0x48] sm:$0xff]   ;;  %v1792_v8 = vld [vmem:[%s2370_s1 + $0x50] sm:$0xff]  }
   0x2   :  { %v1785_v1 = vld [vmem:[%s2370_s1 + $0xc0] sm:$0xff]   ;;  %1608 = vmatprep.subr.bf16.mxu0 %v1784_v0  ;;  %v1789_v5 = vld [vmem:[%s2370_s1 + $0xc8] sm:$0xff]   ;;  %v1793_v9 = vld [vmem:[%s2370_s1 + $0xd0] sm:$0xff]  }
   0x3   :  { %v1786_v2 = vld [vmem:[%s2370_s1] sm:$0xff]   ;;  %1630 = vmatprep.subr.bf16.mxu1 %v1785_v1  ;;  %v1790_v6 = vld [vmem:[%s2370_s1 + $0x8] sm:$0xff]   ;;  %v1794_v10 = vld [vmem:[%s2370_s1 + $0x10] sm:$0xff]  }
   0x4   :  { %v1787_v3 = vld [vmem:[%s2370_s1 + $0x80] sm:$0xff]   ;;  %1609 = vmatpush3.bf16.msra.mxu0 %v1786_v2  ;;  %v1791_v7 = vld [vmem:[%s2370_s1 + $0x88] sm:$0xff]   ;;  %v1795_v11 = vld [vmem:[%s2370_s1 + $0x90] sm:$0xff]  }
   0x5   :  { %1631 = vmatpush3.bf16.msra.mxu1 %v1787_v3  ;;  %1610 = vmatprep.subr.bf16.mxu0 %v1788_v4  ;;  %v1796_v12 = vld [vmem:[%s2370_s1 + $0x58] sm:$0xff]   ;;  %v1800_v16 = vld [vmem:[%s2370_s1 + $0x60] sm:$0xff]   ;;  %v1804_v20 = vld [vmem:[%s2370_s1 + $0x68] sm:$0xff]  }
   0x6   :  { %1632 = vmatprep.subr.bf16.mxu1 %v1789_v5  ;;  %v1797_v13 = vld [vmem:[%s2370_s1 + $0xd8] sm:$0xff]   ;;  %v1801_v17 = vld [vmem:[%s2370_s1 + $0xe0] sm:$0xff]   ;;  %v1805_v21 = vld [vmem:[%s2370_s1 + $0xe8] sm:$0xff]  }
   0x7   :  { %v1798_v14 = vld [vmem:[%s2370_s1 + $0x18] sm:$0xff]   ;;  %v1802_v18 = vld [vmem:[%s2370_s1 + $0x20] sm:$0xff]   ;;  %v1806_v22 = vld [vmem:[%s2370_s1 + $0x28] sm:$0xff]  }
   0x8   :  { %1611 = vmatpush3.bf16.msra.mxu0 %v1790_v6  ;;  %v1799_v15 = vld [vmem:[%s2370_s1 + $0x98] sm:$0xff]   ;;  %v1803_v19 = vld [vmem:[%s2370_s1 + $0xa0] sm:$0xff]   ;;  %v1807_v23 = vld [vmem:[%s2370_s1 + $0xa8] sm:$0xff]  }
   0x9   :  { %1633 = vmatpush3.bf16.msra.mxu1 %v1791_v7  ;;  %1612 = vmatprep.subr.bf16.mxu0 %v1792_v8  ;;  %v1808_v24 = vld [vmem:[%s2370_s1 + $0x70] sm:$0xff]   ;;  %v1812_v28 = vld [vmem:[%s2370_s1 + $0x78] sm:$0xff]   ;;  %v24_v32 = vld [vmem:[%s2371_s0] sm:$0xff] }
   0xa   :  { %1634 = vmatprep.subr.bf16.mxu1 %v1793_v9  ;;  %v1809_v25 = vld [vmem:[%s2370_s1 + $0xf0] sm:$0xff]   ;;  %v1813_v29 = vld [vmem:[%s2370_s1 + $0xf8] sm:$0xff]   ;;  %v25_v33 = vld [vmem:[%s2371_s0 + $0x8] sm:$0xff]  ;;  %v1462_v34 = vcombine.low %v24_v32, %v24_v32  ;;  %v1463_v35 = vcombine.high %v24_v32, %v24_v32 }
   0xb   :  { %v1810_v26 = vld [vmem:[%s2370_s1 + $0x30] sm:$0xff]   ;;  %v1814_v30 = vld [vmem:[%s2370_s1 + $0x38] sm:$0xff]   ;;  %v1464_v36 = vcombine.low %v25_v33, %v25_v33  ;;  %v1465_v37 = vcombine.high %v25_v33, %v25_v33  ;;  %v1820_v38 = vld [vmem:[%s2370_s1 + $0x140] sm:$0xff]  }
   0xc   :  { %1613 = vmatpush3.bf16.msra.mxu0 %v1794_v10  ;;  %v1811_v27 = vld [vmem:[%s2370_s1 + $0xb0] sm:$0xff]   ;;  %v1815_v31 = vld [vmem:[%s2370_s1 + $0xb8] sm:$0xff]   ;;  %v1821_v39 = vld [vmem:[%s2370_s1 + $0x1c0] sm:$0xff]   ;;  %1144 = vmatprep.mubr.bf16.mxu0 %v1463_v35 }
   0xd   :  { %1635 = vmatpush3.bf16.msra.mxu1 %v1795_v11  ;;  %1614 = vmatprep.subr.bf16.mxu0 %v1796_v12  ;;  %v1822_v40 = vld [vmem:[%s2370_s1 + $0x100] sm:$0xff]   ;;  %v1824_v42 = vld [vmem:[%s2370_s1 + $0x148] sm:$0xff]   ;;  %v1828_v46 = vld [vmem:[%s2370_s1 + $0x150] sm:$0xff]  }
   0xe   :  { %1636 = vmatprep.subr.bf16.mxu1 %v1797_v13  ;;  %1184 = vmatprep.mubr.bf16.mxu1 %v1465_v37  ;;  %v1823_v41 = vld [vmem:[%s2370_s1 + $0x180] sm:$0xff]   ;;  %v1825_v43 = vld [vmem:[%s2370_s1 + $0x1c8] sm:$0xff]   ;;  %v1829_v47 = vld [vmem:[%s2370_s1 + $0x1d0] sm:$0xff]  }
   0xf   :  { %v1826_v44 = vld [vmem:[%s2370_s1 + $0x108] sm:$0xff]   ;;  %v1830_v48 = vld [vmem:[%s2370_s1 + $0x110] sm:$0xff]   ;;  %v1832_v50 = vld [vmem:[%s2370_s1 + $0x158] sm:$0xff]  }
  0x10   :  { %1615 = vmatpush3.bf16.msra.mxu0 %v1798_v14  ;;  %v1827_v45 = vld [vmem:[%s2370_s1 + $0x188] sm:$0xff]   ;;  %v1831_v49 = vld [vmem:[%s2370_s1 + $0x190] sm:$0xff]   ;;  %v1833_v51 = vld [vmem:[%s2370_s1 + $0x1d8] sm:$0xff]  }
  0x11   :  { %1637 = vmatpush3.bf16.msra.mxu1 %v1799_v15  ;;  %1616 = vmatprep.subr.bf16.mxu0 %v1800_v16  ;;  %v1834_v52 = vld [vmem:[%s2370_s1 + $0x118] sm:$0xff]   ;;  %v1836_v54 = vld [vmem:[%s2370_s1 + $0x160] sm:$0xff]   ;;  %v1840_v58 = vld [vmem:[%s2370_s1 + $0x168] sm:$0xff]  }
  0x12   :  { %1638 = vmatprep.subr.bf16.mxu1 %v1801_v17  ;;  %v1835_v53 = vld [vmem:[%s2370_s1 + $0x198] sm:$0xff]   ;;  %v1837_v55 = vld [vmem:[%s2370_s1 + $0x1e0] sm:$0xff]   ;;  %v1841_v59 = vld [vmem:[%s2370_s1 + $0x1e8] sm:$0xff]  }
  0x13   :  { %v1838_v56 = vld [vmem:[%s2370_s1 + $0x120] sm:$0xff]   ;;  %v1842_v60 = vld [vmem:[%s2370_s1 + $0x128] sm:$0xff]   ;;  %v1844_v62 = vld [vmem:[%s2370_s1 + $0x170] sm:$0xff]  }
  0x14   :  { %1617 = vmatpush3.bf16.msra.mxu0 %v1802_v18  ;;  %v1839_v57 = vld [vmem:[%s2370_s1 + $0x1a0] sm:$0xff]   ;;  %v1843_v61 = vld [vmem:[%s2370_s1 + $0x1a8] sm:$0xff]   ;;  %v1845_v63 = vld [vmem:[%s2370_s1 + $0x1f0] sm:$0xff]  }
  0x15   :  { %1639 = vmatpush3.bf16.msra.mxu1 %v1803_v19  ;;  %1618 = vmatprep.subr.bf16.mxu0 %v1804_v20  ;;  %v1846_v0 = vld [vmem:[%s2370_s1 + $0x130] sm:$0xff]   ;;  %v1848_v2 = vld [vmem:[%s2370_s1 + $0x178] sm:$0xff]   ;;  %v1856_v12 = vld [vmem:[%s2370_s1 + $0x240] sm:$0xff]  }
  0x16   :  { %1640 = vmatprep.subr.bf16.mxu1 %v1805_v21  ;;  %v1847_v1 = vld [vmem:[%s2370_s1 + $0x1b0] sm:$0xff]   ;;  %v1849_v3 = vld [vmem:[%s2370_s1 + $0x1f8] sm:$0xff]   ;;  %v1857_v13 = vld [vmem:[%s2370_s1 + $0x2c0] sm:$0xff]  }
  0x17   :  { %v1850_v4 = vld [vmem:[%s2370_s1 + $0x138] sm:$0xff]   ;;  %v26_v6 = vld [vmem:[%s2371_s0 + $0x10] sm:$0xff]  ;;  %v1858_v14 = vld [vmem:[%s2370_s1 + $0x200] sm:$0xff]  }
  0x18   :  { %1619 = vmatpush3.bf16.msra.mxu0 %v1806_v22  ;;  %v1851_v5 = vld [vmem:[%s2370_s1 + $0x1b8] sm:$0xff]   ;;  %v1466_v7 = vcombine.low %v26_v6, %v26_v6  ;;  %v1467_v8 = vcombine.high %v26_v6, %v26_v6  ;;  %v1859_v15 = vld [vmem:[%s2370_s1 + $0x280] sm:$0xff]   ;;  %v1860_v16 = vld [vmem:[%s2370_s1 + $0x248] sm:$0xff]  }
  0x19   :  { %1641 = vmatpush3.bf16.msra.mxu1 %v1807_v23  ;;  %1620 = vmatprep.subr.bf16.mxu0 %v1808_v24  ;;  %v27_v9 = vld [vmem:[%s2371_s0 + $0x18] sm:$0xff]  ;;  %v1861_v17 = vld [vmem:[%s2370_s1 + $0x2c8] sm:$0xff]   ;;  %v1864_v20 = vld [vmem:[%s2370_s1 + $0x250] sm:$0xff]  }
  0x1a   :  { %1642 = vmatprep.subr.bf16.mxu1 %v1809_v25  ;;  %v1468_v10 = vcombine.low %v27_v9, %v27_v9  ;;  %v1469_v11 = vcombine.high %v27_v9, %v27_v9  ;;  %v1862_v18 = vld [vmem:[%s2370_s1 + $0x208] sm:$0xff]   ;;  %v1865_v21 = vld [vmem:[%s2370_s1 + $0x2d0] sm:$0xff]   ;;  %v1868_v24 = vld [vmem:[%s2370_s1 + $0x258] sm:$0xff]  }
  0x1b   :  { %v1863_v19 = vld [vmem:[%s2370_s1 + $0x288] sm:$0xff]   ;;  %v1866_v22 = vld [vmem:[%s2370_s1 + $0x210] sm:$0xff]   ;;  %v1869_v25 = vld [vmem:[%s2370_s1 + $0x2d8] sm:$0xff]  }
  0x1c   :  { %1621 = vmatpush3.bf16.msra.mxu0 %v1810_v26  ;;  %v1867_v23 = vld [vmem:[%s2370_s1 + $0x290] sm:$0xff]   ;;  %v1870_v26 = vld [vmem:[%s2370_s1 + $0x218] sm:$0xff]   ;;  %v1876_v32 = vld [vmem:[%s2370_s1 + $0x268] sm:$0xff]  }
  0x1d   :  { %1643 = vmatpush3.bf16.msra.mxu1 %v1811_v27  ;;  %1622 = vmatprep.subr.bf16.mxu0 %v1812_v28  ;;  %v1871_v27 = vld [vmem:[%s2370_s1 + $0x298] sm:$0xff]   ;;  %v1872_v28 = vld [vmem:[%s2370_s1 + $0x260] sm:$0xff]   ;;  %v1877_v33 = vld [vmem:[%s2370_s1 + $0x2e8] sm:$0xff]  }
  0x1e   :  { %1644 = vmatprep.subr.bf16.mxu1 %v1813_v29  ;;  %v1873_v29 = vld [vmem:[%s2370_s1 + $0x2e0] sm:$0xff]   ;;  %v1879_v35 = vld [vmem:[%s2370_s1 + $0x2a8] sm:$0xff]   ;;  %v1881_v37 = vld [vmem:[%s2370_s1 + $0x2f0] sm:$0xff]  }
  0x1f   :  { %v1912_v6 = vld [vmem:[%s2370_s1 + $0x368] sm:$0xff]  }
  0x20   :  { %1623 = vmatpush3.bf16.msra.mxu0 %v1814_v30  ;;  %v1874_v30 = vld [vmem:[%s2370_s1 + $0x220] sm:$0xff]   ;;  %v1915_v9 = vld [vmem:[%s2370_s1 + $0x3a8] sm:$0xff]  }
  0x21   :  { %1645 = vmatpush3.bf16.msra.mxu1 %v1815_v31  ;;  %1652 = vmatprep.subr.bf16.mxu0 %v1820_v38  ;;  %v1875_v31 = vld [vmem:[%s2370_s1 + $0x2a0] sm:$0xff]   ;;  %v1882_v38 = vld [vmem:[%s2370_s1 + $0x230] sm:$0xff]  }
  0x22   :  { %1674 = vmatprep.subr.bf16.mxu1 %v1821_v39  ;;  %v1883_v39 = vld [vmem:[%s2370_s1 + $0x2b0] sm:$0xff]  }
  0x23   :  { %1145 = vmatmul.mubr.bf16.vlgmr.msra.gmra.mrb[0].mxu0 %v1462_v34  ;;  %v1878_v34 = vld [vmem:[%s2370_s1 + $0x228] sm:$0xff]  }
  0x24   :  { %1185 = vmatmul.mubr.bf16.vlgmr.msra.gmra.mrb[0].mxu1 %v1464_v36  ;;  %1653 = vmatpush3.bf16.msra.mxu0 %v1822_v40  ;;  %v1880_v36 = vld [vmem:[%s2370_s1 + $0x270] sm:$0xff]   ;;  %v1884_v40 = vld [vmem:[%s2370_s1 + $0x278] sm:$0xff]  }
  0x25   :  { %1675 = vmatpush3.bf16.msra.mxu1 %v1823_v41  ;;  %1654 = vmatprep.subr.bf16.mxu0 %v1824_v42  ;;  %v1885_v41 = vld [vmem:[%s2370_s1 + $0x2f8] sm:$0xff]  }
  0x26   :  { %1676 = vmatprep.subr.bf16.mxu1 %v1825_v43  ;;  %1224 = vmatprep.mubr.bf16.mxu0 %v1467_v8  ;;  %v1886_v42 = vld [vmem:[%s2370_s1 + $0x238] sm:$0xff]   ;;  %v1914_v8 = vld [vmem:[%s2370_s1 + $0x328] sm:$0xff]  }
  0x27   :  { %1264 = vmatprep.mubr.bf16.mxu1 %v1469_v11  ;;  %v1887_v43 = vld [vmem:[%s2370_s1 + $0x2b8] sm:$0xff]   ;;  %v1917_v11 = vld [vmem:[%s2370_s1 + $0x3f0] sm:$0xff]  }
  0x28   :  { %1655 = vmatpush3.bf16.msra.mxu0 %v1826_v44  ;;  %v28_v44 = vld [vmem:[%s2371_s0 + $0x20] sm:$0xff] }
  0x29   :  { %1677 = vmatpush3.bf16.msra.mxu1 %v1827_v45  ;;  %1656 = vmatprep.subr.bf16.mxu0 %v1828_v46  ;;  %v29_v45 = vld [vmem:[%s2371_s0 + $0x28] sm:$0xff]  ;;  %v1470_v46 = vcombine.low %v28_v44, %v28_v44 }
  0x2a   :  { %1678 = vmatprep.subr.bf16.mxu1 %v1829_v47  ;;  %v1471_v47 = vcombine.high %v28_v44, %v28_v44 }
  0x2c   :  { %1657 = vmatpush3.bf16.msra.mxu0 %v1830_v48  ;;  %v1472_v48 = vcombine.low %v29_v45, %v29_v45 }
  0x2d   :  { %1679 = vmatpush3.bf16.msra.mxu1 %v1831_v49  ;;  %1658 = vmatprep.subr.bf16.mxu0 %v1832_v50  ;;  %v1473_v49 = vcombine.high %v29_v45, %v29_v45  ;;  %v1892_v50 = vld [vmem:[%s2370_s1 + $0x340] sm:$0xff]  }
  0x2e   :  { %1680 = vmatprep.subr.bf16.mxu1 %v1833_v51  ;;  %v1893_v51 = vld [vmem:[%s2370_s1 + $0x3c0] sm:$0xff]  }
  0x30   :  { %1659 = vmatpush3.bf16.msra.mxu0 %v1834_v52  ;;  %v1894_v52 = vld [vmem:[%s2370_s1 + $0x300] sm:$0xff]  }
  0x31   :  { %1681 = vmatpush3.bf16.msra.mxu1 %v1835_v53  ;;  %1660 = vmatprep.subr.bf16.mxu0 %v1836_v54  ;;  %v1895_v53 = vld [vmem:[%s2370_s1 + $0x380] sm:$0xff]   ;;  %v1896_v54 = vld [vmem:[%s2370_s1 + $0x348] sm:$0xff]  }
  0x32   :  { %1682 = vmatprep.subr.bf16.mxu1 %v1837_v55  ;;  %v1897_v55 = vld [vmem:[%s2370_s1 + $0x3c8] sm:$0xff]  }
  0x34   :  { %1661 = vmatpush3.bf16.msra.mxu0 %v1838_v56  ;;  %v1898_v56 = vld [vmem:[%s2370_s1 + $0x308] sm:$0xff]  }
  0x35   :  { %1683 = vmatpush3.bf16.msra.mxu1 %v1839_v57  ;;  %1662 = vmatprep.subr.bf16.mxu0 %v1840_v58  ;;  %v1899_v57 = vld [vmem:[%s2370_s1 + $0x388] sm:$0xff]   ;;  %v1900_v58 = vld [vmem:[%s2370_s1 + $0x350] sm:$0xff]  }
  0x36   :  { %1684 = vmatprep.subr.bf16.mxu1 %v1841_v59  ;;  %v1901_v59 = vld [vmem:[%s2370_s1 + $0x3d0] sm:$0xff]  }
  0x38   :  { %1663 = vmatpush3.bf16.msra.mxu0 %v1842_v60  ;;  %v1902_v60 = vld [vmem:[%s2370_s1 + $0x310] sm:$0xff]  }
  0x39   :  { %1685 = vmatpush3.bf16.msra.mxu1 %v1843_v61  ;;  %1664 = vmatprep.subr.bf16.mxu0 %v1844_v62  ;;  %v1903_v61 = vld [vmem:[%s2370_s1 + $0x390] sm:$0xff]   ;;  %v1904_v62 = vld [vmem:[%s2370_s1 + $0x358] sm:$0xff]  }
  0x3a   :  { %1686 = vmatprep.subr.bf16.mxu1 %v1845_v63  ;;  %v1905_v63 = vld [vmem:[%s2370_s1 + $0x3d8] sm:$0xff]  }
  0x3c   :  { %1665 = vmatpush3.bf16.msra.mxu0 %v1846_v0  ;;  %v1906_v0 = vld [vmem:[%s2370_s1 + $0x318] sm:$0xff]  }
  0x3d   :  { %1687 = vmatpush3.bf16.msra.mxu1 %v1847_v1  ;;  %1666 = vmatprep.subr.bf16.mxu0 %v1848_v2  ;;  %v1907_v1 = vld [vmem:[%s2370_s1 + $0x398] sm:$0xff]   ;;  %v1908_v2 = vld [vmem:[%s2370_s1 + $0x360] sm:$0xff]  }
  0x3e   :  { %1688 = vmatprep.subr.bf16.mxu1 %v1849_v3  ;;  %v1909_v3 = vld [vmem:[%s2370_s1 + $0x3e0] sm:$0xff]  }
  0x40   :  { %1667 = vmatpush3.bf16.msra.mxu0 %v1850_v4  ;;  %v1910_v4 = vld [vmem:[%s2370_s1 + $0x320] sm:$0xff]  }
  0x41   :  { %1689 = vmatpush3.bf16.msra.mxu1 %v1851_v5  ;;  %1696 = vmatprep.subr.bf16.mxu0 %v1856_v12  ;;  %v1911_v5 = vld [vmem:[%s2370_s1 + $0x3a0] sm:$0xff]   ;;  %v1918_v12 = vld [vmem:[%s2370_s1 + $0x330] sm:$0xff]  }
  0x42   :  { %1718 = vmatprep.subr.bf16.mxu1 %v1857_v13  ;;  %v1919_v13 = vld [vmem:[%s2370_s1 + $0x3b0] sm:$0xff]  }
  0x43   :  { %1225 = vmatmul.mubr.bf16.vlgmr.msra.gmra.mrb[4].mxu0 %v1466_v7  ;;  %v1913_v7 = vld [vmem:[%s2370_s1 + $0x3e8] sm:$0xff]  }
  0x44   :  { %1265 = vmatmul.mubr.bf16.vlgmr.msra.gmra.mrb[4].mxu1 %v1468_v10  ;;  %1697 = vmatpush3.bf16.msra.mxu0 %v1858_v14  ;;  %v1916_v10 = vld [vmem:[%s2370_s1 + $0x370] sm:$0xff]   ;;  %v1920_v14 = vld [vmem:[%s2370_s1 + $0x378] sm:$0xff]  }
  0x45   :  { %1719 = vmatpush3.bf16.msra.mxu1 %v1859_v15  ;;  %1698 = vmatprep.subr.bf16.mxu0 %v1860_v16  ;;  %v1921_v15 = vld [vmem:[%s2370_s1 + $0x3f8] sm:$0xff]  }
  0x46   :  { %1720 = vmatprep.subr.bf16.mxu1 %v1861_v17  ;;  %1304 = vmatprep.mubr.bf16.mxu0 %v1471_v47  ;;  %v1922_v16 = vld [vmem:[%s2370_s1 + $0x338] sm:$0xff]  }
  0x47   :  { %1344 = vmatprep.mubr.bf16.mxu1 %v1473_v49  ;;  %v1923_v17 = vld [vmem:[%s2370_s1 + $0x3b8] sm:$0xff]  }
  0x48   :  { %1699 = vmatpush3.bf16.msra.mxu0 %v1862_v18  ;;  %v30_v18 = vld [vmem:[%s2371_s0 + $0x30] sm:$0xff] }
  0x49   :  { %1721 = vmatpush3.bf16.msra.mxu1 %v1863_v19  ;;  %1700 = vmatprep.subr.bf16.mxu0 %v1864_v20  ;;  %v31_v19 = vld [vmem:[%s2371_s0 + $0x38] sm:$0xff]  ;;  %v1474_v20 = vcombine.low %v30_v18, %v30_v18 }
  0x4a   :  { %1722 = vmatprep.subr.bf16.mxu1 %v1865_v21  ;;  %v1475_v21 = vcombine.high %v30_v18, %v30_v18 }
  0x4c   :  { %1701 = vmatpush3.bf16.msra.mxu0 %v1866_v22  ;;  %v1476_v22 = vcombine.low %v31_v19, %v31_v19 }
  0x4d   :  { %1723 = vmatpush3.bf16.msra.mxu1 %v1867_v23  ;;  %1702 = vmatprep.subr.bf16.mxu0 %v1868_v24  ;;  %v1477_v23 = vcombine.high %v31_v19, %v31_v19 }
  0x4e   :  { %1724 = vmatprep.subr.bf16.mxu1 %v1869_v25 }
  0x50   :  { %1703 = vmatpush3.bf16.msra.mxu0 %v1870_v26 }
  0x51   :  { %1725 = vmatpush3.bf16.msra.mxu1 %v1871_v27  ;;  %1704 = vmatprep.subr.bf16.mxu0 %v1872_v28 }
  0x52   :  { %1726 = vmatprep.subr.bf16.mxu1 %v1873_v29 }
  0x54   :  { %1705 = vmatpush3.bf16.msra.mxu0 %v1874_v30 }
  0x55   :  { %1727 = vmatpush3.bf16.msra.mxu1 %v1875_v31  ;;  %1706 = vmatprep.subr.bf16.mxu0 %v1876_v32 }
  0x56   :  { %1728 = vmatprep.subr.bf16.mxu1 %v1877_v33 }
  0x58   :  { %1707 = vmatpush3.bf16.msra.mxu0 %v1878_v34 }
  0x59   :  { %1729 = vmatpush3.bf16.msra.mxu1 %v1879_v35  ;;  %1708 = vmatprep.subr.bf16.mxu0 %v1880_v36 }
  0x5a   :  { %1730 = vmatprep.subr.bf16.mxu1 %v1881_v37 }
  0x5c   :  { %1709 = vmatpush3.bf16.msra.mxu0 %v1882_v38 }
  0x5d   :  { %1731 = vmatpush3.bf16.msra.mxu1 %v1883_v39  ;;  %1710 = vmatprep.subr.bf16.mxu0 %v1884_v40 }
  0x5e   :  { %1732 = vmatprep.subr.bf16.mxu1 %v1885_v41 }
  0x60   :  { %1711 = vmatpush3.bf16.msra.mxu0 %v1886_v42 }
  0x61   :  { %1733 = vmatpush3.bf16.msra.mxu1 %v1887_v43  ;;  %1740 = vmatprep.subr.bf16.mxu0 %v1892_v50 }
  0x62   :  { %1762 = vmatprep.subr.bf16.mxu1 %v1893_v51 }
  0x63   :  { %1305 = vmatmul.mubr.bf16.vlgmr.msra.gmra.mrb[8].mxu0 %v1470_v46 }
  0x64   :  { %1345 = vmatmul.mubr.bf16.vlgmr.msra.gmra.mrb[8].mxu1 %v1472_v48  ;;  %1741 = vmatpush3.bf16.msra.mxu0 %v1894_v52 }
  0x65   :  { %1763 = vmatpush3.bf16.msra.mxu1 %v1895_v53  ;;  %1742 = vmatprep.subr.bf16.mxu0 %v1896_v54 }
  0x66   :  { %1764 = vmatprep.subr.bf16.mxu1 %v1897_v55  ;;  %1384 = vmatprep.mubr.bf16.mxu0 %v1475_v21 }
  0x67   :  { %1424 = vmatprep.mubr.bf16.mxu1 %v1477_v23 }
  0x68   :  { %1743 = vmatpush3.bf16.msra.mxu0 %v1898_v56 }
  0x69   :  { %1765 = vmatpush3.bf16.msra.mxu1 %v1899_v57  ;;  %1744 = vmatprep.subr.bf16.mxu0 %v1900_v58 }
  0x6a   :  { %1766 = vmatprep.subr.bf16.mxu1 %v1901_v59 }
  0x6c   :  { %1745 = vmatpush3.bf16.msra.mxu0 %v1902_v60 }
  0x6d   :  { %1767 = vmatpush3.bf16.msra.mxu1 %v1903_v61  ;;  %1746 = vmatprep.subr.bf16.mxu0 %v1904_v62 }
  0x6e   :  { %1768 = vmatprep.subr.bf16.mxu1 %v1905_v63 }
  0x70   :  { %1747 = vmatpush3.bf16.msra.mxu0 %v1906_v0 }
  0x71   :  { %1769 = vmatpush3.bf16.msra.mxu1 %v1907_v1  ;;  %1748 = vmatprep.subr.bf16.mxu0 %v1908_v2 }
  0x72   :  { %1770 = vmatprep.subr.bf16.mxu1 %v1909_v3 }
  0x74   :  { %1749 = vmatpush3.bf16.msra.mxu0 %v1910_v4 }
  0x75   :  { %1771 = vmatpush3.bf16.msra.mxu1 %v1911_v5  ;;  %1750 = vmatprep.subr.bf16.mxu0 %v1912_v6  ;;  %v1606_v6 = vld [vmem:[%s2372_s2] ss:$0 sm:$0xff] }
  0x76   :  { %1772 = vmatprep.subr.bf16.mxu1 %v1913_v7 }
  0x78   :  { %1751 = vmatpush3.bf16.msra.mxu0 %v1914_v8  ;;  %v1607_v8 = vld [vmem:[%s2373_s3] ss:$0 sm:$0xff] }
  0x79   :  { %1773 = vmatpush3.bf16.msra.mxu1 %v1915_v9  ;;  %1752 = vmatprep.subr.bf16.mxu0 %v1916_v10 }
  0x7a   :  { %1774 = vmatprep.subr.bf16.mxu1 %v1917_v11 }
  0x7c   :  { %1753 = vmatpush3.bf16.msra.mxu0 %v1918_v12 }
  0x7d   :  { %1775 = vmatpush3.bf16.msra.mxu1 %v1919_v13  ;;  %1754 = vmatprep.subr.bf16.mxu0 %v1920_v14 }
  0x7e   :  { %1776 = vmatprep.subr.bf16.mxu1 %v1921_v15 }
  0x80   :  { %1755 = vmatpush3.bf16.msra.mxu0 %v1922_v16 }
  0x81   :  { %1777 = vmatpush3.bf16.msra.mxu1 %v1923_v17 }
  0x83   :  { %1385 = vmatmul.mubr.bf16.vlgmr.msra.gmra.mrb[12].mxu0 %v1474_v20 }
  0x84   :  { %1425 = vmatmul.mubr.bf16.vlgmr.msra.gmra.mrb[12].mxu1 %v1476_v22 }
  0xf6   :  { %v1624_v24 = vpop.f32.mrb[0].mxu0 }
  0xf7   :  { %v1646_v25 = vpop.f32.mrb[0].mxu1  ;;  %v1625_v26 = vpop.f32.mrb[1].mxu0 }
  0xf8   :  { %v1647_v27 = vpop.f32.mrb[1].mxu1  ;;  %v1626_v28 = vadd.f32 %v1625_v26, %v1624_v24  ;;  %v1627_v30 = vpop.f32.mrb[2].mxu0 }
  0xf9   :  { %v1648_v29 = vadd.f32 %v1647_v27, %v1646_v25  ;;  %v1649_v31 = vpop.f32.mrb[2].mxu1  ;;  %v1628_v32 = vpop.f32.mrb[3].mxu0 }
  0xfa   :  { %v1650_v33 = vpop.f32.mrb[3].mxu1 }
  0xfb   :  { %v1187_v34 = vadd.f32 %v1648_v29, %v1626_v28 }
 0x116   :  { %v1668_v35 = vpop.f32.mrb[4].mxu0 }
 0x117   :  { %v1690_v36 = vpop.f32.mrb[4].mxu1  ;;  %v1669_v37 = vpop.f32.mrb[5].mxu0 }
 0x118   :  { %v1691_v38 = vpop.f32.mrb[5].mxu1  ;;  %v1670_v39 = vadd.f32 %v1669_v37, %v1668_v35  ;;  %v1671_v41 = vpop.f32.mrb[6].mxu0 }
 0x119   :  { %v1692_v40 = vadd.f32 %v1691_v38, %v1690_v36  ;;  %v1693_v42 = vpop.f32.mrb[6].mxu1  ;;  %v1672_v43 = vpop.f32.mrb[7].mxu0 }
 0x11a   :  { %v1694_v44 = vpop.f32.mrb[7].mxu1  ;;  %v1227_v45 = vadd.f32 %v1670_v39, %v1187_v34 }
 0x11c   :  { %v1267_v46 = vadd.f32 %v1692_v40, %v1227_v45 }
 0x136   :  { %v1712_v47 = vpop.f32.mrb[8].mxu0 }
 0x137   :  { %v1734_v48 = vpop.f32.mrb[8].mxu1  ;;  %v1713_v49 = vpop.f32.mrb[9].mxu0 }
 0x138   :  { %v1714_v50 = vadd.f32 %v1713_v49, %v1712_v47  ;;  %v1735_v51 = vpop.f32.mrb[9].mxu1  ;;  %v1715_v52 = vpop.f32.mrb[10].mxu0 }
 0x139   :  { %v1736_v53 = vadd.f32 %v1735_v51, %v1734_v48  ;;  %v1737_v54 = vpop.f32.mrb[10].mxu1  ;;  %v1716_v55 = vpop.f32.mrb[11].mxu0 }
 0x13a   :  { %v1307_v56 = vadd.f32 %v1714_v50, %v1267_v46  ;;  %v1738_v57 = vpop.f32.mrb[11].mxu1 }
 0x13c   :  { %v1347_v58 = vadd.f32 %v1736_v53, %v1307_v56 }
 0x156   :  { %v1756_v59 = vpop.f32.mrb[12].mxu0 }
 0x157   :  { %v1778_v60 = vpop.f32.mrb[12].mxu1  ;;  %v1757_v61 = vpop.f32.mrb[13].mxu0 }
 0x158   :  { %v1758_v62 = vadd.f32 %v1757_v61, %v1756_v59  ;;  %v1779_v63 = vpop.f32.mrb[13].mxu1  ;;  %v1759_v0 = vpop.f32.mrb[14].mxu0 }
 0x159   :  { %v1780_v1 = vadd.f32 %v1779_v63, %v1778_v60  ;;  %v1781_v2 = vpop.f32.mrb[14].mxu1  ;;  %v1760_v3 = vpop.f32.mrb[15].mxu0 }
 0x15a   :  { %v1387_v4 = vadd.f32 %v1758_v62, %v1347_v58  ;;  %v1782_v5 = vpop.f32.mrb[15].mxu1 }
 0x15c   :  { %v1427_v7 = vadd.f32 %v1780_v1, %v1387_v4 }
 0x15e   :  { %v1445_v9 = vmul.f32 %v1606_v6, %v1427_v7 }
 0x160   :  { %v1453_v10 = vadd.f32 %v1607_v8, %v1445_v9 }
 0x162   :  { %vm1454_vm0 = vcmp.gt.f32.partialorder %v1453_v10, 0.0  ;;  %v1455_v11 = vmul.f32 0.2, %v1453_v10 }
 0x164   :  { %v1456_v12 = vsel %vm1454_vm0, %v1453_v10, %v1455_v11 }
 0x165   :  { %1457 = vst [vmem:[%s2374_s4] sm:$0xff] %v1456_v12 }

</bundles_post_ra>
